<compile_context>
chip_gen: v5e
topology: v5e:2x2
jax: 0.10.0
libtpu: 0.0.40
codegen_flags: <defaults>
</compile_context>

<pallas_src>
import functools
import math

import jax
import jax.numpy as jnp
from jax.experimental import pallas as pl
from jax.experimental.pallas import tpu as pltpu


NEG_INF = -1e18
LN_EPS = 1e-6  # TODO(synk): c2nl LayerNorm uses 1e-6; torch default is 1e-5.


def _vmem_limit_bytes():
    """Scoped-VMEM cap from the actual part (64 MiB v7x / 128 MiB v5e-v6e)."""
    try:
        cap = getattr(pltpu.get_tpu_info(), "vmem_capacity_bytes", None)
        if cap:
            return int(cap) * 3 // 4          # 25% headroom
    except Exception:
        pass
    return 64 * 1024 * 1024


# ----------------------------------------------------------------------------
# In-kernel helpers (traced inside the fused decoder kernel)
# ----------------------------------------------------------------------------
def _linear(x_b, w_ref, b_ref):
    """x @ W + b; x already in the weight dtype (bf16), f32 accumulation."""
    return jnp.dot(x_b, w_ref[0], preferred_element_type=jnp.float32) + b_ref[0]


def _layernorm(x, g_ref, b_ref):
    mu = jnp.mean(x, axis=-1, keepdims=True)
    var = jnp.mean(jnp.square(x - mu), axis=-1, keepdims=True)
    return (x - mu) * jax.lax.rsqrt(var + LN_EPS) * g_ref[0] + b_ref[0]


def _attend(q, k, v, mask_add, heads, d_k, d_v, need_probs=False):
    """All-heads-at-once scaled-dot attention.

    q: [Lq, H*dk] bf16 (1/sqrt(d_k) already folded into the Q weights)
    k: [Lk, H*dk] bf16, v: [Lk, H*dv] bf16
    mask_add: [Lq or 1, Lk] additive f32 mask (0 / -1e18)
    Returns (context [Lq, H*dv] f32,
             exactly-normalised head-0 probabilities [Lq, Lk] f32 or None).
    """
    Lq, Lk = q.shape[0], k.shape[0]
    qh = jnp.swapaxes(q.reshape(Lq, heads, d_k), 0, 1)       # [H, Lq, dk]
    kh = jnp.swapaxes(k.reshape(Lk, heads, d_k), 0, 1)       # [H, Lk, dk]
    vh = jnp.swapaxes(v.reshape(Lk, heads, d_v), 0, 1)       # [H, Lk, dv]
    sc = jnp.einsum("hqd,hkd->hqk", qh, kh,
                    preferred_element_type=jnp.float32) + mask_add[None]
    m = jnp.max(sc, axis=-1, keepdims=True)
    e = jnp.exp(sc - m)
    denom = jnp.sum(e, axis=-1, keepdims=True)
    p = e * pl.reciprocal(denom, approx=True)                 # EUP slot
    ctx = jnp.einsum("hqk,hkd->hqd", p.astype(jnp.bfloat16), vh,
                     preferred_element_type=jnp.float32)      # [H, Lq, dv]
    ctx = jnp.swapaxes(ctx, 0, 1).reshape(Lq, heads * d_v)
    p0 = (e[0] / denom[0]) if need_probs else None            # exact for export
    return ctx, p0


# ----------------------------------------------------------------------------
# Fused decoder kernel: one grid step == (batch element, layer)
# ----------------------------------------------------------------------------
def fused_decoder_layer_kernel(
        # per-batch activations & additive pad masks (resident across layers)
        x_ref, mem_ref, gnn_ref, tgt_add_ref, src_add_ref, node_add_ref,
        # per-layer stacked weights (block l selected by the layer grid axis)
        sa_wqkv, sa_bqkv, sa_wo, sa_bo, ln1_g, ln1_b,
        ca_wq, ca_bq, ca_wkv, ca_bkv, ca_wo, ca_bo, ln2_g, ln2_b,
        ga_wq, ga_bq, ga_wkv, ga_bkv, ga_wo, ga_bo,
        ffn_g, ffn_b, w1, b1, w2, b2,
        # outputs (written only on the final layer step)
        out_ref, ctx_attn_ref, gnn_attn_ref,
        # VMEM scratch: activation carried across layer steps
        act_ref,
        *, heads, d_k, d_v):
    layer = pl.program_id(1)
    last = pl.num_programs(1) - 1
    hk = heads * d_k
    Lt = act_ref.shape[0]

    @pl.when(layer == 0)
    def _():
        act_ref[...] = x_ref[0].astype(jnp.float32)

    x = act_ref[...]                       # [Lt, D] f32 (residual path)
    mem = mem_ref[0]                       # [Ls, D] bf16 (MXU-ready)
    gnn = gnn_ref[0]                       # [Ln, D] bf16

    # Decoder self-attn mask: causal term from iota (no [B,Lt,Lt] HBM traffic)
    # plus the per-batch additive key-pad mask.
    row = jax.lax.broadcasted_iota(jnp.int32, (Lt, Lt), 0)
    col = jax.lax.broadcasted_iota(jnp.int32, (Lt, Lt), 1)
    dec_add = jnp.where(col > row, NEG_INF, 0.0) + tgt_add_ref[0]   # [Lt, Lt]
    src_add = src_add_ref[0]               # [1, Ls]
    node_add = node_add_ref[0]             # [1, Ln]

    # --- masked self-attention + residual + LayerNorm ------------------------
    qkv = _linear(x.astype(jnp.bfloat16), sa_wqkv, sa_bqkv).astype(jnp.bfloat16)
    ctx, _ = _attend(qkv[:, :hk], qkv[:, hk:2 * hk], qkv[:, 2 * hk:],
                     dec_add, heads, d_k, d_v)
    sa = _linear(ctx.astype(jnp.bfloat16), sa_wo, sa_bo)
    query_norm = _layernorm(sa + x, ln1_g, ln1_b)

    # --- memory-bank cross-attention + residual + LayerNorm ------------------
    q = _linear(query_norm.astype(jnp.bfloat16), ca_wq, ca_bq).astype(jnp.bfloat16)
    kv = _linear(mem, ca_wkv, ca_bkv).astype(jnp.bfloat16)
    ctx, p0 = _attend(q, kv[:, :hk], kv[:, hk:], src_add, heads, d_k, d_v,
                      need_probs=True)
    mid = _linear(ctx.astype(jnp.bfloat16), ca_wo, ca_bo)
    mid_norm = _layernorm(mid + query_norm, ln2_g, ln2_b)

    # --- GNN-node cross-attention (has_gnn_attn=True) -------------------------
    q = _linear(mid_norm.astype(jnp.bfloat16), ga_wq, ga_bq).astype(jnp.bfloat16)
    kv = _linear(gnn, ga_wkv, ga_bkv).astype(jnp.bfloat16)
    ctx, g0 = _attend(q, kv[:, :hk], kv[:, hk:], node_add, heads, d_k, d_v,
                      need_probs=True)
    gout = _linear(ctx.astype(jnp.bfloat16), ga_wo, ga_bo)

    # --- position-wise FFN: W2(relu(W1(LN(x)))) + x ---------------------------
    ffn_in = gout + mid_norm
    h = jnp.maximum(
        _linear(_layernorm(ffn_in, ffn_g, ffn_b).astype(jnp.bfloat16), w1, b1),
        0.0)
    layer_out = _linear(h.astype(jnp.bfloat16), w2, b2) + ffn_in
    act_ref[...] = layer_out               # carry to the next layer step (VMEM)

    # Only the final layer's outputs are consumed downstream; earlier layers
    # skip the stores and the single HBM writeback happens once per batch.
    @pl.when(layer == last)
    def _():
        out_ref[0] = layer_out.astype(out_ref.dtype)
        ctx_attn_ref[0] = p0.astype(ctx_attn_ref.dtype)
        gnn_attn_ref[0] = g0.astype(gnn_attn_ref.dtype)


# ----------------------------------------------------------------------------
# pallas_call wrapper: one launch for the whole decoder stack
# ----------------------------------------------------------------------------
_WEIGHT_KEYS = ("sa_wqkv", "sa_bqkv", "sa_wo", "sa_bo", "ln1_g", "ln1_b",
                "ca_wq", "ca_bq", "ca_wkv", "ca_bkv", "ca_wo", "ca_bo",
                "ln2_g", "ln2_b",
                "ga_wq", "ga_bq", "ga_wkv", "ga_bkv", "ga_wo", "ga_bo",
                "ffn_g", "ffn_b", "w1", "b1", "w2", "b2")


def pallas_decoder_stack(x, memory, gnn, tgt_add, src_add, node_add, params, *,
                         heads, d_k, d_v):
    B, Lt, D = x.shape
    Ls = memory.shape[1]
    Ln = gnn.shape[1]
    weight_args = tuple(params[k] for k in _WEIGHT_KEYS)
    nlayers = weight_args[0].shape[0]

    def per_batch(shape):               # activations/masks: block follows b only
        return pl.BlockSpec((1,) + shape, lambda b, l: (b, 0, 0))

    def per_layer(arr):                 # stacked weights: block follows l only
        return pl.BlockSpec((1,) + arr.shape[1:], lambda b, l: (l, 0, 0))

    kern = functools.partial(fused_decoder_layer_kernel,
                             heads=heads, d_k=d_k, d_v=d_v)
    out, ctx_attn, gnn_attn = pl.pallas_call(
        kern,
        out_shape=(jax.ShapeDtypeStruct((B, Lt, D), jnp.float32),
                   jax.ShapeDtypeStruct((B, Lt, Ls), jnp.float32),
                   jax.ShapeDtypeStruct((B, Lt, Ln), jnp.float32)),
        grid=(B, nlayers),
        in_specs=[per_batch((Lt, D)), per_batch((Ls, D)), per_batch((Ln, D)),
                  per_batch((1, Lt)), per_batch((1, Ls)), per_batch((1, Ln))]
                 + [per_layer(w) for w in weight_args],
        out_specs=(per_batch((Lt, D)), per_batch((Lt, Ls)),
                   per_batch((Lt, Ln))),
        scratch_shapes=[pltpu.VMEM((Lt, D), jnp.float32)],
        compiler_params=pltpu.CompilerParams(
            dimension_semantics=("parallel", "arbitrary"),   # megacore on batch
            vmem_limit_bytes=_vmem_limit_bytes()),
    )(x, memory, gnn, tgt_add, src_add, node_add, *weight_args)
    return out, ctx_attn, gnn_attn


# ----------------------------------------------------------------------------
# Decoder forward (mirrors IdentiDecoder.forward, split_decoder=False, eval)
# ----------------------------------------------------------------------------
def identi_decoder_forward(params, memory_bank, memory_len, tgt_pad_mask,
                           tgt_emb, gnn, lengths_node, heads, d_k, d_v):
    B, Lt, _ = tgt_emb.shape
    Ls = memory_bank.shape[1]
    Ln = gnn.shape[1]
    neg = jnp.float32(NEG_INF)

    # init_decoder: pad masks from lengths, precomputed in ADDITIVE form.
    src_pad = jnp.arange(Ls)[None, :] >= memory_len[:, None]          # [B, Ls]
    node_pad = jnp.arange(Ln)[None, :] >= lengths_node[:, None]       # [B, Ln]
    tgt_add = jnp.where(tgt_pad_mask.astype(jnp.float32) > 0.5,
                        neg, 0.0)[:, None, :]                          # [B,1,Lt]
    src_add = jnp.where(src_pad, neg, 0.0).astype(jnp.float32)[:, None, :]
    node_add = jnp.where(node_pad, neg, 0.0).astype(jnp.float32)[:, None, :]

    out, ctx_attn, gnn_attn = pallas_decoder_stack(
        tgt_emb.astype(jnp.float32),
        memory_bank.astype(jnp.bfloat16),      # MXU operand; cast once here
        gnn.astype(jnp.bfloat16),
        tgt_add, src_add, node_add, params,
        heads=heads, d_k=d_k, d_v=d_v)
    return out, {"std": ctx_attn, "gnn": gnn_attn}


# ----------------------------------------------------------------------------
# Deterministic parameter init (stacked per-layer, pre-packed for the kernel)
# ----------------------------------------------------------------------------
def init_params(key, nlayers, d_model, heads, d_k, d_v, d_ff,
                weight_dtype=jnp.bfloat16):
    hk, hv = heads * d_k, heads * d_v
    q_scale = 1.0 / math.sqrt(d_k)

    def proj(k, i, o):
        return jax.random.normal(k, (nlayers, i, o), jnp.float32) * 0.05

    def zeros(o):
        return jnp.zeros((nlayers, 1, o), jnp.float32)

    def ones(o):
        return jnp.ones((nlayers, 1, o), jnp.float32)

    ks = jax.random.split(key, 14)
    sa_wq = proj(ks[0], d_model, hk) * q_scale     # fold 1/sqrt(d_k) into Q
    sa_wk = proj(ks[1], d_model, hk)
    sa_wv = proj(ks[2], d_model, hv)
    ca_wq = proj(ks[4], d_model, hk) * q_scale
    ca_wk = proj(ks[5], d_model, hk)
    ca_wv = proj(ks[6], d_model, hv)
    ga_wq = proj(ks[8], d_model, hk) * q_scale
    ga_wk = proj(ks[9], d_model, hk)
    ga_wv = proj(ks[10], d_model, hv)

    return dict(
        sa_wqkv=jnp.concatenate([sa_wq, sa_wk, sa_wv], axis=2).astype(weight_dtype),
        sa_bqkv=zeros(2 * hk + hv),
        sa_wo=proj(ks[3], hv, d_model).astype(weight_dtype), sa_bo=zeros(d_model),
        ln1_g=ones(d_model), ln1_b=zeros(d_model),
        ca_wq=ca_wq.astype(weight_dtype), ca_bq=zeros(hk),
        ca_wkv=jnp.concatenate([ca_wk, ca_wv], axis=2).astype(weight_dtype),
        ca_bkv=zeros(hk + hv),
        ca_wo=proj(ks[7], hv, d_model).astype(weight_dtype), ca_bo=zeros(d_model),
        ln2_g=ones(d_model), ln2_b=zeros(d_model),
        ga_wq=ga_wq.astype(weight_dtype), ga_bq=zeros(hk),
        ga_wkv=jnp.concatenate([ga_wk, ga_wv], axis=2).astype(weight_dtype),
        ga_bkv=zeros(hk + hv),
        ga_wo=proj(ks[11], hv, d_model).astype(weight_dtype), ga_bo=zeros(d_model),
        ffn_g=ones(d_model), ffn_b=zeros(d_model),
        w1=proj(ks[12], d_model, d_ff).astype(weight_dtype), b1=zeros(d_ff),
        w2=proj(ks[13], d_ff, d_model).astype(weight_dtype), b2=zeros(d_model),
    )


# ----------------------------------------------------------------------------
if __name__ == "__main__":
    # small config consistent with the module's __init__
    nlayers, d_model, heads, d_k, d_v, d_ff = 2, 32, 4, 8, 8, 64
    B, Lt, Ls, Ln = 2, 8, 16, 8

    root = jax.random.PRNGKey(0)
    kp, k1, k2, k3 = jax.random.split(root, 4)
    params = init_params(kp, nlayers, d_model, heads, d_k, d_v, d_ff)

    memory_bank = jax.random.normal(k1, (B, Ls, d_model), jnp.float32)
    tgt_emb = jax.random.normal(k2, (B, Lt, d_model), jnp.float32)
    gnn = jax.random.normal(k3, (B, Ln, d_model), jnp.float32)
    memory_len = jnp.array([16, 12], jnp.int32)
    lengths_node = jnp.array([8, 6], jnp.int32)
    # tgt_pad_mask: 1 where padded
    tgt_pad_mask = jnp.array(
        [[0, 0, 0, 0, 0, 0, 0, 0],
         [0, 0, 0, 0, 0, 0, 1, 1]], jnp.float32)

    fwd = jax.jit(functools.partial(identi_decoder_forward,
                                    heads=heads, d_k=d_k, d_v=d_v))
    dec_out, attns = fwd(params, memory_bank, memory_len, tgt_pad_mask,
                         tgt_emb, gnn, lengths_node)
    jax.block_until_ready((dec_out, attns))

    assert dec_out.shape == (B, Lt, d_model)
    assert attns["std"].shape == (B, Lt, Ls)
    assert attns["gnn"].shape == (B, Lt, Ln)
    assert bool(jnp.all(jnp.isfinite(dec_out)))
    assert bool(jnp.all(jnp.isfinite(attns["std"])))
    assert bool(jnp.all(jnp.isfinite(attns["gnn"])))
    # exported attention rows should be (exactly-normalised) distributions
    assert bool(jnp.all(jnp.abs(jnp.sum(attns["std"], -1) - 1.0) < 1e-3))
    assert bool(jnp.all(jnp.abs(jnp.sum(attns["gnn"], -1) - 1.0) < 1e-3))
    print("KERNEL_OK")
</pallas_src>

<mosaic_0001>
module attributes {stable_mosaic.version = 11 : i64} {
  func.func @fused_decoder_layer_kernel(%arg0: i32, %arg1: i32, %arg2: memref<1x8x32xf32, #tpu.memory_space<vmem>>, %arg3: memref<1x16x32xbf16, #tpu.memory_space<vmem>>, %arg4: memref<1x8x32xbf16, #tpu.memory_space<vmem>>, %arg5: memref<1x1x8xf32, #tpu.memory_space<vmem>>, %arg6: memref<1x1x16xf32, #tpu.memory_space<vmem>>, %arg7: memref<1x1x8xf32, #tpu.memory_space<vmem>>, %arg8: memref<1x32x96xbf16, #tpu.memory_space<vmem>>, %arg9: memref<1x1x96xf32, #tpu.memory_space<vmem>>, %arg10: memref<1x32x32xbf16, #tpu.memory_space<vmem>>, %arg11: memref<1x1x32xf32, #tpu.memory_space<vmem>>, %arg12: memref<1x1x32xf32, #tpu.memory_space<vmem>>, %arg13: memref<1x1x32xf32, #tpu.memory_space<vmem>>, %arg14: memref<1x32x32xbf16, #tpu.memory_space<vmem>>, %arg15: memref<1x1x32xf32, #tpu.memory_space<vmem>>, %arg16: memref<1x32x64xbf16, #tpu.memory_space<vmem>>, %arg17: memref<1x1x64xf32, #tpu.memory_space<vmem>>, %arg18: memref<1x32x32xbf16, #tpu.memory_space<vmem>>, %arg19: memref<1x1x32xf32, #tpu.memory_space<vmem>>, %arg20: memref<1x1x32xf32, #tpu.memory_space<vmem>>, %arg21: memref<1x1x32xf32, #tpu.memory_space<vmem>>, %arg22: memref<1x32x32xbf16, #tpu.memory_space<vmem>>, %arg23: memref<1x1x32xf32, #tpu.memory_space<vmem>>, %arg24: memref<1x32x64xbf16, #tpu.memory_space<vmem>>, %arg25: memref<1x1x64xf32, #tpu.memory_space<vmem>>, %arg26: memref<1x32x32xbf16, #tpu.memory_space<vmem>>, %arg27: memref<1x1x32xf32, #tpu.memory_space<vmem>>, %arg28: memref<1x1x32xf32, #tpu.memory_space<vmem>>, %arg29: memref<1x1x32xf32, #tpu.memory_space<vmem>>, %arg30: memref<1x32x64xbf16, #tpu.memory_space<vmem>>, %arg31: memref<1x1x64xf32, #tpu.memory_space<vmem>>, %arg32: memref<1x64x32xbf16, #tpu.memory_space<vmem>>, %arg33: memref<1x1x32xf32, #tpu.memory_space<vmem>>, %arg34: memref<1x8x32xf32, #tpu.memory_space<vmem>>, %arg35: memref<1x8x16xf32, #tpu.memory_space<vmem>>, %arg36: memref<1x8x8xf32, #tpu.memory_space<vmem>>, %arg37: memref<8x32xf32, #tpu.memory_space<vmem>>) attributes {dimension_semantics = [#tpu.dimension_semantics<parallel>, #tpu.dimension_semantics<arbitrary>], iteration_bounds = array<i64: 2, 2>, scalar_prefetch = 0 : i64, scratch_operands = 1 : i64, tpu.core_type = #tpu.core_type<tc>, window_params = [{transform_indices = @transform_0, window_bounds = array<i64: 1, 8, 32>}, {transform_indices = @transform_1, window_bounds = array<i64: 1, 16, 32>}, {transform_indices = @transform_2, window_bounds = array<i64: 1, 8, 32>}, {transform_indices = @transform_3, window_bounds = array<i64: 1, 1, 8>}, {transform_indices = @transform_4, window_bounds = array<i64: 1, 1, 16>}, {transform_indices = @transform_5, window_bounds = array<i64: 1, 1, 8>}, {transform_indices = @transform_6, window_bounds = array<i64: 1, 32, 96>}, {transform_indices = @transform_7, window_bounds = array<i64: 1, 1, 96>}, {transform_indices = @transform_8, window_bounds = array<i64: 1, 32, 32>}, {transform_indices = @transform_9, window_bounds = array<i64: 1, 1, 32>}, {transform_indices = @transform_10, window_bounds = array<i64: 1, 1, 32>}, {transform_indices = @transform_11, window_bounds = array<i64: 1, 1, 32>}, {transform_indices = @transform_12, window_bounds = array<i64: 1, 32, 32>}, {transform_indices = @transform_13, window_bounds = array<i64: 1, 1, 32>}, {transform_indices = @transform_14, window_bounds = array<i64: 1, 32, 64>}, {transform_indices = @transform_15, window_bounds = array<i64: 1, 1, 64>}, {transform_indices = @transform_16, window_bounds = array<i64: 1, 32, 32>}, {transform_indices = @transform_17, window_bounds = array<i64: 1, 1, 32>}, {transform_indices = @transform_18, window_bounds = array<i64: 1, 1, 32>}, {transform_indices = @transform_19, window_bounds = array<i64: 1, 1, 32>}, {transform_indices = @transform_20, window_bounds = array<i64: 1, 32, 32>}, {transform_indices = @transform_21, window_bounds = array<i64: 1, 1, 32>}, {transform_indices = @transform_22, window_bounds = array<i64: 1, 32, 64>}, {transform_indices = @transform_23, window_bounds = array<i64: 1, 1, 64>}, {transform_indices = @transform_24, window_bounds = array<i64: 1, 32, 32>}, {transform_indices = @transform_25, window_bounds = array<i64: 1, 1, 32>}, {transform_indices = @transform_26, window_bounds = array<i64: 1, 1, 32>}, {transform_indices = @transform_27, window_bounds = array<i64: 1, 1, 32>}, {transform_indices = @transform_28, window_bounds = array<i64: 1, 32, 64>}, {transform_indices = @transform_29, window_bounds = array<i64: 1, 1, 64>}, {transform_indices = @transform_30, window_bounds = array<i64: 1, 64, 32>}, {transform_indices = @transform_31, window_bounds = array<i64: 1, 1, 32>}, {transform_indices = @transform_32, window_bounds = array<i64: 1, 8, 32>}, {transform_indices = @transform_33, window_bounds = array<i64: 1, 8, 16>}, {transform_indices = @transform_34, window_bounds = array<i64: 1, 8, 8>}]} {
    %c0_i32 = arith.constant 0 : i32
    %0 = arith.cmpi eq, %arg1, %c0_i32 : i32
    %1 = arith.extui %0 : i1 to i32
    %c0_i32_0 = arith.constant 0 : i32
    %2 = arith.cmpi ne, %1, %c0_i32_0 : i32
    scf.if %2 {
      %c0_137 = arith.constant 0 : index
      %c0_138 = arith.constant 0 : index
      %c0_139 = arith.constant 0 : index
      %284 = vector.load %arg2[%c0_137, %c0_138, %c0_139] : memref<1x8x32xf32, #tpu.memory_space<vmem>>, vector<1x8x32xf32>
      %285 = vector.shape_cast %284 : vector<1x8x32xf32> to vector<8x32xf32>
      %c0_140 = arith.constant 0 : index
      %c0_141 = arith.constant 0 : index
      %286 = vector.load %arg37[%c0_140, %c0_141] : memref<8x32xf32, #tpu.memory_space<vmem>>, vector<8x32xf32>
      tpu.vector_store %arg37[%c0_140, %c0_141], %285 {strides = array<i32>} : memref<8x32xf32, #tpu.memory_space<vmem>>, vector<8x32xf32>,
    } else {
    }
    %c0 = arith.constant 0 : index
    %c0_1 = arith.constant 0 : index
    %3 = vector.load %arg37[%c0, %c0_1] : memref<8x32xf32, #tpu.memory_space<vmem>>, vector<8x32xf32>
    %c0_2 = arith.constant 0 : index
    %c0_3 = arith.constant 0 : index
    %c0_4 = arith.constant 0 : index
    %4 = vector.load %arg3[%c0_2, %c0_3, %c0_4] : memref<1x16x32xbf16, #tpu.memory_space<vmem>>, vector<1x16x32xbf16>
    %5 = vector.shape_cast %4 : vector<1x16x32xbf16> to vector<16x32xbf16>
    %c0_5 = arith.constant 0 : index
    %c0_6 = arith.constant 0 : index
    %c0_7 = arith.constant 0 : index
    %6 = vector.load %arg4[%c0_5, %c0_6, %c0_7] : memref<1x8x32xbf16, #tpu.memory_space<vmem>>, vector<1x8x32xbf16>
    %7 = vector.shape_cast %6 : vector<1x8x32xbf16> to vector<8x32xbf16>
    %8 = tpu.iota {dimensions = array<i32: 0>} : vector<8x8xi32>
    %9 = tpu.iota {dimensions = array<i32: 1>} : vector<8x8xi32>
    %10 = arith.cmpi sgt, %9, %8 : vector<8x8xi32>
    %cst = arith.constant -9.99999984E+17 : f32
    %cst_8 = arith.constant 0.000000e+00 : f32
    %11 = vector.broadcast %cst : f32 to vector<8x8xf32>
    %12 = vector.broadcast %cst_8 : f32 to vector<8x8xf32>
    %13 = arith.select %10, %11, %12 : vector<8x8xi1>, vector<8x8xf32>
    %c0_9 = arith.constant 0 : index
    %c0_10 = arith.constant 0 : index
    %c0_11 = arith.constant 0 : index
    %14 = vector.load %arg5[%c0_9, %c0_10, %c0_11] : memref<1x1x8xf32, #tpu.memory_space<vmem>>, vector<1x1x8xf32>
    %15 = vector.shape_cast %14 : vector<1x1x8xf32> to vector<1x8xf32>
    %16 = vector.broadcast %15 : vector<1x8xf32> to vector<8x8xf32>
    %17 = arith.addf %13, %16 : vector<8x8xf32>
    %c0_12 = arith.constant 0 : index
    %c0_13 = arith.constant 0 : index
    %c0_14 = arith.constant 0 : index
    %18 = vector.load %arg6[%c0_12, %c0_13, %c0_14] : memref<1x1x16xf32, #tpu.memory_space<vmem>>, vector<1x1x16xf32>
    %19 = vector.shape_cast %18 : vector<1x1x16xf32> to vector<1x16xf32>
    %c0_15 = arith.constant 0 : index
    %c0_16 = arith.constant 0 : index
    %c0_17 = arith.constant 0 : index
    %20 = vector.load %arg7[%c0_15, %c0_16, %c0_17] : memref<1x1x8xf32, #tpu.memory_space<vmem>>, vector<1x1x8xf32>
    %21 = vector.shape_cast %20 : vector<1x1x8xf32> to vector<1x8xf32>
    %22 = arith.truncf %3 : vector<8x32xf32> to vector<8x32xbf16>
    %c0_18 = arith.constant 0 : index
    %c0_19 = arith.constant 0 : index
    %c0_20 = arith.constant 0 : index
    %23 = vector.load %arg8[%c0_18, %c0_19, %c0_20] : memref<1x32x96xbf16, #tpu.memory_space<vmem>>, vector<1x32x96xbf16>
    %24 = vector.shape_cast %23 : vector<1x32x96xbf16> to vector<32x96xbf16>
    %cst_21 = arith.constant dense<0.000000e+00> : vector<8x96xf32>
    %25 = tpu.matmul %22, %24, %cst_21 {dimension_numbers = #tpu.dot_dimension_numbers<[1], [0], [0], [1], [0, 0, 1, 1], [], []>} : vector<8x32xbf16>, vector<32x96xbf16>, vector<8x96xf32> -> vector<8x96xf32>
    %c0_22 = arith.constant 0 : index
    %c0_23 = arith.constant 0 : index
    %c0_24 = arith.constant 0 : index
    %26 = vector.load %arg9[%c0_22, %c0_23, %c0_24] : memref<1x1x96xf32, #tpu.memory_space<vmem>>, vector<1x1x96xf32>
    %27 = vector.shape_cast %26 : vector<1x1x96xf32> to vector<1x96xf32>
    %28 = vector.broadcast %27 : vector<1x96xf32> to vector<8x96xf32>
    %29 = arith.addf %25, %28 : vector<8x96xf32>
    %30 = arith.truncf %29 : vector<8x96xf32> to vector<8x96xbf16>
    %31 = vector.extract_strided_slice %30 {offsets = [0, 0], sizes = [8, 32], strides = [1, 1]} : vector<8x96xbf16> to vector<8x32xbf16>
    %32 = vector.extract_strided_slice %30 {offsets = [0, 32], sizes = [8, 32], strides = [1, 1]} : vector<8x96xbf16> to vector<8x32xbf16>
    %33 = vector.extract_strided_slice %30 {offsets = [0, 64], sizes = [8, 32], strides = [1, 1]} : vector<8x96xbf16> to vector<8x32xbf16>
    %34 = vector.shape_cast %31 : vector<8x32xbf16> to vector<8x4x8xbf16>
    %35 = tpu.transpose %34, [1, 0, 2] : vector<8x4x8xbf16> -> vector<4x8x8xbf16>
    %36 = vector.shape_cast %32 : vector<8x32xbf16> to vector<8x4x8xbf16>
    %37 = tpu.transpose %36, [1, 0, 2] : vector<8x4x8xbf16> -> vector<4x8x8xbf16>
    %38 = vector.shape_cast %33 : vector<8x32xbf16> to vector<8x4x8xbf16>
    %39 = tpu.transpose %38, [1, 0, 2] : vector<8x4x8xbf16> -> vector<4x8x8xbf16>
    "tpu.trace_start"() <{level = 10 : i32, message = "hqd,hkd->hqk"}> : () -> ()
    %cst_25 = arith.constant dense<0.000000e+00> : vector<4x8x8xf32>
    %40 = tpu.matmul %35, %37, %cst_25 {dimension_numbers = #tpu.dot_dimension_numbers<[2], [2], [1], [1], [0, 0, 0, 1, 1, 1], [0], [0]>} : vector<4x8x8xbf16>, vector<4x8x8xbf16>, vector<4x8x8xf32> -> vector<4x8x8xf32>
    "tpu.trace_stop"() : () -> ()
    %41 = vector.shape_cast %17 : vector<8x8xf32> to vector<1x8x8xf32>
    %42 = vector.broadcast %41 : vector<1x8x8xf32> to vector<4x8x8xf32>
    %43 = arith.addf %40, %42 : vector<4x8x8xf32>
    %cst_26 = arith.constant dense<0xFF800000> : vector<4x8xf32>
    %44 = vector.multi_reduction <maximumf>, %43, %cst_26 [2] : vector<4x8x8xf32> to vector<4x8xf32>
    %45 = vector.shape_cast %44 : vector<4x8xf32> to vector<4x8x1xf32>
    %46 = vector.broadcast %45 : vector<4x8x1xf32> to vector<4x8x8xf32>
    %47 = arith.subf %43, %46 : vector<4x8x8xf32>
    %48 = math.exp %47 : vector<4x8x8xf32>
    %cst_27 = arith.constant dense<0.000000e+00> : vector<4x8xf32>
    %49 = vector.multi_reduction <add>, %48, %cst_27 [2] : vector<4x8x8xf32> to vector<4x8xf32>
    %50 = vector.shape_cast %49 : vector<4x8xf32> to vector<4x8x1xf32>
    %51 = tpu.reciprocal %50 {approx = true} : vector<4x8x1xf32> -> vector<4x8x1xf32>
    %52 = vector.broadcast %51 : vector<4x8x1xf32> to vector<4x8x8xf32>
    %53 = arith.mulf %48, %52 : vector<4x8x8xf32>
    %54 = arith.truncf %53 : vector<4x8x8xf32> to vector<4x8x8xbf16>
    "tpu.trace_start"() <{level = 10 : i32, message = "hqk,hkd->hqd"}> : () -> ()
    %cst_28 = arith.constant dense<0.000000e+00> : vector<4x8x8xf32>
    %55 = tpu.matmul %54, %39, %cst_28 {dimension_numbers = #tpu.dot_dimension_numbers<[2], [1], [1], [2], [0, 0, 0, 1, 1, 2], [0], [0]>} : vector<4x8x8xbf16>, vector<4x8x8xbf16>, vector<4x8x8xf32> -> vector<4x8x8xf32>
    "tpu.trace_stop"() : () -> ()
    %56 = tpu.transpose %55, [1, 0, 2] : vector<4x8x8xf32> -> vector<8x4x8xf32>
    %57 = vector.shape_cast %56 : vector<8x4x8xf32> to vector<8x32xf32>
    %58 = arith.truncf %57 : vector<8x32xf32> to vector<8x32xbf16>
    %c0_29 = arith.constant 0 : index
    %c0_30 = arith.constant 0 : index
    %c0_31 = arith.constant 0 : index
    %59 = vector.load %arg10[%c0_29, %c0_30, %c0_31] : memref<1x32x32xbf16, #tpu.memory_space<vmem>>, vector<1x32x32xbf16>
    %60 = vector.shape_cast %59 : vector<1x32x32xbf16> to vector<32x32xbf16>
    %cst_32 = arith.constant dense<0.000000e+00> : vector<8x32xf32>
    %61 = tpu.matmul %58, %60, %cst_32 {dimension_numbers = #tpu.dot_dimension_numbers<[1], [0], [0], [1], [0, 0, 1, 1], [], []>} : vector<8x32xbf16>, vector<32x32xbf16>, vector<8x32xf32> -> vector<8x32xf32>
    %c0_33 = arith.constant 0 : index
    %c0_34 = arith.constant 0 : index
    %c0_35 = arith.constant 0 : index
    %62 = vector.load %arg11[%c0_33, %c0_34, %c0_35] : memref<1x1x32xf32, #tpu.memory_space<vmem>>, vector<1x1x32xf32>
    %63 = vector.shape_cast %62 : vector<1x1x32xf32> to vector<1x32xf32>
    %64 = vector.broadcast %63 : vector<1x32xf32> to vector<8x32xf32>
    %65 = arith.addf %61, %64 : vector<8x32xf32>
    %66 = arith.addf %65, %3 : vector<8x32xf32>
    %cst_36 = arith.constant dense<0.000000e+00> : vector<8xf32>
    %67 = vector.multi_reduction <add>, %66, %cst_36 [1] : vector<8x32xf32> to vector<8xf32>
    %68 = vector.shape_cast %67 : vector<8xf32> to vector<8x1xf32>
    %cst_37 = arith.constant 3.200000e+01 : f32
    %69 = vector.broadcast %cst_37 : f32 to vector<8x1xf32>
    %70 = arith.divf %68, %69 : vector<8x1xf32>
    %71 = vector.broadcast %70 : vector<8x1xf32> to vector<8x32xf32>
    %72 = arith.subf %66, %71 : vector<8x32xf32>
    %73 = arith.mulf %72, %72 : vector<8x32xf32>
    %cst_38 = arith.constant dense<0.000000e+00> : vector<8xf32>
    %74 = vector.multi_reduction <add>, %73, %cst_38 [1] : vector<8x32xf32> to vector<8xf32>
    %75 = vector.shape_cast %74 : vector<8xf32> to vector<8x1xf32>
    %cst_39 = arith.constant 3.200000e+01 : f32
    %76 = vector.broadcast %cst_39 : f32 to vector<8x1xf32>
    %77 = arith.divf %75, %76 : vector<8x1xf32>
    %78 = vector.broadcast %70 : vector<8x1xf32> to vector<8x32xf32>
    %79 = arith.subf %66, %78 : vector<8x32xf32>
    %cst_40 = arith.constant 9.99999997E-7 : f32
    %80 = vector.broadcast %cst_40 : f32 to vector<8x1xf32>
    %81 = arith.addf %77, %80 : vector<8x1xf32>
    %82 = math.rsqrt %81 : vector<8x1xf32>
    %83 = vector.broadcast %82 : vector<8x1xf32> to vector<8x32xf32>
    %84 = arith.mulf %79, %83 : vector<8x32xf32>
    %c0_41 = arith.constant 0 : index
    %c0_42 = arith.constant 0 : index
    %c0_43 = arith.constant 0 : index
    %85 = vector.load %arg12[%c0_41, %c0_42, %c0_43] : memref<1x1x32xf32, #tpu.memory_space<vmem>>, vector<1x1x32xf32>
    %86 = vector.shape_cast %85 : vector<1x1x32xf32> to vector<1x32xf32>
    %87 = vector.broadcast %86 : vector<1x32xf32> to vector<8x32xf32>
    %88 = arith.mulf %84, %87 : vector<8x32xf32>
    %c0_44 = arith.constant 0 : index
    %c0_45 = arith.constant 0 : index
    %c0_46 = arith.constant 0 : index
    %89 = vector.load %arg13[%c0_44, %c0_45, %c0_46] : memref<1x1x32xf32, #tpu.memory_space<vmem>>, vector<1x1x32xf32>
    %90 = vector.shape_cast %89 : vector<1x1x32xf32> to vector<1x32xf32>
    %91 = vector.broadcast %90 : vector<1x32xf32> to vector<8x32xf32>
    %92 = arith.addf %88, %91 : vector<8x32xf32>
    %93 = arith.truncf %92 : vector<8x32xf32> to vector<8x32xbf16>
    %c0_47 = arith.constant 0 : index
    %c0_48 = arith.constant 0 : index
    %c0_49 = arith.constant 0 : index
    %94 = vector.load %arg14[%c0_47, %c0_48, %c0_49] : memref<1x32x32xbf16, #tpu.memory_space<vmem>>, vector<1x32x32xbf16>
    %95 = vector.shape_cast %94 : vector<1x32x32xbf16> to vector<32x32xbf16>
    %cst_50 = arith.constant dense<0.000000e+00> : vector<8x32xf32>
    %96 = tpu.matmul %93, %95, %cst_50 {dimension_numbers = #tpu.dot_dimension_numbers<[1], [0], [0], [1], [0, 0, 1, 1], [], []>} : vector<8x32xbf16>, vector<32x32xbf16>, vector<8x32xf32> -> vector<8x32xf32>
    %c0_51 = arith.constant 0 : index
    %c0_52 = arith.constant 0 : index
    %c0_53 = arith.constant 0 : index
    %97 = vector.load %arg15[%c0_51, %c0_52, %c0_53] : memref<1x1x32xf32, #tpu.memory_space<vmem>>, vector<1x1x32xf32>
    %98 = vector.shape_cast %97 : vector<1x1x32xf32> to vector<1x32xf32>
    %99 = vector.broadcast %98 : vector<1x32xf32> to vector<8x32xf32>
    %100 = arith.addf %96, %99 : vector<8x32xf32>
    %101 = arith.truncf %100 : vector<8x32xf32> to vector<8x32xbf16>
    %c0_54 = arith.constant 0 : index
    %c0_55 = arith.constant 0 : index
    %c0_56 = arith.constant 0 : index
    %102 = vector.load %arg16[%c0_54, %c0_55, %c0_56] : memref<1x32x64xbf16, #tpu.memory_space<vmem>>, vector<1x32x64xbf16>
    %103 = vector.shape_cast %102 : vector<1x32x64xbf16> to vector<32x64xbf16>
    %cst_57 = arith.constant dense<0.000000e+00> : vector<16x64xf32>
    %104 = tpu.matmul %5, %103, %cst_57 {dimension_numbers = #tpu.dot_dimension_numbers<[1], [0], [0], [1], [0, 0, 1, 1], [], []>} : vector<16x32xbf16>, vector<32x64xbf16>, vector<16x64xf32> -> vector<16x64xf32>
    %c0_58 = arith.constant 0 : index
    %c0_59 = arith.constant 0 : index
    %c0_60 = arith.constant 0 : index
    %105 = vector.load %arg17[%c0_58, %c0_59, %c0_60] : memref<1x1x64xf32, #tpu.memory_space<vmem>>, vector<1x1x64xf32>
    %106 = vector.shape_cast %105 : vector<1x1x64xf32> to vector<1x64xf32>
    %107 = vector.broadcast %106 : vector<1x64xf32> to vector<16x64xf32>
    %108 = arith.addf %104, %107 : vector<16x64xf32>
    %109 = arith.truncf %108 : vector<16x64xf32> to vector<16x64xbf16>
    %110 = vector.extract_strided_slice %109 {offsets = [0, 0], sizes = [16, 32], strides = [1, 1]} : vector<16x64xbf16> to vector<16x32xbf16>
    %111 = vector.extract_strided_slice %109 {offsets = [0, 32], sizes = [16, 32], strides = [1, 1]} : vector<16x64xbf16> to vector<16x32xbf16>
    %112 = vector.shape_cast %101 : vector<8x32xbf16> to vector<8x4x8xbf16>
    %113 = tpu.transpose %112, [1, 0, 2] : vector<8x4x8xbf16> -> vector<4x8x8xbf16>
    %114 = vector.shape_cast %110 : vector<16x32xbf16> to vector<16x4x8xbf16>
    %115 = tpu.transpose %114, [1, 0, 2] : vector<16x4x8xbf16> -> vector<4x16x8xbf16>
    %116 = vector.shape_cast %111 : vector<16x32xbf16> to vector<16x4x8xbf16>
    %117 = tpu.transpose %116, [1, 0, 2] : vector<16x4x8xbf16> -> vector<4x16x8xbf16>
    "tpu.trace_start"() <{level = 10 : i32, message = "hqd,hkd->hqk"}> : () -> ()
    %cst_61 = arith.constant dense<0.000000e+00> : vector<4x8x16xf32>
    %118 = tpu.matmul %113, %115, %cst_61 {dimension_numbers = #tpu.dot_dimension_numbers<[2], [2], [1], [1], [0, 0, 0, 1, 1, 1], [0], [0]>} : vector<4x8x8xbf16>, vector<4x16x8xbf16>, vector<4x8x16xf32> -> vector<4x8x16xf32>
    "tpu.trace_stop"() : () -> ()
    %119 = vector.shape_cast %19 : vector<1x16xf32> to vector<1x1x16xf32>
    %120 = vector.broadcast %119 : vector<1x1x16xf32> to vector<4x8x16xf32>
    %121 = arith.addf %118, %120 : vector<4x8x16xf32>
    %cst_62 = arith.constant dense<0xFF800000> : vector<4x8xf32>
    %122 = vector.multi_reduction <maximumf>, %121, %cst_62 [2] : vector<4x8x16xf32> to vector<4x8xf32>
    %123 = vector.shape_cast %122 : vector<4x8xf32> to vector<4x8x1xf32>
    %124 = vector.broadcast %123 : vector<4x8x1xf32> to vector<4x8x16xf32>
    %125 = arith.subf %121, %124 : vector<4x8x16xf32>
    %126 = math.exp %125 : vector<4x8x16xf32>
    %cst_63 = arith.constant dense<0.000000e+00> : vector<4x8xf32>
    %127 = vector.multi_reduction <add>, %126, %cst_63 [2] : vector<4x8x16xf32> to vector<4x8xf32>
    %128 = vector.shape_cast %127 : vector<4x8xf32> to vector<4x8x1xf32>
    %129 = tpu.reciprocal %128 {approx = true} : vector<4x8x1xf32> -> vector<4x8x1xf32>
    %130 = vector.broadcast %129 : vector<4x8x1xf32> to vector<4x8x16xf32>
    %131 = arith.mulf %126, %130 : vector<4x8x16xf32>
    %132 = arith.truncf %131 : vector<4x8x16xf32> to vector<4x8x16xbf16>
    "tpu.trace_start"() <{level = 10 : i32, message = "hqk,hkd->hqd"}> : () -> ()
    %cst_64 = arith.constant dense<0.000000e+00> : vector<4x8x8xf32>
    %133 = tpu.matmul %132, %117, %cst_64 {dimension_numbers = #tpu.dot_dimension_numbers<[2], [1], [1], [2], [0, 0, 0, 1, 1, 2], [0], [0]>} : vector<4x8x16xbf16>, vector<4x16x8xbf16>, vector<4x8x8xf32> -> vector<4x8x8xf32>
    "tpu.trace_stop"() : () -> ()
    %134 = tpu.transpose %133, [1, 0, 2] : vector<4x8x8xf32> -> vector<8x4x8xf32>
    %135 = vector.shape_cast %134 : vector<8x4x8xf32> to vector<8x32xf32>
    %136 = vector.extract_strided_slice %126 {offsets = [0, 0, 0], sizes = [1, 8, 16], strides = [1, 1, 1]} : vector<4x8x16xf32> to vector<1x8x16xf32>
    %137 = vector.shape_cast %136 : vector<1x8x16xf32> to vector<8x16xf32>
    %138 = vector.extract_strided_slice %128 {offsets = [0, 0, 0], sizes = [1, 8, 1], strides = [1, 1, 1]} : vector<4x8x1xf32> to vector<1x8x1xf32>
    %139 = vector.shape_cast %138 : vector<1x8x1xf32> to vector<8x1xf32>
    %140 = vector.broadcast %139 : vector<8x1xf32> to vector<8x16xf32>
    %141 = arith.divf %137, %140 : vector<8x16xf32>
    %142 = arith.truncf %135 : vector<8x32xf32> to vector<8x32xbf16>
    %c0_65 = arith.constant 0 : index
    %c0_66 = arith.constant 0 : index
    %c0_67 = arith.constant 0 : index
    %143 = vector.load %arg18[%c0_65, %c0_66, %c0_67] : memref<1x32x32xbf16, #tpu.memory_space<vmem>>, vector<1x32x32xbf16>
    %144 = vector.shape_cast %143 : vector<1x32x32xbf16> to vector<32x32xbf16>
    %cst_68 = arith.constant dense<0.000000e+00> : vector<8x32xf32>
    %145 = tpu.matmul %142, %144, %cst_68 {dimension_numbers = #tpu.dot_dimension_numbers<[1], [0], [0], [1], [0, 0, 1, 1], [], []>} : vector<8x32xbf16>, vector<32x32xbf16>, vector<8x32xf32> -> vector<8x32xf32>
    %c0_69 = arith.constant 0 : index
    %c0_70 = arith.constant 0 : index
    %c0_71 = arith.constant 0 : index
    %146 = vector.load %arg19[%c0_69, %c0_70, %c0_71] : memref<1x1x32xf32, #tpu.memory_space<vmem>>, vector<1x1x32xf32>
    %147 = vector.shape_cast %146 : vector<1x1x32xf32> to vector<1x32xf32>
    %148 = vector.broadcast %147 : vector<1x32xf32> to vector<8x32xf32>
    %149 = arith.addf %145, %148 : vector<8x32xf32>
    %150 = arith.addf %149, %92 : vector<8x32xf32>
    %cst_72 = arith.constant dense<0.000000e+00> : vector<8xf32>
    %151 = vector.multi_reduction <add>, %150, %cst_72 [1] : vector<8x32xf32> to vector<8xf32>
    %152 = vector.shape_cast %151 : vector<8xf32> to vector<8x1xf32>
    %cst_73 = arith.constant 3.200000e+01 : f32
    %153 = vector.broadcast %cst_73 : f32 to vector<8x1xf32>
    %154 = arith.divf %152, %153 : vector<8x1xf32>
    %155 = vector.broadcast %154 : vector<8x1xf32> to vector<8x32xf32>
    %156 = arith.subf %150, %155 : vector<8x32xf32>
    %157 = arith.mulf %156, %156 : vector<8x32xf32>
    %cst_74 = arith.constant dense<0.000000e+00> : vector<8xf32>
    %158 = vector.multi_reduction <add>, %157, %cst_74 [1] : vector<8x32xf32> to vector<8xf32>
    %159 = vector.shape_cast %158 : vector<8xf32> to vector<8x1xf32>
    %cst_75 = arith.constant 3.200000e+01 : f32
    %160 = vector.broadcast %cst_75 : f32 to vector<8x1xf32>
    %161 = arith.divf %159, %160 : vector<8x1xf32>
    %162 = vector.broadcast %154 : vector<8x1xf32> to vector<8x32xf32>
    %163 = arith.subf %150, %162 : vector<8x32xf32>
    %cst_76 = arith.constant 9.99999997E-7 : f32
    %164 = vector.broadcast %cst_76 : f32 to vector<8x1xf32>
    %165 = arith.addf %161, %164 : vector<8x1xf32>
    %166 = math.rsqrt %165 : vector<8x1xf32>
    %167 = vector.broadcast %166 : vector<8x1xf32> to vector<8x32xf32>
    %168 = arith.mulf %163, %167 : vector<8x32xf32>
    %c0_77 = arith.constant 0 : index
    %c0_78 = arith.constant 0 : index
    %c0_79 = arith.constant 0 : index
    %169 = vector.load %arg20[%c0_77, %c0_78, %c0_79] : memref<1x1x32xf32, #tpu.memory_space<vmem>>, vector<1x1x32xf32>
    %170 = vector.shape_cast %169 : vector<1x1x32xf32> to vector<1x32xf32>
    %171 = vector.broadcast %170 : vector<1x32xf32> to vector<8x32xf32>
    %172 = arith.mulf %168, %171 : vector<8x32xf32>
    %c0_80 = arith.constant 0 : index
    %c0_81 = arith.constant 0 : index
    %c0_82 = arith.constant 0 : index
    %173 = vector.load %arg21[%c0_80, %c0_81, %c0_82] : memref<1x1x32xf32, #tpu.memory_space<vmem>>, vector<1x1x32xf32>
    %174 = vector.shape_cast %173 : vector<1x1x32xf32> to vector<1x32xf32>
    %175 = vector.broadcast %174 : vector<1x32xf32> to vector<8x32xf32>
    %176 = arith.addf %172, %175 : vector<8x32xf32>
    %177 = arith.truncf %176 : vector<8x32xf32> to vector<8x32xbf16>
    %c0_83 = arith.constant 0 : index
    %c0_84 = arith.constant 0 : index
    %c0_85 = arith.constant 0 : index
    %178 = vector.load %arg22[%c0_83, %c0_84, %c0_85] : memref<1x32x32xbf16, #tpu.memory_space<vmem>>, vector<1x32x32xbf16>
    %179 = vector.shape_cast %178 : vector<1x32x32xbf16> to vector<32x32xbf16>
    %cst_86 = arith.constant dense<0.000000e+00> : vector<8x32xf32>
    %180 = tpu.matmul %177, %179, %cst_86 {dimension_numbers = #tpu.dot_dimension_numbers<[1], [0], [0], [1], [0, 0, 1, 1], [], []>} : vector<8x32xbf16>, vector<32x32xbf16>, vector<8x32xf32> -> vector<8x32xf32>
    %c0_87 = arith.constant 0 : index
    %c0_88 = arith.constant 0 : index
    %c0_89 = arith.constant 0 : index
    %181 = vector.load %arg23[%c0_87, %c0_88, %c0_89] : memref<1x1x32xf32, #tpu.memory_space<vmem>>, vector<1x1x32xf32>
    %182 = vector.shape_cast %181 : vector<1x1x32xf32> to vector<1x32xf32>
    %183 = vector.broadcast %182 : vector<1x32xf32> to vector<8x32xf32>
    %184 = arith.addf %180, %183 : vector<8x32xf32>
    %185 = arith.truncf %184 : vector<8x32xf32> to vector<8x32xbf16>
    %c0_90 = arith.constant 0 : index
    %c0_91 = arith.constant 0 : index
    %c0_92 = arith.constant 0 : index
    %186 = vector.load %arg24[%c0_90, %c0_91, %c0_92] : memref<1x32x64xbf16, #tpu.memory_space<vmem>>, vector<1x32x64xbf16>
    %187 = vector.shape_cast %186 : vector<1x32x64xbf16> to vector<32x64xbf16>
    %cst_93 = arith.constant dense<0.000000e+00> : vector<8x64xf32>
    %188 = tpu.matmul %7, %187, %cst_93 {dimension_numbers = #tpu.dot_dimension_numbers<[1], [0], [0], [1], [0, 0, 1, 1], [], []>} : vector<8x32xbf16>, vector<32x64xbf16>, vector<8x64xf32> -> vector<8x64xf32>
    %c0_94 = arith.constant 0 : index
    %c0_95 = arith.constant 0 : index
    %c0_96 = arith.constant 0 : index
    %189 = vector.load %arg25[%c0_94, %c0_95, %c0_96] : memref<1x1x64xf32, #tpu.memory_space<vmem>>, vector<1x1x64xf32>
    %190 = vector.shape_cast %189 : vector<1x1x64xf32> to vector<1x64xf32>
    %191 = vector.broadcast %190 : vector<1x64xf32> to vector<8x64xf32>
    %192 = arith.addf %188, %191 : vector<8x64xf32>
    %193 = arith.truncf %192 : vector<8x64xf32> to vector<8x64xbf16>
    %194 = vector.extract_strided_slice %193 {offsets = [0, 0], sizes = [8, 32], strides = [1, 1]} : vector<8x64xbf16> to vector<8x32xbf16>
    %195 = vector.extract_strided_slice %193 {offsets = [0, 32], sizes = [8, 32], strides = [1, 1]} : vector<8x64xbf16> to vector<8x32xbf16>
    %196 = vector.shape_cast %185 : vector<8x32xbf16> to vector<8x4x8xbf16>
    %197 = tpu.transpose %196, [1, 0, 2] : vector<8x4x8xbf16> -> vector<4x8x8xbf16>
    %198 = vector.shape_cast %194 : vector<8x32xbf16> to vector<8x4x8xbf16>
    %199 = tpu.transpose %198, [1, 0, 2] : vector<8x4x8xbf16> -> vector<4x8x8xbf16>
    %200 = vector.shape_cast %195 : vector<8x32xbf16> to vector<8x4x8xbf16>
    %201 = tpu.transpose %200, [1, 0, 2] : vector<8x4x8xbf16> -> vector<4x8x8xbf16>
    "tpu.trace_start"() <{level = 10 : i32, message = "hqd,hkd->hqk"}> : () -> ()
    %cst_97 = arith.constant dense<0.000000e+00> : vector<4x8x8xf32>
    %202 = tpu.matmul %197, %199, %cst_97 {dimension_numbers = #tpu.dot_dimension_numbers<[2], [2], [1], [1], [0, 0, 0, 1, 1, 1], [0], [0]>} : vector<4x8x8xbf16>, vector<4x8x8xbf16>, vector<4x8x8xf32> -> vector<4x8x8xf32>
    "tpu.trace_stop"() : () -> ()
    %203 = vector.shape_cast %21 : vector<1x8xf32> to vector<1x1x8xf32>
    %204 = vector.broadcast %203 : vector<1x1x8xf32> to vector<4x8x8xf32>
    %205 = arith.addf %202, %204 : vector<4x8x8xf32>
    %cst_98 = arith.constant dense<0xFF800000> : vector<4x8xf32>
    %206 = vector.multi_reduction <maximumf>, %205, %cst_98 [2] : vector<4x8x8xf32> to vector<4x8xf32>
    %207 = vector.shape_cast %206 : vector<4x8xf32> to vector<4x8x1xf32>
    %208 = vector.broadcast %207 : vector<4x8x1xf32> to vector<4x8x8xf32>
    %209 = arith.subf %205, %208 : vector<4x8x8xf32>
    %210 = math.exp %209 : vector<4x8x8xf32>
    %cst_99 = arith.constant dense<0.000000e+00> : vector<4x8xf32>
    %211 = vector.multi_reduction <add>, %210, %cst_99 [2] : vector<4x8x8xf32> to vector<4x8xf32>
    %212 = vector.shape_cast %211 : vector<4x8xf32> to vector<4x8x1xf32>
    %213 = tpu.reciprocal %212 {approx = true} : vector<4x8x1xf32> -> vector<4x8x1xf32>
    %214 = vector.broadcast %213 : vector<4x8x1xf32> to vector<4x8x8xf32>
    %215 = arith.mulf %210, %214 : vector<4x8x8xf32>
    %216 = arith.truncf %215 : vector<4x8x8xf32> to vector<4x8x8xbf16>
    "tpu.trace_start"() <{level = 10 : i32, message = "hqk,hkd->hqd"}> : () -> ()
    %cst_100 = arith.constant dense<0.000000e+00> : vector<4x8x8xf32>
    %217 = tpu.matmul %216, %201, %cst_100 {dimension_numbers = #tpu.dot_dimension_numbers<[2], [1], [1], [2], [0, 0, 0, 1, 1, 2], [0], [0]>} : vector<4x8x8xbf16>, vector<4x8x8xbf16>, vector<4x8x8xf32> -> vector<4x8x8xf32>
    "tpu.trace_stop"() : () -> ()
    %218 = tpu.transpose %217, [1, 0, 2] : vector<4x8x8xf32> -> vector<8x4x8xf32>
    %219 = vector.shape_cast %218 : vector<8x4x8xf32> to vector<8x32xf32>
    %220 = vector.extract_strided_slice %210 {offsets = [0, 0, 0], sizes = [1, 8, 8], strides = [1, 1, 1]} : vector<4x8x8xf32> to vector<1x8x8xf32>
    %221 = vector.shape_cast %220 : vector<1x8x8xf32> to vector<8x8xf32>
    %222 = vector.extract_strided_slice %212 {offsets = [0, 0, 0], sizes = [1, 8, 1], strides = [1, 1, 1]} : vector<4x8x1xf32> to vector<1x8x1xf32>
    %223 = vector.shape_cast %222 : vector<1x8x1xf32> to vector<8x1xf32>
    %224 = vector.broadcast %223 : vector<8x1xf32> to vector<8x8xf32>
    %225 = arith.divf %221, %224 : vector<8x8xf32>
    %226 = arith.truncf %219 : vector<8x32xf32> to vector<8x32xbf16>
    %c0_101 = arith.constant 0 : index
    %c0_102 = arith.constant 0 : index
    %c0_103 = arith.constant 0 : index
    %227 = vector.load %arg26[%c0_101, %c0_102, %c0_103] : memref<1x32x32xbf16, #tpu.memory_space<vmem>>, vector<1x32x32xbf16>
    %228 = vector.shape_cast %227 : vector<1x32x32xbf16> to vector<32x32xbf16>
    %cst_104 = arith.constant dense<0.000000e+00> : vector<8x32xf32>
    %229 = tpu.matmul %226, %228, %cst_104 {dimension_numbers = #tpu.dot_dimension_numbers<[1], [0], [0], [1], [0, 0, 1, 1], [], []>} : vector<8x32xbf16>, vector<32x32xbf16>, vector<8x32xf32> -> vector<8x32xf32>
    %c0_105 = arith.constant 0 : index
    %c0_106 = arith.constant 0 : index
    %c0_107 = arith.constant 0 : index
    %230 = vector.load %arg27[%c0_105, %c0_106, %c0_107] : memref<1x1x32xf32, #tpu.memory_space<vmem>>, vector<1x1x32xf32>
    %231 = vector.shape_cast %230 : vector<1x1x32xf32> to vector<1x32xf32>
    %232 = vector.broadcast %231 : vector<1x32xf32> to vector<8x32xf32>
    %233 = arith.addf %229, %232 : vector<8x32xf32>
    %234 = arith.addf %233, %176 : vector<8x32xf32>
    %cst_108 = arith.constant dense<0.000000e+00> : vector<8xf32>
    %235 = vector.multi_reduction <add>, %234, %cst_108 [1] : vector<8x32xf32> to vector<8xf32>
    %236 = vector.shape_cast %235 : vector<8xf32> to vector<8x1xf32>
    %cst_109 = arith.constant 3.200000e+01 : f32
    %237 = vector.broadcast %cst_109 : f32 to vector<8x1xf32>
    %238 = arith.divf %236, %237 : vector<8x1xf32>
    %239 = vector.broadcast %238 : vector<8x1xf32> to vector<8x32xf32>
    %240 = arith.subf %234, %239 : vector<8x32xf32>
    %241 = arith.mulf %240, %240 : vector<8x32xf32>
    %cst_110 = arith.constant dense<0.000000e+00> : vector<8xf32>
    %242 = vector.multi_reduction <add>, %241, %cst_110 [1] : vector<8x32xf32> to vector<8xf32>
    %243 = vector.shape_cast %242 : vector<8xf32> to vector<8x1xf32>
    %cst_111 = arith.constant 3.200000e+01 : f32
    %244 = vector.broadcast %cst_111 : f32 to vector<8x1xf32>
    %245 = arith.divf %243, %244 : vector<8x1xf32>
    %246 = vector.broadcast %238 : vector<8x1xf32> to vector<8x32xf32>
    %247 = arith.subf %234, %246 : vector<8x32xf32>
    %cst_112 = arith.constant 9.99999997E-7 : f32
    %248 = vector.broadcast %cst_112 : f32 to vector<8x1xf32>
    %249 = arith.addf %245, %248 : vector<8x1xf32>
    %250 = math.rsqrt %249 : vector<8x1xf32>
    %251 = vector.broadcast %250 : vector<8x1xf32> to vector<8x32xf32>
    %252 = arith.mulf %247, %251 : vector<8x32xf32>
    %c0_113 = arith.constant 0 : index
    %c0_114 = arith.constant 0 : index
    %c0_115 = arith.constant 0 : index
    %253 = vector.load %arg28[%c0_113, %c0_114, %c0_115] : memref<1x1x32xf32, #tpu.memory_space<vmem>>, vector<1x1x32xf32>
    %254 = vector.shape_cast %253 : vector<1x1x32xf32> to vector<1x32xf32>
    %255 = vector.broadcast %254 : vector<1x32xf32> to vector<8x32xf32>
    %256 = arith.mulf %252, %255 : vector<8x32xf32>
    %c0_116 = arith.constant 0 : index
    %c0_117 = arith.constant 0 : index
    %c0_118 = arith.constant 0 : index
    %257 = vector.load %arg29[%c0_116, %c0_117, %c0_118] : memref<1x1x32xf32, #tpu.memory_space<vmem>>, vector<1x1x32xf32>
    %258 = vector.shape_cast %257 : vector<1x1x32xf32> to vector<1x32xf32>
    %259 = vector.broadcast %258 : vector<1x32xf32> to vector<8x32xf32>
    %260 = arith.addf %256, %259 : vector<8x32xf32>
    %261 = arith.truncf %260 : vector<8x32xf32> to vector<8x32xbf16>
    %c0_119 = arith.constant 0 : index
    %c0_120 = arith.constant 0 : index
    %c0_121 = arith.constant 0 : index
    %262 = vector.load %arg30[%c0_119, %c0_120, %c0_121] : memref<1x32x64xbf16, #tpu.memory_space<vmem>>, vector<1x32x64xbf16>
    %263 = vector.shape_cast %262 : vector<1x32x64xbf16> to vector<32x64xbf16>
    %cst_122 = arith.constant dense<0.000000e+00> : vector<8x64xf32>
    %264 = tpu.matmul %261, %263, %cst_122 {dimension_numbers = #tpu.dot_dimension_numbers<[1], [0], [0], [1], [0, 0, 1, 1], [], []>} : vector<8x32xbf16>, vector<32x64xbf16>, vector<8x64xf32> -> vector<8x64xf32>
    %c0_123 = arith.constant 0 : index
    %c0_124 = arith.constant 0 : index
    %c0_125 = arith.constant 0 : index
    %265 = vector.load %arg31[%c0_123, %c0_124, %c0_125] : memref<1x1x64xf32, #tpu.memory_space<vmem>>, vector<1x1x64xf32>
    %266 = vector.shape_cast %265 : vector<1x1x64xf32> to vector<1x64xf32>
    %267 = vector.broadcast %266 : vector<1x64xf32> to vector<8x64xf32>
    %268 = arith.addf %264, %267 : vector<8x64xf32>
    %cst_126 = arith.constant 0.000000e+00 : f32
    %269 = vector.broadcast %cst_126 : f32 to vector<8x64xf32>
    %270 = arith.maximumf %268, %269 : vector<8x64xf32>
    %271 = arith.truncf %270 : vector<8x64xf32> to vector<8x64xbf16>
    %c0_127 = arith.constant 0 : index
    %c0_128 = arith.constant 0 : index
    %c0_129 = arith.constant 0 : index
    %272 = vector.load %arg32[%c0_127, %c0_128, %c0_129] : memref<1x64x32xbf16, #tpu.memory_space<vmem>>, vector<1x64x32xbf16>
    %273 = vector.shape_cast %272 : vector<1x64x32xbf16> to vector<64x32xbf16>
    %cst_130 = arith.constant dense<0.000000e+00> : vector<8x32xf32>
    %274 = tpu.matmul %271, %273, %cst_130 {dimension_numbers = #tpu.dot_dimension_numbers<[1], [0], [0], [1], [0, 0, 1, 1], [], []>} : vector<8x64xbf16>, vector<64x32xbf16>, vector<8x32xf32> -> vector<8x32xf32>
    %c0_131 = arith.constant 0 : index
    %c0_132 = arith.constant 0 : index
    %c0_133 = arith.constant 0 : index
    %275 = vector.load %arg33[%c0_131, %c0_132, %c0_133] : memref<1x1x32xf32, #tpu.memory_space<vmem>>, vector<1x1x32xf32>
    %276 = vector.shape_cast %275 : vector<1x1x32xf32> to vector<1x32xf32>
    %277 = vector.broadcast %276 : vector<1x32xf32> to vector<8x32xf32>
    %278 = arith.addf %274, %277 : vector<8x32xf32>
    %279 = arith.addf %278, %234 : vector<8x32xf32>
    %c0_134 = arith.constant 0 : index
    %c0_135 = arith.constant 0 : index
    %280 = vector.load %arg37[%c0_134, %c0_135] : memref<8x32xf32, #tpu.memory_space<vmem>>, vector<8x32xf32>
    tpu.vector_store %arg37[%c0_134, %c0_135], %279 {strides = array<i32>} : memref<8x32xf32, #tpu.memory_space<vmem>>, vector<8x32xf32>,
    %c1_i32 = arith.constant 1 : i32
    %281 = arith.cmpi eq, %arg1, %c1_i32 : i32
    %282 = arith.extui %281 : i1 to i32
    %c0_i32_136 = arith.constant 0 : i32
    %283 = arith.cmpi ne, %282, %c0_i32_136 : i32
    scf.if %283 {
      %c0_137 = arith.constant 0 : index
      %c0_138 = arith.constant 0 : index
      %c0_139 = arith.constant 0 : index
      %284 = vector.load %arg34[%c0_137, %c0_138, %c0_139] : memref<1x8x32xf32, #tpu.memory_space<vmem>>, vector<1x8x32xf32>
      %285 = vector.shape_cast %284 : vector<1x8x32xf32> to vector<8x32xf32>
      %286 = vector.shape_cast %279 : vector<8x32xf32> to vector<1x8x32xf32>
      tpu.vector_store %arg34[%c0_137, %c0_138, %c0_139], %286 {strides = array<i32>} : memref<1x8x32xf32, #tpu.memory_space<vmem>>, vector<1x8x32xf32>,
      %c0_140 = arith.constant 0 : index
      %c0_141 = arith.constant 0 : index
      %c0_142 = arith.constant 0 : index
      %287 = vector.load %arg35[%c0_140, %c0_141, %c0_142] : memref<1x8x16xf32, #tpu.memory_space<vmem>>, vector<1x8x16xf32>
      %288 = vector.shape_cast %287 : vector<1x8x16xf32> to vector<8x16xf32>
      %289 = vector.shape_cast %141 : vector<8x16xf32> to vector<1x8x16xf32>
      tpu.vector_store %arg35[%c0_140, %c0_141, %c0_142], %289 {strides = array<i32>} : memref<1x8x16xf32, #tpu.memory_space<vmem>>, vector<1x8x16xf32>,
      %c0_143 = arith.constant 0 : index
      %c0_144 = arith.constant 0 : index
      %c0_145 = arith.constant 0 : index
      %290 = vector.load %arg36[%c0_143, %c0_144, %c0_145] : memref<1x8x8xf32, #tpu.memory_space<vmem>>, vector<1x8x8xf32>
      %291 = vector.shape_cast %290 : vector<1x8x8xf32> to vector<8x8xf32>
      %292 = vector.shape_cast %225 : vector<8x8xf32> to vector<1x8x8xf32>
      tpu.vector_store %arg36[%c0_143, %c0_144, %c0_145], %292 {strides = array<i32>} : memref<1x8x8xf32, #tpu.memory_space<vmem>>, vector<1x8x8xf32>,
    } else {
    }
    return
  }
  func.func @transform_0(%arg0: i32, %arg1: i32) -> (i32, i32, i32) {
    %c0_i32 = arith.constant 0 : i32
    %c0_i32_0 = arith.constant 0 : i32
    %c0_i32_1 = arith.constant 0 : i32
    return %arg0, %c0_i32, %c0_i32_0 : i32, i32, i32
  }
  func.func @transform_1(%arg0: i32, %arg1: i32) -> (i32, i32, i32) {
    %c0_i32 = arith.constant 0 : i32
    %c0_i32_0 = arith.constant 0 : i32
    %c0_i32_1 = arith.constant 0 : i32
    return %arg0, %c0_i32, %c0_i32_0 : i32, i32, i32
  }
  func.func @transform_2(%arg0: i32, %arg1: i32) -> (i32, i32, i32) {
    %c0_i32 = arith.constant 0 : i32
    %c0_i32_0 = arith.constant 0 : i32
    %c0_i32_1 = arith.constant 0 : i32
    return %arg0, %c0_i32, %c0_i32_0 : i32, i32, i32
  }
  func.func @transform_3(%arg0: i32, %arg1: i32) -> (i32, i32, i32) {
    %c0_i32 = arith.constant 0 : i32
    %c0_i32_0 = arith.constant 0 : i32
    %c0_i32_1 = arith.constant 0 : i32
    return %arg0, %c0_i32, %c0_i32_0 : i32, i32, i32
  }
  func.func @transform_4(%arg0: i32, %arg1: i32) -> (i32, i32, i32) {
    %c0_i32 = arith.constant 0 : i32
    %c0_i32_0 = arith.constant 0 : i32
    %c0_i32_1 = arith.constant 0 : i32
    return %arg0, %c0_i32, %c0_i32_0 : i32, i32, i32
  }
  func.func @transform_5(%arg0: i32, %arg1: i32) -> (i32, i32, i32) {
    %c0_i32 = arith.constant 0 : i32
    %c0_i32_0 = arith.constant 0 : i32
    %c0_i32_1 = arith.constant 0 : i32
    return %arg0, %c0_i32, %c0_i32_0 : i32, i32, i32
  }
  func.func @transform_6(%arg0: i32, %arg1: i32) -> (i32, i32, i32) {
    %c0_i32 = arith.constant 0 : i32
    %c0_i32_0 = arith.constant 0 : i32
    %c0_i32_1 = arith.constant 0 : i32
    return %arg1, %c0_i32, %c0_i32_0 : i32, i32, i32
  }
  func.func @transform_7(%arg0: i32, %arg1: i32) -> (i32, i32, i32) {
    %c0_i32 = arith.constant 0 : i32
    %c0_i32_0 = arith.constant 0 : i32
    %c0_i32_1 = arith.constant 0 : i32
    return %arg1, %c0_i32, %c0_i32_0 : i32, i32, i32
  }
  func.func @transform_8(%arg0: i32, %arg1: i32) -> (i32, i32, i32) {
    %c0_i32 = arith.constant 0 : i32
    %c0_i32_0 = arith.constant 0 : i32
    %c0_i32_1 = arith.constant 0 : i32
    return %arg1, %c0_i32, %c0_i32_0 : i32, i32, i32
  }
  func.func @transform_9(%arg0: i32, %arg1: i32) -> (i32, i32, i32) {
    %c0_i32 = arith.constant 0 : i32
    %c0_i32_0 = arith.constant 0 : i32
    %c0_i32_1 = arith.constant 0 : i32
    return %arg1, %c0_i32, %c0_i32_0 : i32, i32, i32
  }
  func.func @transform_10(%arg0: i32, %arg1: i32) -> (i32, i32, i32) {
    %c0_i32 = arith.constant 0 : i32
    %c0_i32_0 = arith.constant 0 : i32
    %c0_i32_1 = arith.constant 0 : i32
    return %arg1, %c0_i32, %c0_i32_0 : i32, i32, i32
  }
  func.func @transform_11(%arg0: i32, %arg1: i32) -> (i32, i32, i32) {
    %c0_i32 = arith.constant 0 : i32
    %c0_i32_0 = arith.constant 0 : i32
    %c0_i32_1 = arith.constant 0 : i32
    return %arg1, %c0_i32, %c0_i32_0 : i32, i32, i32
  }
  func.func @transform_12(%arg0: i32, %arg1: i32) -> (i32, i32, i32) {
    %c0_i32 = arith.constant 0 : i32
    %c0_i32_0 = arith.constant 0 : i32
    %c0_i32_1 = arith.constant 0 : i32
    return %arg1, %c0_i32, %c0_i32_0 : i32, i32, i32
  }
  func.func @transform_13(%arg0: i32, %arg1: i32) -> (i32, i32, i32) {
    %c0_i32 = arith.constant 0 : i32
    %c0_i32_0 = arith.constant 0 : i32
    %c0_i32_1 = arith.constant 0 : i32
    return %arg1, %c0_i32, %c0_i32_0 : i32, i32, i32
  }
  func.func @transform_14(%arg0: i32, %arg1: i32) -> (i32, i32, i32) {
    %c0_i32 = arith.constant 0 : i32
    %c0_i32_0 = arith.constant 0 : i32
    %c0_i32_1 = arith.constant 0 : i32
    return %arg1, %c0_i32, %c0_i32_0 : i32, i32, i32
  }
  func.func @transform_15(%arg0: i32, %arg1: i32) -> (i32, i32, i32) {
    %c0_i32 = arith.constant 0 : i32
    %c0_i32_0 = arith.constant 0 : i32
    %c0_i32_1 = arith.constant 0 : i32
    return %arg1, %c0_i32, %c0_i32_0 : i32, i32, i32
  }
  func.func @transform_16(%arg0: i32, %arg1: i32) -> (i32, i32, i32) {
    %c0_i32 = arith.constant 0 : i32
    %c0_i32_0 = arith.constant 0 : i32
    %c0_i32_1 = arith.constant 0 : i32
    return %arg1, %c0_i32, %c0_i32_0 : i32, i32, i32
  }
  func.func @transform_17(%arg0: i32, %arg1: i32) -> (i32, i32, i32) {
    %c0_i32 = arith.constant 0 : i32
    %c0_i32_0 = arith.constant 0 : i32
    %c0_i32_1 = arith.constant 0 : i32
    return %arg1, %c0_i32, %c0_i32_0 : i32, i32, i32
  }
  func.func @transform_18(%arg0: i32, %arg1: i32) -> (i32, i32, i32) {
    %c0_i32 = arith.constant 0 : i32
    %c0_i32_0 = arith.constant 0 : i32
    %c0_i32_1 = arith.constant 0 : i32
    return %arg1, %c0_i32, %c0_i32_0 : i32, i32, i32
  }
  func.func @transform_19(%arg0: i32, %arg1: i32) -> (i32, i32, i32) {
    %c0_i32 = arith.constant 0 : i32
    %c0_i32_0 = arith.constant 0 : i32
    %c0_i32_1 = arith.constant 0 : i32
    return %arg1, %c0_i32, %c0_i32_0 : i32, i32, i32
  }
  func.func @transform_20(%arg0: i32, %arg1: i32) -> (i32, i32, i32) {
    %c0_i32 = arith.constant 0 : i32
    %c0_i32_0 = arith.constant 0 : i32
    %c0_i32_1 = arith.constant 0 : i32
    return %arg1, %c0_i32, %c0_i32_0 : i32, i32, i32
  }
  func.func @transform_21(%arg0: i32, %arg1: i32) -> (i32, i32, i32) {
    %c0_i32 = arith.constant 0 : i32
    %c0_i32_0 = arith.constant 0 : i32
    %c0_i32_1 = arith.constant 0 : i32
    return %arg1, %c0_i32, %c0_i32_0 : i32, i32, i32
  }
  func.func @transform_22(%arg0: i32, %arg1: i32) -> (i32, i32, i32) {
    %c0_i32 = arith.constant 0 : i32
    %c0_i32_0 = arith.constant 0 : i32
    %c0_i32_1 = arith.constant 0 : i32
    return %arg1, %c0_i32, %c0_i32_0 : i32, i32, i32
  }
  func.func @transform_23(%arg0: i32, %arg1: i32) -> (i32, i32, i32) {
    %c0_i32 = arith.constant 0 : i32
    %c0_i32_0 = arith.constant 0 : i32
    %c0_i32_1 = arith.constant 0 : i32
    return %arg1, %c0_i32, %c0_i32_0 : i32, i32, i32
  }
  func.func @transform_24(%arg0: i32, %arg1: i32) -> (i32, i32, i32) {
    %c0_i32 = arith.constant 0 : i32
    %c0_i32_0 = arith.constant 0 : i32
    %c0_i32_1 = arith.constant 0 : i32
    return %arg1, %c0_i32, %c0_i32_0 : i32, i32, i32
  }
  func.func @transform_25(%arg0: i32, %arg1: i32) -> (i32, i32, i32) {
    %c0_i32 = arith.constant 0 : i32
    %c0_i32_0 = arith.constant 0 : i32
    %c0_i32_1 = arith.constant 0 : i32
    return %arg1, %c0_i32, %c0_i32_0 : i32, i32, i32
  }
  func.func @transform_26(%arg0: i32, %arg1: i32) -> (i32, i32, i32) {
    %c0_i32 = arith.constant 0 : i32
    %c0_i32_0 = arith.constant 0 : i32
    %c0_i32_1 = arith.constant 0 : i32
    return %arg1, %c0_i32, %c0_i32_0 : i32, i32, i32
  }
  func.func @transform_27(%arg0: i32, %arg1: i32) -> (i32, i32, i32) {
    %c0_i32 = arith.constant 0 : i32
    %c0_i32_0 = arith.constant 0 : i32
    %c0_i32_1 = arith.constant 0 : i32
    return %arg1, %c0_i32, %c0_i32_0 : i32, i32, i32
  }
  func.func @transform_28(%arg0: i32, %arg1: i32) -> (i32, i32, i32) {
    %c0_i32 = arith.constant 0 : i32
    %c0_i32_0 = arith.constant 0 : i32
    %c0_i32_1 = arith.constant 0 : i32
    return %arg1, %c0_i32, %c0_i32_0 : i32, i32, i32
  }
  func.func @transform_29(%arg0: i32, %arg1: i32) -> (i32, i32, i32) {
    %c0_i32 = arith.constant 0 : i32
    %c0_i32_0 = arith.constant 0 : i32
    %c0_i32_1 = arith.constant 0 : i32
    return %arg1, %c0_i32, %c0_i32_0 : i32, i32, i32
  }
  func.func @transform_30(%arg0: i32, %arg1: i32) -> (i32, i32, i32) {
    %c0_i32 = arith.constant 0 : i32
    %c0_i32_0 = arith.constant 0 : i32
    %c0_i32_1 = arith.constant 0 : i32
    return %arg1, %c0_i32, %c0_i32_0 : i32, i32, i32
  }
  func.func @transform_31(%arg0: i32, %arg1: i32) -> (i32, i32, i32) {
    %c0_i32 = arith.constant 0 : i32
    %c0_i32_0 = arith.constant 0 : i32
    %c0_i32_1 = arith.constant 0 : i32
    return %arg1, %c0_i32, %c0_i32_0 : i32, i32, i32
  }
  func.func @transform_32(%arg0: i32, %arg1: i32) -> (i32, i32, i32) {
    %c0_i32 = arith.constant 0 : i32
    %c0_i32_0 = arith.constant 0 : i32
    %c0_i32_1 = arith.constant 0 : i32
    return %arg0, %c0_i32, %c0_i32_0 : i32, i32, i32
  }
  func.func @transform_33(%arg0: i32, %arg1: i32) -> (i32, i32, i32) {
    %c0_i32 = arith.constant 0 : i32
    %c0_i32_0 = arith.constant 0 : i32
    %c0_i32_1 = arith.constant 0 : i32
    return %arg0, %c0_i32, %c0_i32_0 : i32, i32, i32
  }
  func.func @transform_34(%arg0: i32, %arg1: i32) -> (i32, i32, i32) {
    %c0_i32 = arith.constant 0 : i32
    %c0_i32_0 = arith.constant 0 : i32
    %c0_i32_1 = arith.constant 0 : i32
    return %arg0, %c0_i32, %c0_i32_0 : i32, i32, i32
  }
}

</mosaic_0001>

<bundles_post_ra>
// kernel: identi_decoder_forward.1
= control target key start
LH: loop header
LB: loop body
LE: loop exit
PB: predicated region body
PF: predicated region fallthrough
CT: control target
= control target key end

     0   :  { %s6739_s6 = smov 1   ;;  %s6740_s10 = smov 2   ;;  %s8340_s0 = inlined_call_operand.smem [shape: u32[35], index: -1, kind: input, shape index: {}] }
   0x1   :  { %s6795_s5 = sld [smem:[%s8340_s0]]   ;;  %s6741_s14 = smov 3  }
   0x2   :  { %s6800_s9 = sld [smem:[%s8340_s0 + %s6739_s6]]   ;;  %s6742_s18 = smov 4  }
   0x3   :  { %s6805_s13 = sld [smem:[%s8340_s0 + %s6740_s10]]   ;;  %s6743_s22 = smov 5  }
   0x4   :  { %s6810_s17 = sld [smem:[%s8340_s0 + %s6741_s14]]   ;;  %s6744_s26 = smov 6  }
   0x5   :  { %s6815_s21 = sld [smem:[%s8340_s0 + %s6742_s18]]   ;;  %s6745_s30 = smov 7  }
   0x6   :  { %s6820_s25 = sld [smem:[%s8340_s0 + %s6743_s22]]   ;;  %s6746_s4 = smov 8  }
   0x7   :  { %8404 = sst [smem:[#allocation48_spill]] %s6795_s5  ;;  %s6747_s10 = smov 9  }
   0x8   :  { %8405 = sst [smem:[#allocation49_spill]] %s6800_s9  ;;  %s6748_s15 = smov 10  }
   0x9   :  { %8406 = sst [smem:[#allocation50_spill]] %s6805_s13  ;;  %s6749_s20 = smov 11  }
   0xa   :  { %8407 = sst [smem:[#allocation51_spill]] %s6810_s17  ;;  %s6751_s1 = smov 13  }
   0xb   :  { %8408 = sst [smem:[#allocation52_spill]] %s6815_s21  ;;  %s6752_s7 = smov 14  }
   0xc   :  { %8409 = sst [smem:[#allocation53_spill]] %s6820_s25  ;;  %s6754_s22 = smov 16  }
   0xd   :  { %s6825_s29 = sld [smem:[%s8340_s0 + %s6744_s26]]   ;;  %s6750_s26 = smov 12  }
   0xe   :  { %s6830_s3 = sld [smem:[%s8340_s0 + %s6745_s30]]   ;;  %s6755_s28 = smov 17  }
   0xf   :  { %s6835_s8 = sld [smem:[%s8340_s0 + %s6746_s4]]  }
  0x10   :  { %s6840_s14 = sld [smem:[%s8340_s0 + %s6747_s10]]  }
  0x11   :  { %s6845_s19 = sld [smem:[%s8340_s0 + %s6748_s15]]   ;;  %s6753_s15 = smov 15  }
  0x12   :  { %s6850_s24 = sld [smem:[%s8340_s0 + %s6749_s20]]  }
  0x13   :  { %8410 = sst [smem:[#allocation54_spill]] %s6825_s29 }
  0x14   :  { %8411 = sst [smem:[#allocation55_spill]] %s6830_s3 }
  0x15   :  { %8412 = sst [smem:[#allocation56_spill]] %s6835_s8 }
  0x16   :  { %8413 = sst [smem:[#allocation57_spill]] %s6840_s14 }
  0x17   :  { %8414 = sst [smem:[#allocation58_spill]] %s6845_s19 }
  0x18   :  { %8415 = sst [smem:[#allocation59_spill]] %s6850_s24 }
  0x19   :  { %s6855_s30 = sld [smem:[%s8340_s0 + %s6750_s26]]  }
  0x1a   :  { %s6860_s6 = sld [smem:[%s8340_s0 + %s6751_s1]]  }
  0x1b   :  { %s6865_s12 = sld [smem:[%s8340_s0 + %s6752_s7]]   ;;  %s6756_s7 = smov 18  }
  0x1c   :  { %s6870_s20 = sld [smem:[%s8340_s0 + %s6753_s15]]   ;;  %s6757_s15 = smov 19  }
  0x1d   :  { %s6875_s27 = sld [smem:[%s8340_s0 + %s6754_s22]]   ;;  %s6758_s22 = smov 20  }
  0x1e   :  { %s6880_s4 = sld [smem:[%s8340_s0 + %s6755_s28]]   ;;  %s6759_s28 = smov 21  }
  0x1f   :  { %8416 = sst [smem:[#allocation60_spill]] %s6855_s30 }
  0x20   :  { %8417 = sst [smem:[#allocation61_spill]] %s6860_s6 }
  0x21   :  { %8418 = sst [smem:[#allocation62_spill]] %s6865_s12 }
  0x22   :  { %8419 = sst [smem:[#allocation63_spill]] %s6870_s20 }
  0x23   :  { %8420 = sst [smem:[#allocation64_spill]] %s6875_s27 }
  0x24   :  { %8421 = sst [smem:[#allocation65_spill]] %s6880_s4 }
  0x25   :  { %s6885_s30 = sld [smem:[%s8340_s0 + %s6756_s7]]   ;;  %s6760_s7 = smov 22  }
  0x26   :  { %s6890_s24 = sld [smem:[%s8340_s0 + %s6757_s15]]   ;;  %s6761_s15 = smov 23  }
  0x27   :  { %s6895_s19 = sld [smem:[%s8340_s0 + %s6758_s22]]   ;;  %s6762_s22 = smov 24  }
  0x28   :  { %s6900_s14 = sld [smem:[%s8340_s0 + %s6759_s28]]   ;;  %s6763_s28 = smov 25  }
  0x29   :  { %s6905_s8 = sld [smem:[%s8340_s0 + %s6760_s7]]   ;;  %s6764_s7 = smov 26  }
  0x2a   :  { %s6910_s29 = sld [smem:[%s8340_s0 + %s6761_s15]]   ;;  %s6765_s15 = smov 27  }
  0x2b   :  { %8422 = sst [smem:[#allocation66_spill]] %s6885_s30 }
  0x2c   :  { %8423 = sst [smem:[#allocation67_spill]] %s6890_s24 }
  0x2d   :  { %8424 = sst [smem:[#allocation68_spill]] %s6895_s19 }
  0x2e   :  { %8425 = sst [smem:[#allocation69_spill]] %s6900_s14 }
  0x2f   :  { %8426 = sst [smem:[#allocation70_spill]] %s6905_s8 }
  0x30   :  { %8427 = sst [smem:[#allocation71_spill]] %s6910_s29 }
  0x31   :  { %s6915_s3 = sld [smem:[%s8340_s0 + %s6762_s22]]   ;;  %s6766_s22 = smov 28  }
  0x32   :  { %s6920_s25 = sld [smem:[%s8340_s0 + %s6763_s28]]   ;;  %s6767_s28 = smov 29  }
  0x33   :  { %s6925_s21 = sld [smem:[%s8340_s0 + %s6764_s7]]   ;;  %s6768_s7 = smov 30  }
  0x34   :  { %s6930_s17 = sld [smem:[%s8340_s0 + %s6765_s15]]   ;;  %s6769_s15 = smov 31  }
  0x35   :  { %s6935_s13 = sld [smem:[%s8340_s0 + %s6766_s22]]   ;;  %s6770_s22 = smov 32  }
  0x36   :  { %s6940_s9 = sld [smem:[%s8340_s0 + %s6767_s28]]   ;;  %s6771_s28 = smov 33  }
  0x37   :  { %8428 = sst [smem:[#allocation72_spill]] %s6915_s3 }
  0x38   :  { %8429 = sst [smem:[#allocation73_spill]] %s6920_s25 }
  0x39   :  { %8430 = sst [smem:[#allocation74_spill]] %s6925_s21 }
  0x3a   :  { %8431 = sst [smem:[#allocation75_spill]] %s6930_s17 }
  0x3b   :  { %8432 = sst [smem:[#allocation76_spill]] %s6935_s13 }
  0x3c   :  { %8433 = sst [smem:[#allocation77_spill]] %s6940_s9 }
  0x3d   :  { %s6945_s5 = sld [smem:[%s8340_s0 + %s6768_s7]]   ;;  %s6772_s7 = smov 34  }
  0x3e   :  { %s6950_s17 = sld [smem:[%s8340_s0 + %s6769_s15]]  }
  0x3f   :  { %s6955_s25 = sld [smem:[%s8340_s0 + %s6770_s22]]  }
  0x40   :  { %s6960_s9 = sld [smem:[%s8340_s0 + %s6771_s28]]  }
  0x43   :  { %8434 = sst [smem:[#allocation78_spill]] %s6945_s5 }
  0x44   :  { %8435 = sst [smem:[#allocation79_spill]] %s6950_s17 }
  0x45   :  { %8436 = sst [smem:[#allocation80_spill]] %s6955_s25 }
  0x46   :  { %8437 = sst [smem:[#allocation81_spill]] %s6960_s9 }
  0x47   :  { %s6965_s5 = sld [smem:[%s8340_s0 + %s6772_s7]]  }
  0x4d   :  { %8438 = sst [smem:[#allocation82_spill]] %s6965_s5 }
  0x4e   :  { %75 = vsyncpa [#allocation4], 0 }
  0x4f   :  { %77 = vsyncpa [#allocation4 + $0x1], 0 }
  0x50   :  { %78 = vsyncpa [#allocation7], 0 }
  0x51   :  { %80 = vsyncpa [#allocation7 + $0x1], 0 }
  0x52   :  { %81 = vsyncpa [#allocation10], 0 }
  0x53   :  { %83 = vsyncpa [#allocation10 + $0x1], 0 }
  0x54   :  { %84 = vsyncpa [#allocation13], 0 }
  0x55   :  { %86 = vsyncpa [#allocation13 + $0x1], 0 }
  0x56   :  { %87 = vsyncpa [#allocation16], 0 }
  0x57   :  { %89 = vsyncpa [#allocation16 + $0x1], 0 }
  0x58   :  { %90 = vsyncpa [#allocation19], 0 }
  0x59   :  { %92 = vsyncpa [#allocation19 + $0x1], 0 }
  0x5a   :  { %93 = vsyncpa [#allocation22], 0 }
  0x5b   :  { %95 = vsyncpa [#allocation22 + $0x1], 0 }
  0x5c   :  { %96 = vsyncpa [#allocation25], 0 }
  0x5d   :  { %98 = vsyncpa [#allocation25 + $0x1], 0 }
  0x5e   :  { %99 = vsyncpa [#allocation28], 0 }
  0x5f   :  { %101 = vsyncpa [#allocation28 + $0x1], 0 }
  0x60   :  { %102 = vsyncpa [#allocation31], 0 }
  0x61   :  { %104 = vsyncpa [#allocation31 + $0x1], 0 }
  0x62   :  { %105 = vsyncpa [#allocation5], 0 }
  0x63   :  { %107 = vsyncpa [#allocation5 + $0x1], 0 }
  0x64   :  { %108 = vsyncpa [#allocation34], 0 }
  0x65   :  { %110 = vsyncpa [#allocation34 + $0x1], 0  ;;  %s6967_s0 = smov 0   ;;  %s6969_s15 = smov 0  }
  0x66   :  { %s6971_s16 = smov 0   ;;  %s6973_s18 = smov 0  }
  0x67   :  { %s6975_s22 = smov 0   ;;  %s6977_s23 = smov 0  }
  0x68   :  { %s6979_s26 = smov 0   ;;  %s6981_s28 = smov 0  }
  0x69   :  { %s6983_s1 = smov 0   ;;  %s6985_s2 = smov 0  }
  0x6a   :  { %s6987_s7 = smov 0  }
  0x6b LB: > { %s8439_s30 = sld [smem:[#allocation66_spill]]  ;;  %s7021_s10 = sadd.s32 4294967295, %s6737_s7   ;;  %s6697_s0 = sphi %s6967_s0, %s8568_s0   ;;  %s6737_s7 = sphi %s6987_s7, %s116_s7   ;;  %s6733_s2 = sphi %s6985_s2, %s8577_s2   ;;  %s6729_s1 = sphi %s6983_s1, %s8576_s1   ;;  %s6725_s28 = sphi %s6981_s28, %s8575_s28   ;;  %s6721_s26 = sphi %s6979_s26, %s8574_s26   ;;  %s6717_s23 = sphi %s6977_s23, %s8573_s23   ;;  %s6713_s22 = sphi %s6975_s22, %s8572_s22   ;;  %s6709_s18 = sphi %s6973_s18, %s8571_s18   ;;  %s6705_s16 = sphi %s6971_s16, %s8570_s16   ;;  %s6701_s15 = sphi %s6969_s15, %s8569_s15  }
  0x6c   : > { %s8440_s27 = sld [smem:[#allocation64_spill]]  ;;  %s125_s5 = sadd.s32 1, %s6729_s1 }
  0x6d   : > { %s8441_s24 = sld [smem:[#allocation67_spill]]  ;;  %s128_s25 = sadd.s32 1, %s6733_s2 }
  0x6e   : > { %s8442_s21 = sld [smem:[#allocation74_spill]]  ;;  %p126_p0 = scmp.ge.s32.totalorder %s125_s5, 2 }
  0x6f   : > { %s8443_s20 = sld [smem:[#allocation63_spill]]  ;;  %s473_s9 = sadd.s32 1, %s6717_s23 }
  0x70   : > { %s8444_s19 = sld [smem:[#allocation68_spill]]  ;;  %p480_p1 = scmp.ne.s32.totalorder %s6717_s23, %s6713_s22 }
  0x71   : > { %s8445_s13 = sld [smem:[#allocation76_spill]]  ;;  %p481_p2 = scmp.eq.s32.totalorder %s6737_s7, 0 }
  0x72   : > { %s8446_s8 = sld [smem:[#allocation70_spill]]  ;;  %s8579_s5 = smov (%p126_p0, %s125_s5), 0 }
  0x73   : > { %s8447_s6 = sld [smem:[#allocation61_spill]]  ;;  %s8581_s25 = smov (!%p126_p0, %s128_s25), %s6733_s2 }
  0x74   : > { %s8448_s4 = sld [smem:[#allocation65_spill]]  ;;  %p7035_p3 = por %p481_p2, %p480_p1 }
  0x75   : > { %s8449_s3 = sld [smem:[#allocation72_spill]]  ;;  %p130_p4 = scmp.ge.s32.totalorder %s8581_s25, 2 }
  0x76   : > { %s8450_s12 = sld [smem:[#allocation62_spill]]  ;;  %p486_p6 = scmp.ne.s32.totalorder %s6713_s22, %s6709_s18 }
  0x77   : > { %8451 = sst [smem:[#allocation83_spill]] %s6697_s0  ;;  %p487_p7 = scmp.eq.s32.totalorder %s7021_s10, 0 }
  0x78   : > { %8452 = sst [smem:[#allocation84_spill]] %s6701_s15  ;;  %s8583_s25 = smov (%p130_p4, %s8581_s25), 0 }
  0x79   : > { %8453 = sst [smem:[#allocation85_spill]] %s6705_s16  ;;  %p7046_p8 = por %p487_p7, %p486_p6 }
  0x7a   : > { %8454 = sst [smem:[#allocation86_spill]] %s6713_s22  ;;  %s967_s29 = sadd.s32 1, %s6705_s16 }
  0x7b   : > { %8455 = sst [smem:[#allocation87_spill]] %s6717_s23  ;;  %p977_p10 = scmp.ne.s32.totalorder %s6705_s16, %s6701_s15 }
  0x7c   : > { %8456 = sst [smem:[#allocation88_spill]] %s6721_s26  ;;  %s470_s26 = ssub.s32 %s6729_s1, %s8579_s5 }
  0x7d   : > { %8457 = sst [smem:[#allocation89_spill]] %s6725_s28  ;;  %p471_p5 = scmp.eq.s32.totalorder %s470_s26, 0 }
  0x7e   : > { %8458 = sst [smem:[#allocation90_spill]] %s6729_s1  ;;  %p978_p11 = scmp.eq.s32.totalorder %s7021_s10, 3 }
  0x7f   : > { %8459 = sst [smem:[#allocation91_spill]] %s6733_s2  ;;  %p983_p13 = scmp.ne.s32.totalorder %s6701_s15, %s6697_s0 }
  0x80   : > { %8460 = sst [smem:[#allocation92_spill]] %s6737_s7  ;;  %p7059_p12 = por %p978_p11, %p977_p10 }
  0x81   : > { %8461 = sst [smem:[#allocation93_spill]] %s7021_s10  ;;  %s8471_s18 = sadd.s32 4294967294, %s6737_s7  }
  0x82   : > { %8462 = sst [smem:[#allocation94_spill]] %s8579_s5  ;;  %s964_s5 = ssub.s32 %s6733_s2, %s8583_s25 }
  0x83   : > { %8464 = sst [smem:[#allocation95_spill]] %s8583_s25  ;;  %p965_p9 = scmp.eq.s32.totalorder %s964_s5, 0 }
  0x84   : > { %s7044_s28 = scalar_select %p471_p5, %s6717_s23, %s473_s9  }
  0x85   : > { %s8466_s17 = scalar_select %p7046_p8, 1, 0 }
  0x86   : > { %8465 = sst [smem:[#allocation96_spill]] %s7044_s28  ;;  %p984_p0 = scmp.eq.s32.totalorder %s8471_s18, 3 }
  0x87   : > { %8467 = sst [smem:[#allocation97_spill]] %s8466_s17  ;;  %p5540_p2 = scmp.ge.s32.totalorder %s6737_s7, 4 }
  0x88   : > { %s7057_s14 = scalar_select %p965_p9, %s6705_s16, %s967_s29  }
  0x89   : > { %s8469_s26 = scalar_select %p7059_p12, 1, 0 }
  0x8a   : > { %8468 = sst [smem:[#allocation98_spill]] %s7057_s14  ;;  %p7067_p1 = por %p984_p0, %p983_p13 }
  0x8b   : > { %8470 = sst [smem:[#allocation99_spill]] %s8469_s26  ;;  %1052 = sbr.rel (%p5540_p2) target bundleno = 427 (0x1ab), region = 16 }
  0x8c   : > { %s8472_s9 = scalar_select %p7067_p1, 1, 0 }
  0x8d   : > { %s7073_s5 = sand.u32 (!%p5540_p2), 1, %s6717_s23   ;;  %s7076_s29 = sand.u32 (!%p5540_p2), 1, %s6737_s7  }
  0x8e   : > { %8473 = sst [smem:[#allocation100_spill]] %s8472_s9  ;;  %s7079_s18 = sshll.u32 (!%p5540_p2), %s7073_s5, 4 }
  0x8f   : > { %s7082_s25 = sshll.u32 (!%p5540_p2), %s6729_s1, 4  ;;  %s1165_s28 = scalar_lea.vmem (!%p5540_p2), [#allocation6], %s7079_s18 }
  0x90   : > { %s1170_s2 = scalar_lea.hbm %s8450_s12, %s7082_s25  ;;  %s1173_s14 = sshll.u32 %s1165_s28, 4  ;;  %s1174_s14 = int_to_ptr.vmem [resolvable:$true] %s1173_s14 }
  0x91   : > { %s1171_s16 = sshll.u32 %s1170_s2, 4  ;;  %s8368_s23 = scalar_lea.sflag [#allocation7], %s7076_s29  ;;  %s1172_s16 = int_to_ptr.hbm [resolvable:$true] %s1171_s16 }
  0x92   : > { %s6015_s9 = sshra.s32 %s1172_s16, 4  ;;  %s6021_s26 = scalar_lea.hbm %s8450_s12, 32  ;;  %s6016_s9 = int_to_ptr.hbm [resolvable:$true] %s6015_s9 }
  0x93   : > { %s6017_s0 = scalar_lea.hbm %s6016_s9, 16  ;;  %p6022_p7 = scmp.lt.s32.totalorder %s6016_s9, %s8450_s12 }
  0x94   : > { %p6018_p4 = scmp.ne.s32.totalorder %s6016_s9, %s6017_s0  ;;  %p6023_p9 = scmp.lt.s32.totalorder %s6021_s26, %s6017_s0 }
  0x96   : > { %p6019_p5 = pnand %p6018_p4, %p7035_p3  ;;  %p6024_p10 = por %p6023_p9, %p6022_p7 }
  0x98   : > { %p6020_p6 = pneg %p6019_p5 }
  0x9a   : > { %p6025_p11 = pnand %p6024_p10, %p6020_p6 }
  0x9c   : > { %6028 = shalt.err (!%p6025_p11)
}
  0x9d   : > { %s6773_s15 = smov 64   ;;  %s6774_s28 = smov 4  }
  0x9e   : > { %5752 = dma.hbm_to_vmem [thread:$0]  (%p7035_p3), %s1172_s16, 256, %s1174_s14, %s8368_s23, %s6773_s15, %s6773_s15, %s6774_s28  }
  0x9f   : > { %s1209_s0 = scalar_lea.hbm %s8440_s27, %s7082_s25  ;;  %s1204_s26 = scalar_lea.vmem [#allocation9], %s7079_s18 }
  0xa0   : > { %s1210_s2 = sshll.u32 %s1209_s0, 4  ;;  %s1212_s9 = sshll.u32 %s1204_s26, 4  ;;  %s1211_s2 = int_to_ptr.hbm [resolvable:$true] %s1210_s2  ;;  %s1213_s9 = int_to_ptr.vmem [resolvable:$true] %s1212_s9 }
  0xa1   : > { %s8369_s12 = scalar_lea.sflag [#allocation10], %s7076_s29  ;;  %s6043_s10 = sshra.s32 %s1211_s2, 4  ;;  %s6044_s10 = int_to_ptr.hbm [resolvable:$true] %s6043_s10 }
  0xa2   : > { %s6045_s17 = scalar_lea.hbm %s6044_s10, 16  ;;  %s6049_s22 = scalar_lea.hbm %s8440_s27, 32 }
  0xa3   : > { %p6046_p13 = scmp.ne.s32.totalorder %s6044_s10, %s6045_s17  ;;  %p6050_p4 = scmp.lt.s32.totalorder %s6044_s10, %s8440_s27 }
  0xa4   : > { %p6051_p5 = scmp.lt.s32.totalorder %s6049_s22, %s6045_s17 }
  0xa5   : > { %p6047_p0 = pnand %p6046_p13, %p7035_p3 }
  0xa6   : > { %p6052_p6 = por %p6051_p5, %p6050_p4 }
  0xa7   : > { %p6048_p2 = pneg %p6047_p0 }
  0xa9   : > { %p6053_p7 = pnand %p6052_p6, %p6048_p2 }
  0xab   : > { %6056 = shalt.err (!%p6053_p7)
}
  0xac   : > { %5754 = dma.hbm_to_vmem [thread:$0]  (%p7035_p3), %s1211_s2, 256, %s1213_s9, %s8369_s12, %s6773_s15, %s6773_s15, %s6774_s28  }
  0xad   : > { %s1245_s14 = scalar_lea.hbm %s8439_s30, %s6729_s1  ;;  %s1242_s17 = scalar_lea.vmem [#allocation12], %s7073_s5 }
  0xae   : > { %s1249_s16 = sshll.u32 %s1242_s17, 4  ;;  %s1247_s22 = sshll.u32 %s1245_s14, 4  ;;  %s1250_s16 = int_to_ptr.vmem [resolvable:$true] %s1249_s16  ;;  %s1248_s22 = int_to_ptr.hbm [resolvable:$true] %s1247_s22 }
  0xaf   : > { %s8370_s10 = scalar_lea.sflag [#allocation13], %s7076_s29  ;;  %s6071_s0 = sshra.s32 %s1248_s22, 4  ;;  %s6072_s0 = int_to_ptr.hbm [resolvable:$true] %s6071_s0 }
  0xb0   : > { %s6073_s26 = scalar_lea.hbm %s6072_s0, 1  ;;  %s6077_s23 = scalar_lea.hbm %s8439_s30, 2 }
  0xb1   : > { %p6074_p9 = scmp.ne.s32.totalorder %s6072_s0, %s6073_s26  ;;  %p6078_p13 = scmp.lt.s32.totalorder %s6072_s0, %s8439_s30 }
  0xb2   : > { %p6079_p0 = scmp.lt.s32.totalorder %s6077_s23, %s6073_s26 }
  0xb3   : > { %p6075_p10 = pnand %p6074_p9, %p7035_p3 }
  0xb4   : > { %p6080_p2 = por %p6079_p0, %p6078_p13 }
  0xb5   : > { %p6076_p11 = pneg %p6075_p10 }
  0xb7   : > { %p6081_p4 = pnand %p6080_p2, %p6076_p11 }
  0xb9   : > { %6084 = shalt.err (!%p6081_p4)
}
  0xba   : > { %5756 = dma.hbm_to_vmem [thread:$0]  (%p7035_p3), %s1248_s22, 16, %s1250_s16, %s8370_s10  }
  0xbb   : > { %s1282_s2 = scalar_lea.hbm %s8444_s19, %s7082_s25  ;;  %s1277_s14 = scalar_lea.vmem [#allocation15], %s7079_s18 }
  0xbc   : > { %s1283_s9 = sshll.u32 %s1282_s2, 4  ;;  %s1285_s17 = sshll.u32 %s1277_s14, 4  ;;  %s1284_s9 = int_to_ptr.hbm [resolvable:$true] %s1283_s9  ;;  %s1286_s17 = int_to_ptr.vmem [resolvable:$true] %s1285_s17 }
  0xbd   : > { %s8371_s23 = scalar_lea.sflag [#allocation16], %s7076_s29  ;;  %s6099_s0 = sshra.s32 %s1284_s9, 4  ;;  %s6100_s0 = int_to_ptr.hbm [resolvable:$true] %s6099_s0 }
  0xbe   : > { %s6101_s26 = scalar_lea.hbm %s6100_s0, 16  ;;  %s6105_s12 = scalar_lea.hbm %s8444_s19, 32 }
  0xbf   : > { %p6102_p5 = scmp.ne.s32.totalorder %s6100_s0, %s6101_s26  ;;  %p6106_p9 = scmp.lt.s32.totalorder %s6100_s0, %s8444_s19 }
  0xc0   : > { %p6107_p10 = scmp.lt.s32.totalorder %s6105_s12, %s6101_s26 }
  0xc1   : > { %p6103_p6 = pnand %p6102_p5, %p7035_p3 }
  0xc2   : > { %p6108_p11 = por %p6107_p10, %p6106_p9 }
  0xc3   : > { %p6104_p7 = pneg %p6103_p6 }
  0xc5   : > { %p6109_p13 = pnand %p6108_p11, %p6104_p7 }
  0xc7   : > { %6112 = shalt.err (!%p6109_p13)
}
  0xc8   : > { %5758 = dma.hbm_to_vmem [thread:$0]  (%p7035_p3), %s1284_s9, 256, %s1286_s17, %s8371_s23, %s6773_s15, %s6773_s15, %s6774_s28  }
  0xc9   : > { %s1321_s16 = scalar_lea.hbm %s8446_s8, %s7082_s25  ;;  %s1316_s12 = scalar_lea.vmem [#allocation18], %s7079_s18 }
  0xca   : > { %s1324_s22 = sshll.u32 %s1316_s12, 4  ;;  %s1322_s2 = sshll.u32 %s1321_s16, 4  ;;  %s1325_s22 = int_to_ptr.vmem [resolvable:$true] %s1324_s22  ;;  %s1323_s2 = int_to_ptr.hbm [resolvable:$true] %s1322_s2 }
  0xcb   : > { %s8372_s14 = scalar_lea.sflag [#allocation19], %s7076_s29  ;;  %s6127_s0 = sshra.s32 %s1323_s2, 4  ;;  %s6128_s0 = int_to_ptr.hbm [resolvable:$true] %s6127_s0 }
  0xcc   : > { %s6129_s26 = scalar_lea.hbm %s6128_s0, 16  ;;  %s6133_s10 = scalar_lea.hbm %s8446_s8, 32 }
  0xcd   : > { %p6130_p0 = scmp.ne.s32.totalorder %s6128_s0, %s6129_s26  ;;  %p6134_p5 = scmp.lt.s32.totalorder %s6128_s0, %s8446_s8 }
  0xce   : > { %p6135_p6 = scmp.lt.s32.totalorder %s6133_s10, %s6129_s26 }
  0xcf   : > { %p6131_p2 = pnand %p6130_p0, %p7035_p3 }
  0xd0   : > { %p6136_p7 = por %p6135_p6, %p6134_p5 }
  0xd1   : > { %p6132_p4 = pneg %p6131_p2 }
  0xd3   : > { %p6137_p9 = pnand %p6136_p7, %p6132_p4 }
  0xd5   : > { %6140 = shalt.err (!%p6137_p9)
}
  0xd6   : > { %5760 = dma.hbm_to_vmem [thread:$0]  (%p7035_p3), %s1323_s2, 256, %s1325_s22, %s8372_s14, %s6773_s15, %s6773_s15, %s6774_s28  }
  0xd7   : > { %s1360_s9 = scalar_lea.hbm %s8449_s3, %s7082_s25  ;;  %s1355_s17 = scalar_lea.vmem [#allocation21], %s7079_s18 }
  0xd8   : > { %s1361_s10 = sshll.u32 %s1360_s9, 4  ;;  %s1363_s16 = sshll.u32 %s1355_s17, 4  ;;  %s1362_s10 = int_to_ptr.hbm [resolvable:$true] %s1361_s10  ;;  %s1364_s16 = int_to_ptr.vmem [resolvable:$true] %s1363_s16 }
  0xd9   : > { %s8373_s12 = scalar_lea.sflag [#allocation22], %s7076_s29  ;;  %s6155_s0 = sshra.s32 %s1362_s10, 4  ;;  %s6156_s0 = int_to_ptr.hbm [resolvable:$true] %s6155_s0 }
  0xda   : > { %s6157_s26 = scalar_lea.hbm %s6156_s0, 16  ;;  %s6161_s23 = scalar_lea.hbm %s8449_s3, 32 }
  0xdb   : > { %p6158_p10 = scmp.ne.s32.totalorder %s6156_s0, %s6157_s26  ;;  %p6162_p0 = scmp.lt.s32.totalorder %s6156_s0, %s8449_s3 }
  0xdc   : > { %p6163_p2 = scmp.lt.s32.totalorder %s6161_s23, %s6157_s26 }
  0xdd   : > { %p6159_p11 = pnand %p6158_p10, %p7035_p3 }
  0xde   : > { %p6164_p4 = por %p6163_p2, %p6162_p0 }
  0xdf   : > { %p6160_p13 = pneg %p6159_p11 }
  0xe1   : > { %p6165_p5 = pnand %p6164_p4, %p6160_p13 }
  0xe3   : > { %6168 = shalt.err (!%p6165_p5)
}
  0xe4   : > { %5762 = dma.hbm_to_vmem [thread:$0]  (%p7035_p3), %s1362_s10, 256, %s1364_s16, %s8373_s12, %s6773_s15, %s6773_s15, %s6774_s28  }
  0xe5   : > { %s1396_s22 = scalar_lea.hbm %s8442_s21, %s6729_s1  ;;  %s1393_s23 = scalar_lea.vmem [#allocation24], %s7073_s5 }
  0xe6   : > { %s1400_s2 = sshll.u32 %s1393_s23, 4  ;;  %s1398_s9 = sshll.u32 %s1396_s22, 4  ;;  %s1401_s2 = int_to_ptr.vmem [resolvable:$true] %s1400_s2  ;;  %s1399_s9 = int_to_ptr.hbm [resolvable:$true] %s1398_s9 }
  0xe7   : > { %s8375_s17 = scalar_lea.sflag [#allocation25], %s7076_s29  ;;  %s6183_s0 = sshra.s32 %s1399_s9, 4  ;;  %s6184_s0 = int_to_ptr.hbm [resolvable:$true] %s6183_s0 }
  0xe8   : > { %s6185_s26 = scalar_lea.hbm %s6184_s0, 1  ;;  %s6189_s14 = scalar_lea.hbm %s8442_s21, 2 }
  0xe9   : > { %p6186_p6 = scmp.ne.s32.totalorder %s6184_s0, %s6185_s26  ;;  %p6190_p10 = scmp.lt.s32.totalorder %s6184_s0, %s8442_s21 }
  0xea   : > { %p6191_p11 = scmp.lt.s32.totalorder %s6189_s14, %s6185_s26 }
  0xeb   : > { %p6187_p7 = pnand %p6186_p6, %p7035_p3 }
  0xec   : > { %p6192_p13 = por %p6191_p11, %p6190_p10 }
  0xed   : > { %p6188_p9 = pneg %p6187_p7 }
  0xef   : > { %p6193_p0 = pnand %p6192_p13, %p6188_p9 }
  0xf1   : > { %6196 = shalt.err (!%p6193_p0)
}
  0xf2   : > { %5764 = dma.hbm_to_vmem [thread:$0]  (%p7035_p3), %s1399_s9, 16, %s1401_s2, %s8375_s17  }
  0xf3   : > { %s1433_s10 = scalar_lea.hbm %s8445_s13, %s7082_s25  ;;  %s1428_s22 = scalar_lea.vmem [#allocation27], %s7079_s18 }
  0xf4   : > { %s1434_s16 = sshll.u32 %s1433_s10, 4  ;;  %s1436_s23 = sshll.u32 %s1428_s22, 4  ;;  %s1435_s16 = int_to_ptr.hbm [resolvable:$true] %s1434_s16  ;;  %s1437_s23 = int_to_ptr.vmem [resolvable:$true] %s1436_s23 }
  0xf5   : > { %s8374_s14 = scalar_lea.sflag [#allocation28], %s7076_s29  ;;  %s6211_s0 = sshra.s32 %s1435_s16, 4  ;;  %s6212_s0 = int_to_ptr.hbm [resolvable:$true] %s6211_s0 }
  0xf6   : > { %s6213_s26 = scalar_lea.hbm %s6212_s0, 16  ;;  %s6217_s12 = scalar_lea.hbm %s8445_s13, 32 }
  0xf7   : > { %p6214_p2 = scmp.ne.s32.totalorder %s6212_s0, %s6213_s26  ;;  %p6218_p6 = scmp.lt.s32.totalorder %s6212_s0, %s8445_s13 }
  0xf8   : > { %p6219_p7 = scmp.lt.s32.totalorder %s6217_s12, %s6213_s26 }
  0xf9   : > { %p6215_p4 = pnand %p6214_p2, %p7035_p3 }
  0xfa   : > { %p6220_p9 = por %p6219_p7, %p6218_p6 }
  0xfb   : > { %p6216_p5 = pneg %p6215_p4 }
  0xfd   : > { %p6221_p10 = pnand %p6220_p9, %p6216_p5 }
  0xff   : > { %6224 = shalt.err (!%p6221_p10)
}
 0x100   : > { %5766 = dma.hbm_to_vmem [thread:$0]  (%p7035_p3), %s1435_s16, 256, %s1437_s23, %s8374_s14, %s6773_s15, %s6773_s15, %s6774_s28  }
 0x101   : > { %s1150_s25 = scalar_lea.hbm %s8447_s6, %s6729_s1  ;;  %s1147_s18 = scalar_lea.vmem [#allocation3], %s7073_s5 }
 0x102   : > { %s1154_s12 = sshll.u32 %s1147_s18, 4  ;;  %s1152_s2 = sshll.u32 %s1150_s25, 4  ;;  %s1155_s12 = int_to_ptr.vmem [resolvable:$true] %s1154_s12  ;;  %s1153_s2 = int_to_ptr.hbm [resolvable:$true] %s1152_s2 }
 0x103   : > { %s1145_s9 = scalar_lea.sflag [#allocation4], %s7073_s5  ;;  %s6239_s10 = sshra.s32 %s1153_s2, 4  ;;  %s6240_s10 = int_to_ptr.hbm [resolvable:$true] %s6239_s10 }
 0x104   : > { %s6241_s22 = scalar_lea.hbm %s6240_s10, 1  ;;  %s6245_s0 = scalar_lea.hbm %s8447_s6, 2 }
 0x105   : > { %p6242_p11 = scmp.ne.s32.totalorder %s6240_s10, %s6241_s22  ;;  %p6246_p2 = scmp.lt.s32.totalorder %s6240_s10, %s8447_s6 }
 0x106   : > { %p6247_p4 = scmp.lt.s32.totalorder %s6245_s0, %s6241_s22 }
 0x107   : > { %p6243_p13 = pnand %p6242_p11, %p7035_p3 }
 0x108   : > { %p6248_p5 = por %p6247_p4, %p6246_p2 }
 0x109   : > { %p6244_p0 = pneg %p6243_p13 }
 0x10b   : > { %p6249_p6 = pnand %p6248_p5, %p6244_p0 }
 0x10d   : > { %6252 = shalt.err (!%p6249_p6)
}
 0x10e   : > { %5751 = dma.hbm_to_vmem [thread:$0]  (%p7035_p3), %s1153_s2, 16, %s1155_s12, %s1145_s9  }
 0x10f   : > { %s1189_s15 = scalar_lea.hbm %s8443_s20, %s6729_s1  ;;  %s1186_s28 = scalar_lea.vmem [#allocation8], %s7073_s5 }
 0x110   : > { %s1193_s16 = sshll.u32 %s1186_s28, 4  ;;  %s1191_s23 = sshll.u32 %s1189_s15, 4  ;;  %s1194_s16 = int_to_ptr.vmem [resolvable:$true] %s1193_s16  ;;  %s1192_s23 = int_to_ptr.hbm [resolvable:$true] %s1191_s23 }
 0x111   : > { %s6267_s26 = sshra.s32 %s1192_s23, 4  ;;  %s6273_s18 = scalar_lea.hbm %s8443_s20, 2  ;;  %s6268_s26 = int_to_ptr.hbm [resolvable:$true] %s6267_s26 }
 0x112   : > { %s6269_s25 = scalar_lea.hbm %s6268_s26, 1  ;;  %p6274_p11 = scmp.lt.s32.totalorder %s6268_s26, %s8443_s20 }
 0x113   : > { %p6270_p7 = scmp.ne.s32.totalorder %s6268_s26, %s6269_s25  ;;  %p6275_p13 = scmp.lt.s32.totalorder %s6273_s18, %s6269_s25 }
 0x115   : > { %p6271_p9 = pnand %p6270_p7, %p7035_p3  ;;  %p6276_p0 = por %p6275_p13, %p6274_p11 }
 0x117   : > { %p6272_p10 = pneg %p6271_p9 }
 0x119   : > { %p6277_p2 = pnand %p6276_p0, %p6272_p10 }
 0x11b   : > { %6280 = shalt.err (!%p6277_p2)
}
 0x11c   : > { %s8474_s12 = scalar_lea.sflag [#allocation7], %s7076_s29  ;;  %s1228_s2 = scalar_lea.hbm %s8448_s4, %s6729_s1 }
 0x11d   : > { %5753 = dma.hbm_to_vmem [thread:$0]  (%p7035_p3), %s1192_s23, 16, %s1194_s16, %s8474_s12  }
 0x11e   : > { %s1225_s9 = scalar_lea.vmem [#allocation11], %s7073_s5  ;;  %s1230_s22 = sshll.u32 %s1228_s2, 4  ;;  %s1231_s22 = int_to_ptr.hbm [resolvable:$true] %s1230_s22 }
 0x11f   : > { %s1232_s10 = sshll.u32 %s1225_s9, 4  ;;  %s6295_s0 = sshra.s32 %s1231_s22, 4  ;;  %s1233_s10 = int_to_ptr.vmem [resolvable:$true] %s1232_s10  ;;  %s6296_s0 = int_to_ptr.hbm [resolvable:$true] %s6295_s0 }
 0x120   : > { %s6297_s15 = scalar_lea.hbm %s6296_s0, 1  ;;  %s6301_s28 = scalar_lea.hbm %s8448_s4, 2 }
 0x121   : > { %p6298_p4 = scmp.ne.s32.totalorder %s6296_s0, %s6297_s15  ;;  %p6302_p7 = scmp.lt.s32.totalorder %s6296_s0, %s8448_s4 }
 0x122   : > { %p6303_p9 = scmp.lt.s32.totalorder %s6301_s28, %s6297_s15 }
 0x123   : > { %p6299_p5 = pnand %p6298_p4, %p7035_p3 }
 0x124   : > { %p6304_p10 = por %p6303_p9, %p6302_p7 }
 0x125   : > { %p6300_p6 = pneg %p6299_p5 }
 0x127   : > { %p6305_p11 = pnand %p6304_p10, %p6300_p6 }
 0x129   : > { %6308 = shalt.err (!%p6305_p11)
}
 0x12a   : > { %s8475_s16 = scalar_lea.sflag [#allocation10], %s7076_s29  ;;  %s1262_s23 = scalar_lea.hbm %s8441_s24, %s6729_s1 }
 0x12b   : > { %5755 = dma.hbm_to_vmem [thread:$0]  (%p7035_p3), %s1231_s22, 16, %s1233_s10, %s8475_s16  }
 0x12c   : > { %s1259_s26 = scalar_lea.vmem [#allocation14], %s7073_s5  ;;  %s1264_s18 = sshll.u32 %s1262_s23, 4  ;;  %s1265_s18 = int_to_ptr.hbm [resolvable:$true] %s1264_s18 }
 0x12d   : > { %s1266_s25 = sshll.u32 %s1259_s26, 4  ;;  %s6323_s12 = sshra.s32 %s1265_s18, 4  ;;  %s1267_s25 = int_to_ptr.vmem [resolvable:$true] %s1266_s25  ;;  %s6324_s12 = int_to_ptr.hbm [resolvable:$true] %s6323_s12 }
 0x12e   : > { %s6325_s2 = scalar_lea.hbm %s6324_s12, 1  ;;  %s6329_s9 = scalar_lea.hbm %s8441_s24, 2 }
 0x12f   : > { %p6326_p13 = scmp.ne.s32.totalorder %s6324_s12, %s6325_s2  ;;  %p6330_p4 = scmp.lt.s32.totalorder %s6324_s12, %s8441_s24 }
 0x130   : > { %p6331_p5 = scmp.lt.s32.totalorder %s6329_s9, %s6325_s2 }
 0x131   : > { %p6327_p0 = pnand %p6326_p13, %p7035_p3 }
 0x132   : > { %p6332_p6 = por %p6331_p5, %p6330_p4 }
 0x133   : > { %p6328_p2 = pneg %p6327_p0 }
 0x135   : > { %p6333_p7 = pnand %p6332_p6, %p6328_p2 }
 0x137   : > { %6336 = shalt.err (!%p6333_p7)
}
 0x138   : > { %s8476_s10 = scalar_lea.sflag [#allocation13], %s7076_s29  ;;  %s8477_s22 = sld [smem:[#allocation69_spill]] }
 0x139   : > { %5757 = dma.hbm_to_vmem [thread:$0]  (%p7035_p3), %s1265_s18, 16, %s1267_s25, %s8476_s10  }
 0x13a   : > { %s1298_s15 = scalar_lea.vmem [#allocation17], %s7073_s5 }
 0x13b   : > { %s1305_s28 = sshll.u32 %s1298_s15, 4  ;;  %s1306_s28 = int_to_ptr.vmem [resolvable:$true] %s1305_s28 }
 0x13e   : > { %s8478_s14 = smov %s8477_s22  ;;  %s1301_s0 = scalar_lea.hbm %s8477_s22, %s6729_s1 }
 0x13f   : > { %s1303_s16 = sshll.u32 %s1301_s0, 4  ;;  %s6357_s12 = scalar_lea.hbm %s8478_s14, 2  ;;  %s1304_s16 = int_to_ptr.hbm [resolvable:$true] %s1303_s16 }
 0x140   : > { %s6351_s23 = sshra.s32 %s1304_s16, 4  ;;  %s6352_s23 = int_to_ptr.hbm [resolvable:$true] %s6351_s23 }
 0x141   : > { %s6353_s26 = scalar_lea.hbm %s6352_s23, 1  ;;  %p6358_p13 = scmp.lt.s32.totalorder %s6352_s23, %s8478_s14 }
 0x142   : > { %p6354_p9 = scmp.ne.s32.totalorder %s6352_s23, %s6353_s26  ;;  %p6359_p0 = scmp.lt.s32.totalorder %s6357_s12, %s6353_s26 }
 0x144   : > { %p6355_p10 = pnand %p6354_p9, %p7035_p3  ;;  %p6360_p2 = por %p6359_p0, %p6358_p13 }
 0x146   : > { %p6356_p11 = pneg %p6355_p10 }
 0x148   : > { %p6361_p4 = pnand %p6360_p2, %p6356_p11 }
 0x14a   : > { %6364 = shalt.err (!%p6361_p4)
}
 0x14b   : > { %s8479_s25 = scalar_lea.sflag [#allocation16], %s7076_s29  ;;  %s8480_s18 = sld [smem:[#allocation71_spill]] }
 0x14c   : > { %5759 = dma.hbm_to_vmem [thread:$0]  (%p7035_p3), %s1304_s16, 16, %s1306_s28, %s8479_s25  }
 0x14d   : > { %s1337_s10 = scalar_lea.vmem [#allocation20], %s7073_s5 }
 0x14e   : > { %s1344_s22 = sshll.u32 %s1337_s10, 4  ;;  %s1345_s22 = int_to_ptr.vmem [resolvable:$true] %s1344_s22 }
 0x151   : > { %s8481_s9 = smov %s8480_s18  ;;  %s1340_s2 = scalar_lea.hbm %s8480_s18, %s6729_s1 }
 0x152   : > { %s1342_s0 = sshll.u32 %s1340_s2, 4  ;;  %s6385_s26 = scalar_lea.hbm %s8481_s9, 2  ;;  %s1343_s0 = int_to_ptr.hbm [resolvable:$true] %s1342_s0 }
 0x153   : > { %s6379_s15 = sshra.s32 %s1343_s0, 4  ;;  %s6380_s15 = int_to_ptr.hbm [resolvable:$true] %s6379_s15 }
 0x154   : > { %s6381_s23 = scalar_lea.hbm %s6380_s15, 1  ;;  %p6386_p9 = scmp.lt.s32.totalorder %s6380_s15, %s8481_s9 }
 0x155   : > { %p6382_p5 = scmp.ne.s32.totalorder %s6380_s15, %s6381_s23  ;;  %p6387_p10 = scmp.lt.s32.totalorder %s6385_s26, %s6381_s23 }
 0x157   : > { %p6383_p6 = pnand %p6382_p5, %p7035_p3  ;;  %p6388_p11 = por %p6387_p10, %p6386_p9 }
 0x159   : > { %p6384_p7 = pneg %p6383_p6 }
 0x15b   : > { %p6389_p13 = pnand %p6388_p11, %p6384_p7 }
 0x15d   : > { %6392 = shalt.err (!%p6389_p13)
}
 0x15e   : > { %s8482_s28 = scalar_lea.sflag [#allocation19], %s7076_s29  ;;  %s8483_s16 = sld [smem:[#allocation73_spill]] }
 0x15f   : > { %5761 = dma.hbm_to_vmem [thread:$0]  (%p7035_p3), %s1343_s0, 16, %s1345_s22, %s8482_s28  }
 0x160   : > { %s1376_s18 = scalar_lea.vmem [#allocation23], %s7073_s5 }
 0x161   : > { %s1383_s2 = sshll.u32 %s1376_s18, 4  ;;  %s1384_s2 = int_to_ptr.vmem [resolvable:$true] %s1383_s2 }
 0x164   : > { %s8484_s12 = smov %s8483_s16  ;;  %s1379_s25 = scalar_lea.hbm %s8483_s16, %s6729_s1 }
 0x165   : > { %s1381_s10 = sshll.u32 %s1379_s25, 4  ;;  %s6413_s26 = scalar_lea.hbm %s8484_s12, 2  ;;  %s1382_s10 = int_to_ptr.hbm [resolvable:$true] %s1381_s10 }
 0x166   : > { %s6407_s15 = sshra.s32 %s1382_s10, 4  ;;  %s6408_s15 = int_to_ptr.hbm [resolvable:$true] %s6407_s15 }
 0x167   : > { %s6409_s23 = scalar_lea.hbm %s6408_s15, 1  ;;  %p6414_p5 = scmp.lt.s32.totalorder %s6408_s15, %s8484_s12 }
 0x168   : > { %p6410_p0 = scmp.ne.s32.totalorder %s6408_s15, %s6409_s23  ;;  %p6415_p6 = scmp.lt.s32.totalorder %s6413_s26, %s6409_s23 }
 0x16a   : > { %p6411_p2 = pnand %p6410_p0, %p7035_p3  ;;  %p6416_p7 = por %p6415_p6, %p6414_p5 }
 0x16c   : > { %p6412_p4 = pneg %p6411_p2 }
 0x16e   : > { %p6417_p9 = pnand %p6416_p7, %p6412_p4 }
 0x170   : > { %6420 = shalt.err (!%p6417_p9)
}
 0x171   : > { %s8485_s22 = scalar_lea.sflag [#allocation22], %s7076_s29  ;;  %s8486_s0 = sld [smem:[#allocation75_spill]] }
 0x172   : > { %5763 = dma.hbm_to_vmem [thread:$0]  (%p7035_p3), %s1382_s10, 16, %s1384_s2, %s8485_s22  }
 0x173   : > { %s1410_s16 = scalar_lea.vmem [#allocation26], %s7073_s5 }
 0x174   : > { %s1417_s18 = sshll.u32 %s1410_s16, 4  ;;  %s1418_s18 = int_to_ptr.vmem [resolvable:$true] %s1417_s18 }
 0x177   : > { %s8487_s25 = smov %s8486_s0  ;;  %s1413_s28 = scalar_lea.hbm %s8486_s0, %s6729_s1 }
 0x178   : > { %s1415_s17 = sshll.u32 %s1413_s28, 4  ;;  %s6441_s26 = scalar_lea.hbm %s8487_s25, 2  ;;  %s1416_s17 = int_to_ptr.hbm [resolvable:$true] %s1415_s17 }
 0x179   : > { %s6435_s15 = sshra.s32 %s1416_s17, 4  ;;  %s6436_s15 = int_to_ptr.hbm [resolvable:$true] %s6435_s15 }
 0x17a   : > { %s6437_s23 = scalar_lea.hbm %s6436_s15, 1  ;;  %p6442_p0 = scmp.lt.s32.totalorder %s6436_s15, %s8487_s25 }
 0x17b   : > { %p6438_p10 = scmp.ne.s32.totalorder %s6436_s15, %s6437_s23  ;;  %p6443_p2 = scmp.lt.s32.totalorder %s6441_s26, %s6437_s23 }
 0x17d   : > { %p6439_p11 = pnand %p6438_p10, %p7035_p3  ;;  %p6444_p4 = por %p6443_p2, %p6442_p0 }
 0x17f   : > { %p6440_p13 = pneg %p6439_p11 }
 0x181   : > { %p6445_p5 = pnand %p6444_p4, %p6440_p13 }
 0x183   : > { %6448 = shalt.err (!%p6445_p5)
}
 0x184   : > { %s8488_s2 = scalar_lea.sflag [#allocation25], %s7076_s29  ;;  %s8489_s10 = sld [smem:[#allocation77_spill]] }
 0x185   : > { %5765 = dma.hbm_to_vmem [thread:$0]  (%p7035_p3), %s1416_s17, 16, %s1418_s18, %s8488_s2  }
 0x186   : > { %s1449_s0 = scalar_lea.vmem [#allocation29], %s7073_s5 }
 0x187   : > { %s1456_s28 = sshll.u32 %s1449_s0, 4  ;;  %s1457_s28 = int_to_ptr.vmem [resolvable:$true] %s1456_s28 }
 0x18a   : > { %s1452_s22 = scalar_lea.hbm %s8489_s10, %s6729_s1  ;;  %s6469_s26 = scalar_lea.hbm %s8489_s10, 2 }
 0x18b   : > { %s1454_s16 = sshll.u32 %s1452_s22, 4  ;;  %s1455_s16 = int_to_ptr.hbm [resolvable:$true] %s1454_s16 }
 0x18c   : > { %s6463_s15 = sshra.s32 %s1455_s16, 4  ;;  %s6464_s15 = int_to_ptr.hbm [resolvable:$true] %s6463_s15 }
 0x18d   : > { %s6465_s23 = scalar_lea.hbm %s6464_s15, 1  ;;  %p6470_p10 = scmp.lt.s32.totalorder %s6464_s15, %s8489_s10 }
 0x18e   : > { %p6466_p6 = scmp.ne.s32.totalorder %s6464_s15, %s6465_s23  ;;  %p6471_p11 = scmp.lt.s32.totalorder %s6469_s26, %s6465_s23 }
 0x190   : > { %p6467_p7 = pnand %p6466_p6, %p7035_p3  ;;  %p6472_p13 = por %p6471_p11, %p6470_p10 }
 0x192   : > { %p6468_p9 = pneg %p6467_p7 }
 0x194   : > { %p6473_p0 = pnand %p6472_p13, %p6468_p9 }
 0x196   : > { %6476 = shalt.err (!%p6473_p0)
}
 0x197   : > { %s8490_s17 = scalar_lea.sflag [#allocation28], %s7076_s29  ;;  %s8491_s18 = sld [smem:[#allocation79_spill]] }
 0x198   : > { %5767 = dma.hbm_to_vmem [thread:$0]  (%p7035_p3), %s1455_s16, 16, %s1457_s28, %s8490_s17  }
 0x199   : > { %s1474_s0 = scalar_lea.vmem [#allocation30], %s7073_s5  ;;  %s1472_s23 = scalar_lea.sflag [#allocation31], %s7073_s5 }
 0x19a   : > { %s1481_s15 = sshll.u32 %s1474_s0, 4  ;;  %s1482_s15 = int_to_ptr.vmem [resolvable:$true] %s1481_s15 }
 0x19d   : > { %s8492_s3 = smov %s8491_s18  ;;  %s1477_s2 = scalar_lea.hbm %s8491_s18, %s6729_s1 }
 0x19e   : > { %s1479_s22 = sshll.u32 %s1477_s2, 4  ;;  %s6497_s29 = scalar_lea.hbm %s8492_s3, 2  ;;  %s1480_s22 = int_to_ptr.hbm [resolvable:$true] %s1479_s22 }
 0x19f   : > { %s6491_s26 = sshra.s32 %s1480_s22, 4  ;;  %s6492_s26 = int_to_ptr.hbm [resolvable:$true] %s6491_s26 }
 0x1a0   : > { %s6493_s4 = scalar_lea.hbm %s6492_s26, 1  ;;  %p6498_p6 = scmp.lt.s32.totalorder %s6492_s26, %s8492_s3 }
 0x1a1   : > { %p6494_p2 = scmp.ne.s32.totalorder %s6492_s26, %s6493_s4  ;;  %p6499_p7 = scmp.lt.s32.totalorder %s6497_s29, %s6493_s4 }
 0x1a3   : > { %p6495_p4 = pnand %p6494_p2, %p7035_p3  ;;  %p6500_p9 = por %p6499_p7, %p6498_p6 }
 0x1a5   : > { %p6496_p5 = pneg %p6495_p4 }
 0x1a7   : > { %p6501_p10 = pnand %p6500_p9, %p6496_p5 }
 0x1a9   : > { %6504 = shalt.err (!%p6501_p10)
}
 0x1aa   : > { %5768 = dma.hbm_to_vmem [thread:$0]  (%p7035_p3), %s1480_s22, 16, %s1482_s15, %s1472_s23  }
 0x1ab PF: > { %p5559_p11 = scmp.ge.s32.totalorder %s6737_s7, 1  ;;  %p1486_p13 = scmp.lt.s32.totalorder %s6737_s7, 5 }
 0x1ad   : > { %p1487_p0 = pnand %p5559_p11, %p1486_p13 }
 0x1af   : > { %1490 = sbr.rel (%p1487_p0) target bundleno = 5029 (0x13a5), region = 148 }
 0x1b4   : > { %s8493_s5 = sld [smem:[#allocation86_spill]] }
 0x1ba   : > { %s7309_s16 = sand.u32 1, %s8493_s5  }
 0x1bb   : > { %8495 = sst [smem:[#allocation101_spill]] %s7309_s16  ;;  %s1493_s4 = scalar_lea.sflag [#allocation4], %s7309_s16 }
 0x1bc   : > { %6648 = dma.done.wait (%p7046_p8), %s1493_s4, 16  }
 0x1bd   : > { %6650 = vsyncadd (%p7046_p8), %s1493_s4, 4294967280  ;;  %s8496_s11 = sld [smem:[#allocation93_spill]]  ;;  %s7321_s2 = sshll.u32 %s7309_s16, 4 }
 0x1be   : > { %8498 = sst [smem:[#allocation103_spill]] %s7321_s2 }
 0x1c3   : > { %s7318_s18 = sand.u32 1, %s8496_s11  }
 0x1c4   : > { %8497 = sst [smem:[#allocation102_spill]] %s7318_s18  ;;  %s1502_s22 = scalar_lea.sflag [#allocation7], %s7318_s18 }
 0x1c5   : > { %6652 = dma.done.wait (%p7046_p8), %s1502_s22, 272  }
 0x1c6   : > { %6654 = vsyncadd (%p7046_p8), %s1502_s22, 4294967024  ;;  %s1521_s23 = scalar_lea.sflag [#allocation10], %s7318_s18 }
 0x1c7   : > { %6656 = dma.done.wait (%p7046_p8), %s1521_s23, 272  }
 0x1c8   : > { %6658 = vsyncadd (%p7046_p8), %s1521_s23, 4294967024  ;;  %s1540_s5 = scalar_lea.sflag [#allocation13], %s7318_s18 }
 0x1c9   : > { %6660 = dma.done.wait (%p7046_p8), %s1540_s5, 32  }
 0x1ca   : > { %6662 = vsyncadd (%p7046_p8), %s1540_s5, 4294967264  ;;  %s1558_s22 = scalar_lea.sflag [#allocation16], %s7318_s18 }
 0x1cb   : > { %6664 = dma.done.wait (%p7046_p8), %s1558_s22, 272  }
 0x1cc   : > { %6666 = vsyncadd (%p7046_p8), %s1558_s22, 4294967024  ;;  %s1577_s4 = scalar_lea.sflag [#allocation19], %s7318_s18 }
 0x1cd   : > { %6668 = dma.done.wait (%p7046_p8), %s1577_s4, 272  }
 0x1ce   : > { %6670 = vsyncadd (%p7046_p8), %s1577_s4, 4294967024  ;;  %s1596_s11 = scalar_lea.sflag [#allocation22], %s7318_s18 }
 0x1cf   : > { %6672 = dma.done.wait (%p7046_p8), %s1596_s11, 272  }
 0x1d0   : > { %6674 = vsyncadd (%p7046_p8), %s1596_s11, 4294967024  ;;  %s1615_s23 = scalar_lea.sflag [#allocation25], %s7318_s18 }
 0x1d1   : > { %6676 = dma.done.wait (%p7046_p8), %s1615_s23, 32  }
 0x1d2   : > { %6678 = vsyncadd (%p7046_p8), %s1615_s23, 4294967264  ;;  %s1633_s26 = scalar_lea.sflag [#allocation28], %s7318_s18 }
 0x1d3   : > { %6680 = dma.done.wait (%p7046_p8), %s1633_s26, 272  }
 0x1d4   : > { %6682 = vsyncadd (%p7046_p8), %s1633_s26, 4294967024  ;;  %s1652_s29 = scalar_lea.sflag [#allocation31], %s7309_s16 }
 0x1d5   : > { %6684 = dma.done.wait (%p7046_p8), %s1652_s29, 16  }
 0x1d6   : > { %6686 = vsyncadd (%p7046_p8), %s1652_s29, 4294967280  ;;  %s8499_s23 = sld [smem:[#allocation84_spill]] }
 0x1d7   : > { %s8500_s4 = sld [smem:[#allocation89_spill]] }
 0x1d8   : > { %s8501_s5 = sld [smem:[#allocation88_spill]] }
 0x1d9   : > { %s8502_s17 = sld [smem:[#allocation48_spill]] }
 0x1da   : > { %s8503_s26 = sld [smem:[#allocation49_spill]] }
 0x1db   : > { %s8504_s15 = sld [smem:[#allocation50_spill]] }
 0x1dc   : > { %s8505_s0 = sld [smem:[#allocation51_spill]]  ;;  %s8385_s8 = sand.u32 1, %s8499_s23  }
 0x1dd   : > { %s8506_s3 = sld [smem:[#allocation52_spill]]  ;;  %p1877_p3 = scmp.lt.s32.totalorder %s8500_s4, 1 }
 0x1de   : > { %s8507_s6 = sld [smem:[#allocation53_spill]]  ;;  %s7389_s28 = sshll.u32 %s8385_s8, 3 }
 0x1df   : > { %s8508_s11 = sld [smem:[#allocation55_spill]]  ;;  %p1899_p8 = scmp.lt.s32.totalorder %s8501_s5, 1 }
 0x1e0   : > { %s8509_s22 = sld [smem:[#allocation54_spill]]  ;;  %s8585_s4 = smov (!%p1877_p3, %s8500_s4), 1 }
 0x1e1   : > { %s8510_s9 = sld [smem:[#allocation56_spill]]  ;;  %s5569_s8 = sshll.u32 %s8585_s4, 3 }
 0x1e2   : > { %s8511_s29 = sld [smem:[#allocation57_spill]]  ;;  %s5572_s14 = sshll.u32 %s8585_s4, 2 }
 0x1e3   : > { %s8512_s10 = sld [smem:[#allocation58_spill]]  ;;  %s1880_s20 = scalar_lea.vmem %s8502_s17, %s5569_s8 }
 0x1e4   : > { %s8513_s12 = sld [smem:[#allocation59_spill]]  ;;  %s7402_s21 = scalar_lea.vmem %s8503_s26, %s5569_s8 }
 0x1e5   : > { %s7396_s13 = scalar_select %p1899_p8, %s8501_s5, 1 }
 0x1e6   : > { %s8514_s23 = sld [smem:[#allocation60_spill]]  ;;  %s7405_s24 = scalar_lea.vmem %s8504_s15, %s5572_s14 }
 0x1e7   : > { %s8515_s19 = sld [smem:[#allocation78_spill]]  ;;  %s1892_s25 = scalar_lea.vmem %s8505_s0, %s8585_s4 }
 0x1e8   : > { %8516 = sst [smem:[#allocation104_spill]] %s7402_s21  ;;  %s1895_s27 = scalar_lea.vmem %s8506_s3, %s8585_s4 }
 0x1e9   : > { %8517 = sst [smem:[#allocation105_spill]] %s7405_s24  ;;  %s1898_s30 = scalar_lea.vmem %s8507_s6, %s8585_s4 }
 0x1ea   : > { %s5724_s1 = sshll.u32 %s7396_s13, 4  ;;  %s1906_s7 = scalar_lea.vmem %s8508_s11, %s7396_s13 }
 0x1eb   : > { %s1903_s18 = scalar_lea.vmem %s8509_s22, %s5724_s1  ;;  %s7418_s16 = scalar_lea.vmem %s8510_s9, %s5724_s1 }
 0x1ec   : > { %s1914_s2 = scalar_lea.vmem %s8511_s29, %s7396_s13  ;;  %s1917_s5 = scalar_lea.vmem %s8512_s10, %s7396_s13 }
 0x1ed   : > { %s1920_s17 = scalar_lea.vmem %s8513_s12, %s7396_s13  ;;  %s7427_s8 = scalar_lea.vmem %s8514_s23, %s5724_s1 }
 0x1ee   : > { %s5727_s26 = sshll.u32 %s7396_s13, 5  ;;  %s1862_s14 = scalar_lea.vmem [#allocation32], %s7389_s28 }
 0x1ef   : > { %s7431_s21 = scalar_lea.vmem %s8515_s19, %s5727_s26  ;;  %s1869_s15 = scalar_lea.vmem [#allocation33], %s7389_s28 }
 0x1f0   : > { %s1876_s24 = scalar_lea.vmem [#allocation35], %s7389_s28  ;;  %s8518_s0 = sld [smem:[#allocation88_spill]] }
 0x1f6   : > { %p5581_p2 = scmp.ne.s32.totalorder %s8518_s0, 0 }
 0x1f8   : > { %1935 = sbr.rel (%p5581_p2) target bundleno = 511 (0x1ff), region = 224 }
 0x1fd   : > { %v1936_v0 = vld [vmem:[%s1880_s20] sm:$0xff]  ;;  %vm1937_vm0 = vcmask 261120  }
 0x1fe   : > { %1938 = vst.msk [vmem:[#allocation2] sm:$0xff] %vm1937_vm0, %v1936_v0 }
 0x1ff PF: > { %v5730_v1 = vld [vmem:[%s1903_s18 + $0x8] sm:$0xff]  ;;  %v5729_v2 = vld [vmem:[%s1903_s18] sm:$0xff]  ;;  %vm1977_vm1 = vcmask 261120   ;;  %s6775_s3 = smov 104   ;;  %s6776_s19 = smov 120   ;;  %vm2025_vm2 = vcmask 1047556  }
 0x200   : > { %1987 = vmatpush.bf16.msra.mxu0 %v5730_v1  ;;  %v5940_v5 = vld [vmem:[%s1906_s7] ss:$0 sm:$0xff]  ;;  %s6777_s6 = smov 96   ;;  %s6778_s20 = smov 112   ;;  %v6780_v14 = vmov 1983009808  }
 0x201   : > { %s6779_s1 = smov 64   ;;  %v2016_v15 = vunpack.c.l.s4 %v6780_v14  ;;  %v6781_v26 = vmov 1934713408   ;;  %vm2361_vm3 = vcmask 64512   ;;  %vm2489_vm5 = vcmask 1043456   ;;  %s6783_s9 = smov 24  }
 0x202   : > { %v2030_v27 = vunpack.c.l.s4 %v6781_v26  ;;  %s6784_s12 = smov 16   ;;  %s8520_s10 = sld [smem:[#allocation103_spill]]  ;;  %vm2687_vm6 = vcmask 130048   ;;  %vm2689_vm7 = vcmask 195584  }
 0x203   : > { %v7462_v20 = vunpack.c.0.s8 %v2016_v15  ;;  %s8521_s18 = sld [smem:[#allocation104_spill]] }
 0x204   : > { %1988 = vmatpush.bf16.msra.mxu0 %v5729_v2  ;;  %v7471_v32 = vunpack.c.0.s8 %v2030_v27  ;;  %s8525_s29 = sld [smem:[#allocation101_spill]] }
 0x205   : > { %v7437_v3 = vld [vmem:[#allocation2] sm:$0xff] }
 0x206   : > { %v1956_v4 = vpack.c.bf16 %v7437_v3, %v7437_v3 }
 0x208   : > { %5590 = vmatmul.msk.bf16.vlgmr.msra.gmra.mxu0 %vm1977_vm1, %v1956_v4  ;;  %s8523_s11 = scalar_lea.vmem [#allocation6], %s8520_s10  ;;  %s8534_s0 = scalar_lea.vmem [#allocation18], %s8520_s10 }
 0x209   : > { %s8538_s22 = scalar_lea.vmem [#allocation15], %s8520_s10 }
 0x20a   : > { %s8526_s23 = scalar_lea.vmem [#allocation8], %s8525_s29  ;;  %s8529_s13 = scalar_lea.vmem [#allocation3], %s8525_s29 }
 0x20b   : > { %s8536_s7 = scalar_lea.vmem [#allocation11], %s8525_s29 }
 0x285   : > { %v1990_v6 = vpop.f32.mrf.mxu0 }
 0x286   : > { %v1991_v7 = vadd.f32 %v5940_v5, %v1990_v6 }
 0x288   : > { %v1994_v8 = vpack.c.bf16 %v1991_v7, %v1991_v7 }
 0x28a   : > { %2000 = vrot.lane.b32.xlu1 %v1994_v8, %s6775_s3  ;;  %1996 = vrot.lane.b32.xlu0 %v1994_v8, %s6776_s19  ;;  %v2005_v16 = vshrl.u32 %v1994_v8, 16 }
 0x28d   : > { %v1992_v9 = vpop.f32.mrf.mxu0 }
 0x292   : > { %2117 = vrot.lane.b32.xlu1 %v1994_v8, %s6777_s6  ;;  %1998 = vrot.lane.b32.xlu0 %v1994_v8, %s6778_s20 }
 0x29a   : > { %2239 = vrot.lane.b32.xlu1 %v1994_v8, %s6779_s1 }
 0x2fc   : > { %v7447_v10 = vpop.permute.xlu1 %2000  ;;  %v7449_v11 = vpop.permute.xlu0 %1996 }
 0x2fd   : > { %2123 = vrot.lane.b32.xlu0 %v7447_v10, %s6777_s6  ;;  %2119 = vrot.lane.b32.xlu2 %v7449_v11, %s6777_s6  ;;  %v2006_v13 = vshrl.u32 %v7449_v11, 16  ;;  %v2012_v18 = vshrl.u32 %v7447_v10, 16  ;;  %v2004_v21 = vpack.i.b16 %v7449_v11, %v1994_v8 }
 0x2ff   : > { %v2007_v19 = vpack.i.b16 %v2006_v13, %v2005_v16  ;;  %v2018_v25 = vperm.slane %v2004_v21, %v7462_v20 }
 0x301   : > { %v2045_v24 = vperm.slane %v2007_v19, %v7462_v20  ;;  %v2027_v31 = vrot.slane %v2018_v25, 4 }
 0x303   : > { %v2053_v30 = vrot.slane %v2045_v24, 4 }
 0x304   : > { %v7455_v12 = vpop.permute.xlu0 %1998  ;;  %v2118_v39 = vpop.permute.xlu1 %2117 }
 0x305   : > { %2121 = vrot.lane.b32.xlu2 %v7455_v12, %s6777_s6  ;;  %v2011_v17 = vshrl.u32 %v7455_v12, 16  ;;  %v2010_v23 = vpack.i.b16 %v7447_v10, %v7455_v12  ;;  %v2128_v44 = vshrl.u32 %v2118_v39, 16 }
 0x307   : > { %v2013_v22 = vpack.i.b16 %v2012_v18, %v2011_v17  ;;  %v2023_v29 = vperm.slane %v2010_v23, %v7462_v20 }
 0x309   : > { %v2050_v28 = vperm.slane %v2013_v22, %v7462_v20  ;;  %v2024_v36 = vrot.slane %v2023_v29, 4  ;;  %v2028_v37 = vsel %vm2025_vm2, %v2023_v29, %v2027_v31 }
 0x30a   : > { %v2036_v40 = vperm.slane %v2028_v37, %v7471_v32 }
 0x30b   : > { %v2051_v33 = vrot.slane %v2050_v28, 4  ;;  %v2054_v34 = vsel %vm2025_vm2, %v2050_v28, %v2053_v30  ;;  %v2026_v42 = vsel %vm2025_vm2, %v2024_v36, %v2018_v25 }
 0x30c   : > { %v2062_v38 = vperm.slane %v2054_v34, %v7471_v32  ;;  %v2032_v48 = vperm.slane %v2026_v42, %v7471_v32  ;;  %v2039_v49 = vrot.slane %v2036_v40, 4 }
 0x30d   : > { %v2052_v41 = vsel %vm2025_vm2, %v2051_v33, %v2045_v24 }
 0x30e   : > { %v2058_v45 = vperm.slane %v2052_v41, %v7471_v32  ;;  %v2065_v46 = vrot.slane %v2062_v38, 4  ;;  %v2037_v55 = vrot.slane %v2032_v48, 4  ;;  %v2040_v56 = vsel %vm2025_vm2, 0, %v2039_v49 }
 0x30f   : > { %v2072_v4 = vrot.slane %v2040_v56, 4  ;;  %v2067_v41 = vsel %vm2025_vm2, %v2039_v49, %v2032_v48 }
 0x310   : > { %v2063_v52 = vrot.slane %v2058_v45, 4  ;;  %v2066_v53 = vsel %vm2025_vm2, 0, %v2065_v46  ;;  %v2038_v5 = vsel %vm2025_vm2, 0, %v2037_v55  ;;  %v2086_v38 = vsel %vm2025_vm2, %v2065_v46, %v2058_v45 }
 0x311   : > { %v2091_v62 = vrot.slane %v2066_v53, 4  ;;  %v2073_v22 = vsel %vm2025_vm2, %v2072_v4, %v2038_v5  ;;  %v2090_v53 = vperm.slane %v2086_v38, %v7462_v20  ;;  %v2071_v45 = vperm.slane %v2067_v41, %v7462_v20 }
 0x312   : > { %v2064_v2 = vsel %vm2025_vm2, 0, %v2063_v52  ;;  %v2077_v30 = vperm.slane %v2073_v22, %v7462_v20 }
 0x313   : > { %v2092_v14 = vsel %vm2025_vm2, %v2091_v62, %v2064_v2 }
 0x314   : > { %v2096_v24 = vperm.slane %v2092_v14, %v7462_v20 }
 0x316   : > { %v2097_v42 = vrot.slane %v2096_v24, 4 }
 0x318   : > { %v2098_v49 = vsel %vm2025_vm2, %v2097_v42, %v2090_v53 }
 0x357   : > { %v2120_v35 = vpop.permute.xlu2 %2119 }
 0x358   : > { %v2129_v43 = vshrl.u32 %v2120_v35, 16  ;;  %v2127_v47 = vpack.i.b16 %v2120_v35, %v2118_v39 }
 0x35a   : > { %v2130_v50 = vpack.i.b16 %v2129_v43, %v2128_v44  ;;  %v2141_v54 = vperm.slane %v2127_v47, %v7462_v20  ;;  %v2078_v47 = vrot.slane %v2077_v30, 4  ;;  %v1943_v30 = vlaneseq }
 0x35c   : > { %v2167_v58 = vperm.slane %v2130_v50, %v7462_v20  ;;  %v2149_v63 = vrot.slane %v2141_v54, 4  ;;  %v2079_v56 = vsel %vm2025_vm2, %v2078_v47, %v2071_v45 }
 0x35d   : > { %v2083_v62 = vperm.slane %v2079_v56, %v7471_v32 }
 0x35e   : > { %v2175_v6 = vrot.slane %v2167_v58, 4 }
 0x35f   : > { %v2122_v51 = vpop.permute.xlu2 %2121 }
 0x360   : > { %v2134_v59 = vshrl.u32 %v2122_v51, 16 }
 0x36f   : > { %v2124_v57 = vpop.permute.xlu0 %2123 }
 0x370   : > { %v2133_v60 = vpack.i.b16 %v2124_v57, %v2122_v51  ;;  %v2135_v61 = vshrl.u32 %v2124_v57, 16 }
 0x372   : > { %v2136_v0 = vpack.i.b16 %v2135_v61, %v2134_v59  ;;  %v2146_v1 = vperm.slane %v2133_v60, %v7462_v20  ;;  %v2102_v60 = vperm.slane %v2098_v49, %v7471_v32 }
 0x374   : > { %v2147_v7 = vrot.slane %v2146_v1, 4  ;;  %v2150_v8 = vsel %vm2025_vm2, %v2146_v1, %v2149_v63  ;;  %v2172_v9 = vperm.slane %v2136_v0, %v7462_v20  ;;  %v2107_v22 = vpack.i.b16 %v2102_v60, %v2083_v62 }
 0x375   : > { %v2158_v13 = vperm.slane %v2150_v8, %v7471_v32 }
 0x376   : > { %v2148_v15 = vsel %vm2025_vm2, %v2147_v7, %v2141_v54  ;;  %v2173_v16 = vrot.slane %v2172_v9, 4  ;;  %v2176_v17 = vsel %vm2025_vm2, %v2172_v9, %v2175_v6  ;;  %v2103_v7 = vrot.slane %v2102_v60, 4 }
 0x377   : > { %v2154_v18 = vperm.slane %v2148_v15, %v7471_v32  ;;  %v2161_v19 = vrot.slane %v2158_v13, 4  ;;  %v2184_v21 = vperm.slane %v2176_v17, %v7471_v32  ;;  %v2084_v15 = vrot.slane %v2083_v62, 4 }
 0x378   : > { %v2174_v23 = vsel %vm2025_vm2, %v2173_v16, %v2167_v58 }
 0x379   : > { %v2159_v25 = vrot.slane %v2154_v18, 4  ;;  %v2162_v26 = vsel %vm2025_vm2, 0, %v2161_v19  ;;  %v2180_v27 = vperm.slane %v2174_v23, %v7471_v32  ;;  %v2187_v28 = vrot.slane %v2184_v21, 4 }
 0x37a   : > { %v2194_v29 = vrot.slane %v2162_v26, 4  ;;  %v2189_v36 = vsel %vm2025_vm2, %v2161_v19, %v2154_v18  ;;  %v2109_v18 = vshrl.u32 %v2102_v60, 16  ;;  %v2104_v19 = vsel %vm2025_vm2, 0, %v2103_v7 }
 0x37b   : > { %v2160_v31 = vsel %vm2025_vm2, 0, %v2159_v25  ;;  %v2185_v33 = vrot.slane %v2180_v27, 4  ;;  %v2188_v34 = vsel %vm2025_vm2, 0, %v2187_v28  ;;  %v2208_v43 = vsel %vm2025_vm2, %v2187_v28, %v2180_v27 }
 0x37c   : > { %v2213_v35 = vrot.slane %v2188_v34, 4  ;;  %v2195_v37 = vsel %vm2025_vm2, %v2194_v29, %v2160_v31  ;;  %v2193_v50 = vperm.slane %v2189_v36, %v7462_v20  ;;  %v2212_v54 = vperm.slane %v2208_v43, %v7462_v20  ;;  %v5941_v34 = vld [vmem:[%s1892_s25] ss:$0 sm:$0xff]  ;;  %s6785_s25 = smov 8  }
 0x37d   : > { %v2186_v39 = vsel %vm2025_vm2, 0, %v2185_v33  ;;  %v2199_v40 = vperm.slane %v2195_v37, %v7462_v20  ;;  %v2108_v23 = vshrl.u32 %v2083_v62, 16  ;;  %v2085_v24 = vsel %vm2025_vm2, 0, %v2084_v15 }
 0x37e   : > { %v2214_v44 = vsel %vm2025_vm2, %v2213_v35, %v2186_v39  ;;  %v2115_v25 = vshrl.u32 %v2104_v19, 16  ;;  %v2113_v27 = vpack.i.b16 %v2104_v19, %v2085_v24  ;;  %v2114_v28 = vshrl.u32 %v2085_v24, 16 }
 0x37f   : > { %v2200_v51 = vrot.slane %v2199_v40, 4  ;;  %v2218_v52 = vperm.slane %v2214_v44, %v7462_v20  ;;  %v2110_v26 = vpack.i.b16 %v2109_v18, %v2108_v23  ;;  %v1944_v31 = vshrl.u32 %v1943_v30, 7 }
 0x380   : > { %v2116_v29 = vpack.i.b16 %v2115_v25, %v2114_v28  ;;  %v1946_v33 = vand.u32 127, %v1943_v30  ;;  %v6782_v35 = vmov 0.0  }
 0x381   : > { %v2201_v46 = vsel %vm2025_vm2, %v2200_v51, %v2193_v50  ;;  %v2219_v48 = vrot.slane %v2218_v52, 4 }
 0x382   : > { %v2205_v55 = vperm.slane %v2201_v46, %v7471_v32  ;;  %vm1947_vm4 = vcmp.gt.s32.totalorder %v1946_v33, %v1944_v31 }
 0x383   : > { %v2220_v57 = vsel %vm2025_vm2, %v2219_v48, %v2212_v54  ;;  %v1948_v36 = vsel %vm1947_vm4, -1e+18, %v6782_v35 }
 0x384   : > { %v2224_v58 = vperm.slane %v2220_v57, %v7471_v32  ;;  %v2206_v59 = vrot.slane %v2205_v55, 4  ;;  %v2230_v61 = vshrl.u32 %v2205_v55, 16  ;;  %v1953_v37 = vadd.f32 %v5941_v34, %v1948_v36 }
 0x386   : > { %v2229_v63 = vpack.i.b16 %v2224_v58, %v2205_v55  ;;  %v2231_v0 = vshrl.u32 %v2224_v58, 16  ;;  %v2207_v1 = vsel %vm2025_vm2, 0, %v2206_v59  ;;  %v2225_v2 = vrot.slane %v2224_v58, 4  ;;  %v2240_v55 = vpop.permute.xlu1 %2239 }
 0x387   : > { %v2236_v9 = vshrl.u32 %v2207_v1, 16 }
 0x388   : > { %v2366_v4 = vsel %vm2361_vm3, %v2229_v63, 0  ;;  %v2232_v5 = vpack.i.b16 %v2231_v0, %v2230_v61  ;;  %v2226_v6 = vsel %vm2025_vm2, 0, %v2225_v2 }
 0x389   : > { %2375 = vmatpush.bf16.xpose.msra.mxu1 %v2366_v4  ;;  %v2235_v8 = vpack.i.b16 %v2226_v6, %v2207_v1  ;;  %v2237_v13 = vshrl.u32 %v2226_v6, 16 }
 0x38a   : > { %v2385_v14 = vsel %vm2361_vm3, %v2232_v5, 0 }
 0x38b   : > { %2394 = vmatpush.bf16.xpose.msra.mxu2 %v2385_v14  ;;  %v2404_v16 = vsel %vm2361_vm3, %v2235_v8, 0  ;;  %v2238_v17 = vpack.i.b16 %v2237_v13, %v2236_v9  ;;  %v2250_v13 = vshrl.u32 %v2240_v55, 16 }
 0x38c   : > { %2413 = vmatpush.bf16.xpose.msra.mxu3 %v2404_v16 }
 0x38d   : > { %v2423_v21 = vsel %vm2361_vm3, %v2238_v17, 0 }
 0x38e   : > { %2432 = vmatpush.bf16.xpose.msrb.mxu0 %v2423_v21 }
 0x390   : > { %5591 = vmatmul.msk.bf16.vlgmr.msra.gmra.mxu1 %vm2361_vm3, %v2107_v22 }
 0x392   : > { %5592 = vmatmul.msk.bf16.vlgmr.msra.gmra.mxu2 %vm2361_vm3, %v2110_v26 }
 0x393   : > { %5593 = vmatmul.msk.bf16.vlgmr.msra.gmra.mxu3 %vm2361_vm3, %v2113_v27 }
 0x395   : > { %5594 = vmatmul.msk.bf16.vlgmr.msrb.gmra.mxu0 %vm2361_vm3, %v2116_v29 }
 0x40d   : > { %v2377_v38 = vpop.f32.mrf.mxu1 }
 0x40e   : > { %v2378_v39 = vadd.f32 %v2377_v38, %v1953_v37 }
 0x410   : > { %v2438_v40 = vsel %vm2361_vm3, %v2378_v39, -inf }
 0x411   : > { %2439 = vmax.xlane.f32.xlu0 %v2438_v40 }
 0x412   : > { %v2434_v41 = vpop.f32.mrf.mxu0 }
 0x413   : > { %v2435_v42 = vadd.f32 %v2434_v41, %v1953_v37 }
 0x415   : > { %v2379_v43 = vpop.f32.mrf.mxu1  ;;  %v2396_v44 = vpop.f32.mrf.mxu2  ;;  %v2447_v47 = vsel %vm2361_vm3, %v2435_v42, -inf }
 0x416   : > { %2448 = vmax.xlane.f32.xlu2 %v2447_v47  ;;  %v2415_v50 = vpop.f32.mrf.mxu3  ;;  %v2397_v52 = vadd.f32 %v2396_v44, %v1953_v37 }
 0x417   : > { %v2416_v51 = vadd.f32 %v2415_v50, %v1953_v37 }
 0x418   : > { %v2441_v54 = vsel %vm2361_vm3, %v2397_v52, -inf }
 0x419   : > { %v2444_v53 = vsel %vm2361_vm3, %v2416_v51, -inf }
 0x41a   : > { %v2436_v45 = vpop.f32.mrf.mxu0  ;;  %2445 = vmax.xlane.f32.xlu1 %v2444_v53 }
 0x41d   : > { %v2398_v46 = vpop.f32.mrf.mxu2 }
 0x41e   : > { %2442 = vmax.xlane.f32.xlu2 %v2441_v54  ;;  %v2417_v48 = vpop.f32.mrf.mxu3 }
 0x425   : > { %2243 = vrot.lane.b32.xlu0 %v7455_v12, %s6779_s1 }
 0x433   : > { %2245 = vrot.lane.b32.xlu1 %v7447_v10, %s6779_s1 }
 0x436   : > { %2241 = vrot.lane.b32.xlu2 %v7449_v11, %s6779_s1  ;;  %s8535_s1 = smov %s8534_s0 }
 0x484   : > { %v2440_v49 = vpop.xlane.xlu0 %2439 }
 0x485   : > { %v2450_v56 = vsub.f32 %v2378_v39, %v2440_v49 }
 0x487   : > { %v2454_v57 = vmul.f32 1.442695, %v2450_v56 }
 0x489   : > { %5959 = vpow2.f32 %v2454_v57  ;;  %v2449_v58 = vpop.xlane.xlu2 %2448 }
 0x48a   : > { %v2453_v62 = vsub.f32 %v2435_v42, %v2449_v58 }
 0x48c   : > { %v2460_v11 = vmul.f32 1.442695, %v2453_v62 }
 0x48d   : > { %v2446_v59 = vpop.xlane.xlu1 %2445 }
 0x48e   : > { %v2452_v60 = vsub.f32 %v2416_v51, %v2446_v59 }
 0x48f   : > { %v7550_v61 = vpop.eup %5959 }
 0x490   : > { %v2458_v63 = vmul.f32 1.442695, %v2452_v60  ;;  %v2462_v12 = vsel %vm2361_vm3, %v7550_v61, 0.0 }
 0x491   : > { %v2443_v0 = vpop.xlane.xlu2 %2442  ;;  %2463 = vadd.xlane.f32.xlu1 %v2462_v12 }
 0x492   : > { %5961 = vpow2.f32 %v2458_v63  ;;  %v2451_v10 = vsub.f32 %v2397_v52, %v2443_v0 }
 0x494   : > { %v2456_v1 = vmul.f32 1.442695, %v2451_v10 }
 0x496   : > { %5963 = vpow2.f32 %v2456_v1 }
 0x497   : > { %5965 = vpow2.f32 %v2460_v11  ;;  %v2244_v17 = vpop.permute.xlu0 %2243 }
 0x498   : > { %v7554_v2 = vpop.eup %5961  ;;  %v2256_v21 = vshrl.u32 %v2244_v17, 16 }
 0x499   : > { %v2468_v4 = vsel %vm2361_vm3, %v7554_v2, 0.0  ;;  %v2242_v5 = vpop.permute.xlu2 %2241 }
 0x49a   : > { %2469 = vadd.xlane.f32.xlu0 %v2468_v4  ;;  %v2251_v9 = vshrl.u32 %v2242_v5, 16  ;;  %v2249_v14 = vpack.i.b16 %v2242_v5, %v2240_v55 }
 0x49c   : > { %v7558_v6 = vpop.eup %5963  ;;  %v2252_v16 = vpack.i.b16 %v2251_v9, %v2250_v13  ;;  %v2263_v18 = vperm.slane %v2249_v14, %v7462_v20 }
 0x49d   : > { %v2465_v7 = vsel %vm2361_vm3, %v7558_v6, 0.0  ;;  %v7562_v8 = vpop.eup %5965 }
 0x49e   : > { %2466 = vadd.xlane.f32.xlu2 %v2465_v7  ;;  %v2471_v15 = vsel %vm2361_vm3, %v7562_v8, 0.0  ;;  %v2289_v22 = vperm.slane %v2252_v16, %v7462_v20  ;;  %v2271_v25 = vrot.slane %v2263_v18, 4 }
 0x4a0   : > { %v2297_v28 = vrot.slane %v2289_v22, 4 }
 0x4a2   : > { %2472 = vadd.xlane.f32.xlu0 %v2471_v15 }
 0x4a5   : > { %v2246_v19 = vpop.permute.xlu1 %2245 }
 0x4a6   : > { %v2255_v23 = vpack.i.b16 %v2246_v19, %v2244_v17  ;;  %v2257_v24 = vshrl.u32 %v2246_v19, 16 }
 0x4a8   : > { %v2258_v26 = vpack.i.b16 %v2257_v24, %v2256_v21  ;;  %v2268_v27 = vperm.slane %v2255_v23, %v7462_v20 }
 0x4aa   : > { %v2269_v29 = vrot.slane %v2268_v27, 4  ;;  %v2272_v30 = vsel %vm2025_vm2, %v2268_v27, %v2271_v25  ;;  %v2294_v31 = vperm.slane %v2258_v26, %v7462_v20 }
 0x4ab   : > { %v2280_v33 = vperm.slane %v2272_v30, %v7471_v32 }
 0x4ac   : > { %v2270_v34 = vsel %vm2025_vm2, %v2269_v29, %v2263_v18  ;;  %v2295_v35 = vrot.slane %v2294_v31, 4  ;;  %v2298_v36 = vsel %vm2025_vm2, %v2294_v31, %v2297_v28 }
 0x4ad   : > { %v2276_v37 = vperm.slane %v2270_v34, %v7471_v32  ;;  %v2283_v38 = vrot.slane %v2280_v33, 4  ;;  %v2306_v39 = vperm.slane %v2298_v36, %v7471_v32 }
 0x4ae   : > { %v2296_v40 = vsel %vm2025_vm2, %v2295_v35, %v2289_v22 }
 0x4af   : > { %v2281_v41 = vrot.slane %v2276_v37, 4  ;;  %v2284_v42 = vsel %vm2025_vm2, 0, %v2283_v38  ;;  %v2302_v43 = vperm.slane %v2296_v40, %v7471_v32  ;;  %v2309_v44 = vrot.slane %v2306_v39, 4 }
 0x4b0   : > { %v2316_v47 = vrot.slane %v2284_v42, 4  ;;  %v2311_v45 = vsel %vm2025_vm2, %v2283_v38, %v2276_v37 }
 0x4b1   : > { %v2282_v50 = vsel %vm2025_vm2, 0, %v2281_v41  ;;  %v2307_v51 = vrot.slane %v2302_v43, 4  ;;  %v2310_v52 = vsel %vm2025_vm2, 0, %v2309_v44  ;;  %v2330_v49 = vsel %vm2025_vm2, %v2309_v44, %v2302_v43 }
 0x4b2   : > { %v2335_v53 = vrot.slane %v2310_v52, 4  ;;  %v2317_v46 = vsel %vm2025_vm2, %v2316_v47, %v2282_v50  ;;  %v2315_v56 = vperm.slane %v2311_v45, %v7462_v20  ;;  %v2334_v60 = vperm.slane %v2330_v49, %v7462_v20 }
 0x4b3   : > { %v2308_v54 = vsel %vm2025_vm2, 0, %v2307_v51  ;;  %v2321_v48 = vperm.slane %v2317_v46, %v7462_v20 }
 0x4b4   : > { %v2336_v55 = vsel %vm2025_vm2, %v2335_v53, %v2308_v54 }
 0x4b5   : > { %v2322_v57 = vrot.slane %v2321_v48, 4  ;;  %v2340_v58 = vperm.slane %v2336_v55, %v7462_v20 }
 0x4b7   : > { %v2323_v59 = vsel %vm2025_vm2, %v2322_v57, %v2315_v56  ;;  %v2341_v62 = vrot.slane %v2340_v58, 4 }
 0x4b8   : > { %v2327_v63 = vperm.slane %v2323_v59, %v7471_v32 }
 0x4b9   : > { %v2342_v12 = vsel %vm2025_vm2, %v2341_v62, %v2334_v60 }
 0x4ba   : > { %v2346_v0 = vperm.slane %v2342_v12, %v7471_v32  ;;  %v2328_v10 = vrot.slane %v2327_v63, 4  ;;  %v2352_v11 = vshrl.u32 %v2327_v63, 16 }
 0x4bc   : > { %v2351_v1 = vpack.i.b16 %v2346_v0, %v2327_v63  ;;  %v2353_v4 = vshrl.u32 %v2346_v0, 16  ;;  %v2329_v5 = vsel %vm2025_vm2, 0, %v2328_v10  ;;  %v2347_v7 = vrot.slane %v2346_v0, 4 }
 0x4bd   : > { %v2358_v16 = vshrl.u32 %v2329_v5, 16 }
 0x4be   : > { %v2491_v9 = vsel %vm2489_vm5, %v2351_v1, 0  ;;  %v2354_v13 = vpack.i.b16 %v2353_v4, %v2352_v11  ;;  %v2348_v14 = vsel %vm2025_vm2, 0, %v2347_v7 }
 0x4bf   : > { %2500 = vmatpush.bf16.msrb.mxu1 %v2491_v9  ;;  %v2357_v15 = vpack.i.b16 %v2348_v14, %v2329_v5  ;;  %v2359_v17 = vshrl.u32 %v2348_v14, 16 }
 0x4c0   : > { %v2510_v18 = vsel %vm2489_vm5, %v2354_v13, 0 }
 0x4c1   : > { %2519 = vmatpush.bf16.msrb.mxu2 %v2510_v18  ;;  %v2529_v19 = vsel %vm2489_vm5, %v2357_v15, 0  ;;  %v2360_v21 = vpack.i.b16 %v2359_v17, %v2358_v16 }
 0x4c2   : > { %2538 = vmatpush.bf16.msrb.mxu3 %v2529_v19 }
 0x4c3   : > { %v2548_v22 = vsel %vm2489_vm5, %v2360_v21, 0 }
 0x4c4   : > { %2557 = vmatpush.bf16.msra.mxu0 %v2548_v22 }
 0x504   : > { %v2464_v23 = vpop.xlane.xlu1 %2463 }
 0x505   : > { %5967 = vrcp.f32 %v2464_v23 }
 0x50b   : > { %v5968_v24 = vpop.eup %5967 }
 0x50c   : > { %v2478_v25 = vmul.f32 %v5968_v24, %v7550_v61 }
 0x50d   : > { %v2470_v26 = vpop.xlane.xlu0 %2469 }
 0x50e   : > { %5969 = vrcp.f32 %v2470_v26  ;;  %v2482_v27 = vpack.c.bf16 %v2478_v25, %v2478_v25 }
 0x510   : > { %5595 = vmatmul.msk.bf16.vlgmr.msrb.gmra.mxu1 %vm2361_vm3, %v2482_v27 }
 0x511   : > { %v2467_v28 = vpop.xlane.xlu2 %2466 }
 0x512   : > { %5971 = vrcp.f32 %v2467_v28 }
 0x514   : > { %v5970_v29 = vpop.eup %5969 }
 0x515   : > { %v2480_v30 = vmul.f32 %v5970_v29, %v7554_v2  ;;  %v2473_v31 = vpop.xlane.xlu0 %2472 }
 0x516   : > { %5973 = vrcp.f32 %v2473_v31 }
 0x517   : > { %v2484_v33 = vpack.c.bf16 %v2480_v30, %v2480_v30 }
 0x518   : > { %v5972_v34 = vpop.eup %5971 }
 0x519   : > { %v2479_v35 = vmul.f32 %v5972_v34, %v7558_v6  ;;  %5597 = vmatmul.msk.bf16.vlgmr.msrb.gmra.mxu3 %vm2361_vm3, %v2484_v33 }
 0x51b   : > { %v2483_v36 = vpack.c.bf16 %v2479_v35, %v2479_v35 }
 0x51c   : > { %v5974_v61 = vpop.eup %5973 }
 0x51d   : > { %v2481_v37 = vmul.f32 %v5974_v61, %v7562_v8  ;;  %5596 = vmatmul.msk.bf16.vlgmr.msrb.gmra.mxu2 %vm2361_vm3, %v2483_v36 }
 0x51f   : > { %v2485_v38 = vpack.c.bf16 %v2481_v37, %v2481_v37 }
 0x521   : > { %5598 = vmatmul.msk.bf16.vlgmr.msra.gmra.mxu0 %vm2361_vm3, %v2485_v38 }
 0x58d   : > { %v2502_v39 = vpop.f32.mrf.mxu1 }
 0x58e   : > { %v2566_v2 = vrot.slane %v2502_v39, 4 }
 0x595   : > { %v2504_v40 = vpop.f32.mrf.mxu1 }
 0x59c   : > { %v2540_v41 = vpop.f32.mrf.mxu3 }
 0x59d   : > { %v2563_v42 = vrot.slane %v2540_v41, 4  ;;  %v2567_v43 = vsel %vm2025_vm2, %v2540_v41, %v2566_v2 }
 0x59e   : > { %v2559_v44 = vpop.f32.mrf.mxu0  ;;  %v2575_v8 = vperm.slane %v2567_v43, %v7462_v20 }
 0x59f   : > { %v2565_v6 = vsel %vm2025_vm2, %v2563_v42, %v2502_v39  ;;  %v2576_v47 = vrot.slane %v2559_v44, 4 }
 0x5a0   : > { %v2571_v50 = vperm.slane %v2565_v6, %v7462_v20  ;;  %v2521_v51 = vpop.f32.mrf.mxu2  ;;  %v2602_v48 = vrot.slane %v2575_v8, 4 }
 0x5a1   : > { %v2577_v52 = vsel %vm2025_vm2, %v2576_v47, %v2521_v51  ;;  %v2578_v53 = vrot.slane %v2521_v51, 4 }
 0x5a2   : > { %v2590_v45 = vrot.slane %v2571_v50, 4  ;;  %v2583_v46 = vperm.slane %v2577_v52, %v7462_v20 }
 0x5a3   : > { %v2579_v54 = vsel %vm2025_vm2, %v2559_v44, %v2578_v53 }
 0x5a4   : > { %v2587_v49 = vperm.slane %v2579_v54, %v7462_v20  ;;  %v2588_v55 = vrot.slane %v2583_v46, 4  ;;  %v2591_v56 = vsel %vm2025_vm2, %v2583_v46, %v2590_v45  ;;  %v2542_v57 = vpop.f32.mrf.mxu3 }
 0x5a5   : > { %v2599_v58 = vperm.slane %v2591_v56, %v7471_v32  ;;  %v5728_v56 = vld [vmem:[%s8521_s18] sm:$0xff]  ;;  %s8537_s18 = scalar_lea.vmem [#allocation20], %s8525_s29 }
 0x5a6   : > { %v2589_v59 = vsel %vm2025_vm2, %v2588_v55, %v2571_v50  ;;  %v2600_v60 = vrot.slane %v2587_v49, 4  ;;  %v2603_v62 = vsel %vm2025_vm2, %v2587_v49, %v2602_v48  ;;  %v2561_v63 = vpop.f32.mrf.mxu0  ;;  %v5732_v50 = vld [vmem:[%s7418_s16 + $0x8] sm:$0xff]  ;;  %v5942_v57 = vld [vmem:[%s1914_s2] ss:$0 sm:$0xff]  ;;  %s8542_s2 = scalar_lea.vmem [#allocation17], %s8525_s29 }
 0x5a7   : > { %v2595_v12 = vperm.slane %v2589_v59, %v7471_v32  ;;  %v2611_v0 = vperm.slane %v2603_v62, %v7471_v32  ;;  %v2614_v10 = vrot.slane %v2599_v58, 4  ;;  %2721 = vmatpush.bf16.msra.mxu1 %v5732_v50  ;;  %v5736_v49 = vld [vmem:[%s8523_s11 + $0x8] sm:$0xff] }
 0x5a8   : > { %v2601_v11 = vsel %vm2025_vm2, %v2600_v60, %v2575_v8  ;;  %v2523_v1 = vpop.f32.mrf.mxu2  ;;  %v5731_v8 = vld [vmem:[%s7418_s16] sm:$0xff]  ;;  %2840 = vmatpush.bf16.msra.mxu3 %v5736_v49  ;;  %s8524_s16 = smov %s8523_s11  ;;  %s8539_s11 = smov %s8538_s22 }
 0x5a9   : > { %v2607_v4 = vperm.slane %v2601_v11, %v7471_v32  ;;  %v2612_v5 = vrot.slane %v2595_v12, 4  ;;  %v2615_v7 = vsel %vm2025_vm2, 0.0, %v2614_v10  ;;  %v2618_v9 = vrot.slane %v2611_v0, 4  ;;  %v5735_v55 = vld [vmem:[%s8524_s16] sm:$0xff]  ;;  %s8540_s16 = scalar_lea.vmem [#allocation12], %s8525_s29 }
 0x5aa   : > { %v2620_v13 = vsel %vm2025_vm2, %v2614_v10, %v2595_v12  ;;  %v2625_v14 = vrot.slane %v2615_v7, 4  ;;  %v6786_v12 = vmov 32.0  }
 0x5ab   : > { %v2613_v15 = vsel %vm2025_vm2, 0.0, %v2612_v5  ;;  %v2616_v16 = vrot.slane %v2607_v4, 4  ;;  %v2619_v17 = vsel %vm2025_vm2, 0.0, %v2618_v9  ;;  %v2624_v18 = vperm.slane %v2620_v13, %v7462_v20  ;;  %2722 = vmatpush.bf16.msra.mxu1 %v5731_v8  ;;  %v5945_v8 = vld [vmem:[%s1920_s17] ss:$0 sm:$0xff]  ;;  %s8532_s17 = sld [smem:[#allocation105_spill]] }
 0x5ac   : > { %v2636_v19 = vrot.slane %v2619_v17, 4  ;;  %v2626_v21 = vsel %vm2025_vm2, %v2625_v14, %v2613_v15  ;;  %v2631_v22 = vsel %vm2025_vm2, %v2618_v9, %v2607_v4  ;;  %2841 = vmatpush.bf16.msra.mxu3 %v5735_v55  ;;  %5975 = vrcp.f32 %v6786_v12  ;;  %v5943_v4 = vld [vmem:[%s8526_s23] ss:$0 sm:$0xff]  ;;  %s8541_s23 = scalar_lea.vmem [#allocation14], %s8525_s29 }
 0x5ad   : > { %v2617_v23 = vsel %vm2025_vm2, 0.0, %v2616_v16  ;;  %v2630_v24 = vperm.slane %v2626_v21, %v7462_v20  ;;  %v2635_v25 = vperm.slane %v2631_v22, %v7462_v20  ;;  %v2644_v26 = vrot.slane %v2624_v18, 4 }
 0x5ae   : > { %v2637_v27 = vsel %vm2025_vm2, %v2636_v19, %v2617_v23  ;;  %v5734_v23 = vld [vmem:[%s7427_s8 + $0x8] sm:$0xff] }
 0x5af   : > { %v2641_v28 = vperm.slane %v2637_v27, %v7462_v20  ;;  %v2645_v29 = vsel %vm2025_vm2, %v2630_v24, %v2644_v26  ;;  %v2656_v30 = vrot.slane %v2635_v25, 4  ;;  %v2642_v31 = vrot.slane %v2630_v24, 4  ;;  %5629 = vmatmul.msk.bf16.vlgmr.msra.gmra.mxu3 %vm1977_vm1, %v5728_v56  ;;  %2798 = vmatpush.bf16.msra.mxu2 %v5734_v23  ;;  %v5733_v24 = vld [vmem:[%s7427_s8] sm:$0xff]  ;;  %s8553_s8 = sld [smem:[#allocation88_spill]] }
 0x5b0   : > { %v2653_v33 = vperm.slane %v2645_v29, %v7471_v32 }
 0x5b1   : > { %v2657_v34 = vsel %vm2025_vm2, %v2641_v28, %v2656_v30  ;;  %v2643_v35 = vsel %vm2025_vm2, %v2642_v31, %v2624_v18  ;;  %v2654_v36 = vrot.slane %v2641_v28, 4 }
 0x5b2   : > { %v2665_v61 = vperm.slane %v2657_v34, %v7471_v32  ;;  %v2672_v37 = vrot.slane %v2653_v33, 4  ;;  %v2649_v38 = vperm.slane %v2643_v35, %v7471_v32  ;;  %v5976_v0 = vpop.eup %5975 }
 0x5b3   : > { %v2655_v39 = vsel %vm2025_vm2, %v2654_v36, %v2635_v25  ;;  %v2733_v10 = vmul.f32 32.0, %v5976_v0  ;;  %vm2737_vm8 = vweird.f32 %v5976_v0  ;;  %2799 = vmatpush.bf16.msra.mxu2 %v5733_v24 }
 0x5b4   : > { %v2673_v40 = vsel %vm2025_vm2, %v2665_v61, %v2672_v37  ;;  %v2670_v2 = vrot.slane %v2665_v61, 4  ;;  %v2661_v41 = vperm.slane %v2655_v39, %v7471_v32  ;;  %v2668_v42 = vrot.slane %v2649_v38, 4 }
 0x5b5   : > { %2683 = vrot.lane.b32.xlu0 %v2673_v40, %s6783_s9  ;;  %v2734_v11 = vsub.f32 1.0, %v2733_v10  ;;  %p5708_p4 = scmp.ne.s32.totalorder %s8553_s8, 1 }
 0x5b6   : > { %v2671_v43 = vsel %vm2025_vm2, %v2670_v2, %v2653_v33  ;;  %v2666_v44 = vrot.slane %v2661_v41, 4  ;;  %v2669_v6 = vsel %vm2025_vm2, %v2661_v41, %v2668_v42 }
 0x5b7   : > { %2679 = vrot.lane.b32.xlu1 %v2671_v43, %s6784_s12  ;;  %2675 = vrot.lane.b32.xlu2 %v2669_v6, %s6785_s25  ;;  %v2735_v1 = vmul.f32 %v5976_v0, %v2734_v11 }
 0x5b8   : > { %v2667_v47 = vsel %vm2025_vm2, %v2666_v44, %v2649_v38  ;;  %v5944_v44 = vld [vmem:[%s1917_s5] ss:$0 sm:$0xff] }
 0x5b9   : > { %v2736_v5 = vadd.f32 %v5976_v0, %v2735_v1 }
 0x5bb   : > { %v7670_v13 = vsel %vm2737_vm8, %v5976_v0, %v2736_v5 }
 0x611   : > { %v2676_v51 = vpop.permute.xlu2 %2675 }
 0x612   : > { %v2686_v52 = vsel %vm2361_vm3, %v2667_v47, %v2676_v51 }
 0x627   : > { %v2684_v45 = vpop.permute.xlu0 %2683 }
 0x629   : > { %v2680_v53 = vpop.permute.xlu1 %2679 }
 0x62a   : > { %v2688_v46 = vsel %vm2687_vm6, %v2686_v52, %v2680_v53 }
 0x62b   : > { %v2690_v54 = vsel %vm2689_vm7, %v2688_v46, %v2684_v45 }
 0x62c   : > { %v2691_v48 = vpack.c.bf16 %v2690_v54, %v2690_v54 }
 0x62e   : > { %5607 = vmatmul.msk.bf16.vlgmr.msra.gmra.mxu1 %vm1977_vm1, %v2691_v48 }
 0x632   : > { %v2843_v7 = vpop.f32.mrf.mxu3 }
 0x633   : > { %v2844_v9 = vadd.f32 %v5943_v4, %v2843_v7 }
 0x635   : > { %v7672_v14 = vpack.c.bf16 %v2844_v9, %v2844_v9 }
 0x637   : > { %2973 = vrot.lane.b32.xlu1 %v7672_v14, %s6776_s19  ;;  %v2988_v40 = vshrl.u32 %v7672_v14, 16 }
 0x63a   : > { %v2845_v17 = vpop.f32.mrf.mxu3 }
 0x63b   : > { %v2846_v18 = vadd.f32 %v5943_v4, %v2845_v17 }
 0x63d   : > { %v2849_v21 = vpack.c.bf16 %v2846_v18, %v2846_v18 }
 0x63f   : > { %2975 = vrot.lane.b32.xlu1 %v2849_v21, %s6776_s19  ;;  %v3000_v34 = vshrl.u32 %v2849_v21, 16 }
 0x647   : > { %2977 = vrot.lane.b32.xlu1 %v7672_v14, %s6778_s20 }
 0x64f   : > { %2979 = vrot.lane.b32.xlu1 %v2849_v21, %s6778_s20 }
 0x657   : > { %2981 = vrot.lane.b32.xlu1 %v7672_v14, %s6775_s3 }
 0x6a9   : > { %v7688_v25 = vpop.permute.xlu1 %2973 }
 0x6aa   : > { %v2989_v42 = vshrl.u32 %v7688_v25, 16  ;;  %v2987_v52 = vpack.i.b16 %v7688_v25, %v7672_v14 }
 0x6ab   : > { %v2724_v58 = vpop.f32.mrf.mxu1 }
 0x6ac   : > { %v2725_v59 = vadd.f32 %v5942_v57, %v2724_v58  ;;  %v2990_v45 = vpack.i.b16 %v2989_v42, %v2988_v40 }
 0x6ae   : > { %v2728_v60 = vadd.f32 %v2725_v59, %v7437_v3  ;;  %v3013_v59 = vperm.slane %v2987_v52, %v7462_v20 }
 0x6b0   : > { %v2729_v62 = vsel %vm1977_vm1, %v2728_v60, 0.0  ;;  %v3021_v7 = vrot.slane %v3013_v59, 4 }
 0x6b1   : > { %2730 = vadd.xlane.f32.xlu2 %v2729_v62  ;;  %v7691_v29 = vpop.permute.xlu1 %2975 }
 0x6b2   : > { %v3001_v35 = vshrl.u32 %v7691_v29, 16  ;;  %v2999_v37 = vpack.i.b16 %v7691_v29, %v2849_v21 }
 0x6b3   : > { %v2726_v63 = vpop.f32.mrf.mxu1 }
 0x6b4   : > { %v3002_v39 = vpack.i.b16 %v3001_v35, %v3000_v34  ;;  %v3065_v43 = vperm.slane %v2999_v37, %v7462_v20 }
 0x6b6   : > { %v3091_v47 = vperm.slane %v3002_v39, %v7462_v20  ;;  %v3073_v46 = vrot.slane %v3065_v43, 4 }
 0x6b8   : > { %v3099_v55 = vrot.slane %v3091_v47, 4 }
 0x6b9   : > { %v2978_v36 = vpop.permute.xlu1 %2977 }
 0x6ba   : > { %v2994_v11 = vshrl.u32 %v2978_v36, 16 }
 0x6c1   : > { %v7711_v53 = vpop.permute.xlu1 %2979 }
 0x6c2   : > { %v3006_v54 = vshrl.u32 %v7711_v53, 16 }
 0x6c9   : > { %2983 = vrot.lane.b32.xlu2 %v2849_v21, %s6775_s3  ;;  %v7729_v9 = vpop.permute.xlu1 %2981 }
 0x6ca   : > { %v2993_v18 = vpack.i.b16 %v7729_v9, %v2978_v36 }
 0x6d1   : > { %3215 = vrot.lane.b32.xlu2 %v2849_v21, %s6777_s6 }
 0x6d9   : > { %3221 = vrot.lane.b32.xlu2 %v2978_v36, %s6777_s6 }
 0x724   : > { %v2731_v3 = vpop.xlane.xlu2 %2730 }
 0x725   : > { %v2739_v15 = vmul.f32 %v7670_v13, %v2731_v3 }
 0x727   : > { %v2740_v16 = vsub.f32 %v2728_v60, %v2739_v15  ;;  %v3039_v60 = vperm.slane %v2990_v45, %v7462_v20 }
 0x729   : > { %v2741_v19 = vmul.f32 %v2740_v16, %v2740_v16  ;;  %v3047_v17 = vrot.slane %v3039_v60, 4 }
 0x72b   : > { %v2742_v22 = vsel %vm1977_vm1, %v2741_v19, 0.0  ;;  %v2995_v19 = vshrl.u32 %v7729_v9, 16 }
 0x72c   : > { %2743 = vadd.xlane.f32.xlu0 %v2742_v22  ;;  %v7697_v2 = vpop.permute.xlu2 %2983 }
 0x72d   : > { %v3007_v50 = vshrl.u32 %v7697_v2, 16  ;;  %v3005_v48 = vpack.i.b16 %v7697_v2, %v7711_v53 }
 0x72f   : > { %v3008_v56 = vpack.i.b16 %v3007_v50, %v3006_v54  ;;  %v3070_v57 = vperm.slane %v3005_v48, %v7462_v20 }
 0x731   : > { %v3071_v62 = vrot.slane %v3070_v57, 4  ;;  %v3074_v63 = vsel %vm2025_vm2, %v3070_v57, %v3073_v46  ;;  %v3096_v12 = vperm.slane %v3008_v56, %v7462_v20 }
 0x732   : > { %v3082_v10 = vperm.slane %v3074_v63, %v7471_v32 }
 0x733   : > { %v3072_v1 = vsel %vm2025_vm2, %v3071_v62, %v3065_v43  ;;  %v3097_v4 = vrot.slane %v3096_v12, 4  ;;  %v3100_v5 = vsel %vm2025_vm2, %v3096_v12, %v3099_v55 }
 0x734   : > { %v3078_v3 = vperm.slane %v3072_v1, %v7471_v32  ;;  %v3085_v15 = vrot.slane %v3082_v10, 4 }
 0x735   : > { %v3098_v21 = vsel %vm2025_vm2, %v3097_v4, %v3091_v47 }
 0x736   : > { %v3083_v22 = vrot.slane %v3078_v3, 4  ;;  %v3086_v23 = vsel %vm2025_vm2, 0, %v3085_v15  ;;  %v3104_v24 = vperm.slane %v3098_v21, %v7471_v32 }
 0x738   : > { %v3109_v34 = vrot.slane %v3104_v24, 4 }
 0x73a   : > { %v3110_v40 = vsel %vm2025_vm2, 0, %v3109_v34 }
 0x79f   : > { %v2744_v26 = vpop.xlane.xlu0 %2743 }
 0x7a0   : > { %v2745_v27 = vmul.f32 %v2744_v26, %v7670_v13 }
 0x7a2   : > { %v2746_v28 = vadd.f32 1e-06, %v2745_v27  ;;  %v2996_v27 = vpack.i.b16 %v2995_v19, %v2994_v11 }
 0x7a4   : > { %5977 = vrsqrt.f32 %v2746_v28  ;;  %vm2753_vm10 = vweird.f32 %v2746_v28  ;;  %v3044_v37 = vperm.slane %v2996_v27, %v7462_v20 }
 0x7aa   : > { %v5978_v30 = vpop.eup %5977 }
 0x7ab   : > { %v2748_v31 = vmul.f32 %v5978_v30, %v2746_v28  ;;  %vm2754_vm9 = vweird.f32 %v5978_v30  ;;  %v3018_v28 = vperm.slane %v2993_v18, %v7462_v20 }
 0x7ac   : > { %vm2755_vm11 = vmor %vm2753_vm10, %vm2754_vm9 }
 0x7ad   : > { %v2749_v33 = vmul.f32 %v5978_v30, %v2748_v31  ;;  %v3156_v31 = vrot.slane %v3086_v23, 4  ;;  %v3019_v36 = vrot.slane %v3018_v28, 4 }
 0x7af   : > { %v2750_v61 = vmul.f32 0.5, %v2749_v33  ;;  %v3084_v33 = vsel %vm2025_vm2, 0, %v3083_v22  ;;  %v3020_v43 = vsel %vm2025_vm2, %v3019_v36, %v3013_v59 }
 0x7b0   : > { %v3026_v50 = vperm.slane %v3020_v43, %v7471_v32 }
 0x7b1   : > { %v2751_v38 = vsub.f32 1.5, %v2750_v61  ;;  %v3022_v61 = vsel %vm2025_vm2, %v3018_v28, %v3021_v7 }
 0x7b2   : > { %v3030_v39 = vperm.slane %v3022_v61, %v7471_v32  ;;  %v3031_v48 = vrot.slane %v3026_v50, 4 }
 0x7b3   : > { %v2752_v41 = vmul.f32 %v5978_v30, %v2751_v38  ;;  %v3157_v38 = vsel %vm2025_vm2, %v3156_v31, %v3084_v33 }
 0x7b4   : > { %v3161_v47 = vperm.slane %v3157_v38, %v7462_v20 }
 0x7b5   : > { %v2756_v6 = vsel %vm2755_vm11, %v5978_v30, %v2752_v41  ;;  %v3151_v30 = vsel %vm2025_vm2, %v3085_v15, %v3078_v3 }
 0x7b6   : > { %v2757_v51 = vmul.f32 %v2756_v6, %v2740_v16  ;;  %v3108_v16 = vperm.slane %v3100_v5, %v7471_v32  ;;  %v3155_v41 = vperm.slane %v3151_v30, %v7462_v20  ;;  %v3048_v6 = vsel %vm2025_vm2, %v3044_v37, %v3047_v17 }
 0x7b7   : > { %v3162_v46 = vrot.slane %v3161_v47, 4 }
 0x7b8   : > { %v2762_v49 = vmul.f32 %v5944_v44, %v2757_v51  ;;  %v3111_v26 = vrot.slane %v3108_v16, 4  ;;  %v3045_v44 = vrot.slane %v3044_v37, 4  ;;  %v3056_v51 = vperm.slane %v3048_v6, %v7471_v32 }
 0x7b9   : > { %v3163_v62 = vsel %vm2025_vm2, %v3162_v46, %v3155_v41 }
 0x7ba   : > { %v7717_v58 = vadd.f32 %v5945_v8, %v2762_v49  ;;  %v3112_v35 = vsel %vm2025_vm2, 0, %v3111_v26  ;;  %v3033_v8 = vrot.slane %v3030_v39, 4  ;;  %v3046_v52 = vsel %vm2025_vm2, %v3045_v44, %v3039_v60 }
 0x7bb   : > { %v3175_v42 = vrot.slane %v3112_v35, 4  ;;  %v3170_v45 = vsel %vm2025_vm2, %v3111_v26, %v3104_v24  ;;  %v3052_v55 = vperm.slane %v3046_v52, %v7471_v32  ;;  %v3059_v56 = vrot.slane %v3056_v51, 4 }
 0x7bc   : > { %v2768_v0 = vpack.c.bf16 %v7717_v58, %v7717_v58  ;;  %v3034_v49 = vsel %vm2025_vm2, 0, %v3033_v8  ;;  %v3113_v57 = vsel %vm2025_vm2, %v3033_v8, %v3026_v50  ;;  %v3032_v60 = vsel %vm2025_vm2, 0, %v3031_v48 }
 0x7bd   : > { %v3176_v54 = vsel %vm2025_vm2, %v3175_v42, %v3110_v40  ;;  %v3118_v59 = vrot.slane %v3034_v49, 4  ;;  %v3057_v12 = vrot.slane %v3052_v55, 4  ;;  %v3174_v10 = vperm.slane %v3170_v45, %v7462_v20 }
 0x7be   : > { %5616 = vmatmul.msk.bf16.vlgmr.msra.gmra.mxu2 %vm1977_vm1, %v2768_v0  ;;  %v3180_v63 = vperm.slane %v3176_v54, %v7462_v20  ;;  %v3060_v0 = vsel %vm2025_vm2, 0, %v3059_v56  ;;  %v3132_v1 = vsel %vm2025_vm2, %v3059_v56, %v3052_v55  ;;  %v3167_v5 = vperm.slane %v3163_v62, %v7471_v32 }
 0x7bf   : > { %v3119_v11 = vsel %vm2025_vm2, %v3118_v59, %v3032_v60  ;;  %v3137_v4 = vrot.slane %v3060_v0, 4  ;;  %v3058_v7 = vsel %vm2025_vm2, 0, %v3057_v12  ;;  %v3117_v3 = vperm.slane %v3113_v57, %v7462_v20 }
 0x7c0   : > { %v3123_v15 = vperm.slane %v3119_v11, %v7462_v20  ;;  %v3181_v16 = vrot.slane %v3180_v63, 4  ;;  %v3168_v18 = vrot.slane %v3167_v5, 4  ;;  %v3136_v21 = vperm.slane %v3132_v1, %v7462_v20 }
 0x7c1   : > { %v3138_v17 = vsel %vm2025_vm2, %v3137_v4, %v3058_v7  ;;  %v3204_v26 = vshrl.u32 %v3167_v5, 16 }
 0x7c2   : > { %v3124_v19 = vrot.slane %v3123_v15, 4  ;;  %v3142_v22 = vperm.slane %v3138_v17, %v7462_v20  ;;  %v3182_v23 = vsel %vm2025_vm2, %v3181_v16, %v3174_v10  ;;  %v3169_v30 = vsel %vm2025_vm2, 0, %v3168_v18 }
 0x7c3   : > { %v3186_v24 = vperm.slane %v3182_v23, %v7471_v32  ;;  %v3210_v41 = vshrl.u32 %v3169_v30, 16 }
 0x7c4   : > { %v3125_v27 = vsel %vm2025_vm2, %v3124_v19, %v3117_v3  ;;  %v3143_v28 = vrot.slane %v3142_v22, 4  ;;  %v5946_v3 = vld [vmem:[%s8529_s13] ss:$0 sm:$0xff] }
 0x7c5   : > { %v3129_v31 = vperm.slane %v3125_v27, %v7471_v32  ;;  %v3203_v33 = vpack.i.b16 %v3186_v24, %v3167_v5  ;;  %v3205_v34 = vshrl.u32 %v3186_v24, 16  ;;  %v3187_v35 = vrot.slane %v3186_v24, 4 }
 0x7c6   : > { %v3144_v36 = vsel %vm2025_vm2, %v3143_v28, %v3136_v21 }
 0x7c7   : > { %v3148_v61 = vperm.slane %v3144_v36, %v7471_v32  ;;  %v3192_v37 = vshrl.u32 %v3129_v31, 16  ;;  %v3206_v38 = vpack.i.b16 %v3205_v34, %v3204_v26  ;;  %v3130_v39 = vrot.slane %v3129_v31, 4 }
 0x7c8   : > { %v3188_v40 = vsel %vm2025_vm2, 0, %v3187_v35  ;;  %v3461_v43 = vunpack.c.l.b16 %v3203_v33 }
 0x7c9   : > { %v3191_v42 = vpack.i.b16 %v3148_v61, %v3129_v31  ;;  %v3193_v44 = vshrl.u32 %v3148_v61, 16  ;;  %v3149_v6 = vrot.slane %v3148_v61, 4  ;;  %v3483_v47 = vunpack.c.l.b16 %v3206_v38 }
 0x7ca   : > { %v3131_v50 = vsel %vm2025_vm2, 0, %v3130_v39  ;;  %v3209_v8 = vpack.i.b16 %v3188_v40, %v3169_v30  ;;  %v3211_v51 = vshrl.u32 %v3188_v40, 16 }
 0x7cb   : > { %v3460_v52 = vunpack.c.l.b16 %v3191_v42  ;;  %v3194_v45 = vpack.i.b16 %v3193_v44, %v3192_v37  ;;  %v3150_v46 = vsel %vm2025_vm2, 0, %v3149_v6  ;;  %v3198_v54 = vshrl.u32 %v3131_v50, 16 }
 0x7cc   : > { %v3197_v48 = vpack.i.b16 %v3150_v46, %v3131_v50  ;;  %v3505_v49 = vunpack.c.l.b16 %v3209_v8  ;;  %v3199_v55 = vshrl.u32 %v3150_v46, 16  ;;  %v3212_v56 = vpack.i.b16 %v3211_v51, %v3210_v41 }
 0x7cd   : > { %v3462_v57 = vpack.c.b16 %v3461_v43, %v3460_v52  ;;  %v3482_v59 = vunpack.c.l.b16 %v3194_v45 }
 0x7ce   : > { %v3504_v62 = vunpack.c.l.b16 %v3197_v48  ;;  %v3200_v63 = vpack.i.b16 %v3199_v55, %v3198_v54  ;;  %v3527_v60 = vunpack.c.l.b16 %v3212_v56 }
 0x7cf   : > { %v3467_v12 = vsel %vm2361_vm3, %v3462_v57, 0  ;;  %v3484_v0 = vpack.c.b16 %v3483_v47, %v3482_v59 }
 0x7d0   : > { %3476 = vmatpush.bf16.xpose.msrb.mxu0 %v3467_v12  ;;  %v3506_v10 = vpack.c.b16 %v3505_v49, %v3504_v62  ;;  %v3526_v11 = vunpack.c.l.b16 %v3200_v63 }
 0x7d1   : > { %v3489_v1 = vsel %vm2361_vm3, %v3484_v0, 0 }
 0x7d2   : > { %3498 = vmatpush.bf16.xpose.msrb.mxu1 %v3489_v1  ;;  %v3511_v4 = vsel %vm2361_vm3, %v3506_v10, 0  ;;  %v3528_v5 = vpack.c.b16 %v3527_v60, %v3526_v11 }
 0x7d3   : > { %3520 = vmatpush.bf16.xpose.msrb.mxu2 %v3511_v4 }
 0x7d4   : > { %v3533_v7 = vsel %vm2361_vm3, %v3528_v5, 0 }
 0x7d5   : > { %3542 = vmatpush.bf16.xpose.msrb.mxu3 %v3533_v7 }
 0x841   : > { %v2801_v15 = vpop.f32.mrf.mxu2 }
 0x842   : > { %v2802_v16 = vadd.f32 %v5946_v3, %v2801_v15 }
 0x844   : > { %v2805_v17 = vpack.c.bf16 %v2802_v16, %v2802_v16 }
 0x846   : > { %2853 = vrot.lane.b32.xlu1 %v2805_v17, %s6778_s20  ;;  %2851 = vrot.lane.b32.xlu0 %v2805_v17, %s6776_s19  ;;  %v2860_v24 = vshrl.u32 %v2805_v17, 16 }
 0x849   : > { %v2803_v18 = vpop.f32.mrf.mxu2 }
 0x84e   : > { %2855 = vrot.lane.b32.xlu1 %v2805_v17, %s6775_s3  ;;  %3213 = vrot.lane.b32.xlu0 %v7672_v14, %s6777_s6 }
 0x856   : > { %3217 = vrot.lane.b32.xlu1 %v7688_v25, %s6777_s6  ;;  %3219 = vrot.lane.b32.xlu0 %v7691_v29, %s6777_s6 }
 0x8b8   : > { %v2854_v19 = vpop.permute.xlu1 %2853  ;;  %v2852_v21 = vpop.permute.xlu0 %2851 }
 0x8b9   : > { %v2861_v22 = vshrl.u32 %v2852_v21, 16  ;;  %v2859_v23 = vpack.i.b16 %v2852_v21, %v2805_v17  ;;  %v2866_v30 = vshrl.u32 %v2854_v19, 16 }
 0x8bb   : > { %v2862_v26 = vpack.i.b16 %v2861_v22, %v2860_v24  ;;  %v2873_v27 = vperm.slane %v2859_v23, %v7462_v20 }
 0x8bd   : > { %v2899_v31 = vperm.slane %v2862_v26, %v7462_v20  ;;  %v2881_v34 = vrot.slane %v2873_v27, 4 }
 0x8bf   : > { %v2907_v36 = vrot.slane %v2899_v31, 4 }
 0x8c0   : > { %v2856_v28 = vpop.permute.xlu1 %2855 }
 0x8c1   : > { %v2865_v33 = vpack.i.b16 %v2856_v28, %v2854_v19  ;;  %v2867_v14 = vshrl.u32 %v2856_v28, 16 }
 0x8c3   : > { %v2868_v35 = vpack.i.b16 %v2867_v14, %v2866_v30  ;;  %v2878_v25 = vperm.slane %v2865_v33, %v7462_v20 }
 0x8c5   : > { %v2879_v29 = vrot.slane %v2878_v25, 4  ;;  %v2882_v61 = vsel %vm2025_vm2, %v2878_v25, %v2881_v34  ;;  %v2904_v37 = vperm.slane %v2868_v35, %v7462_v20 }
 0x8c6   : > { %v2890_v38 = vperm.slane %v2882_v61, %v7471_v32 }
 0x8c7   : > { %v2880_v39 = vsel %vm2025_vm2, %v2879_v29, %v2873_v27  ;;  %v2905_v40 = vrot.slane %v2904_v37, 4  ;;  %v2908_v41 = vsel %vm2025_vm2, %v2904_v37, %v2907_v36  ;;  %v5947_v27 = vld [vmem:[%s1895_s27] ss:$0 sm:$0xff]  ;;  %s8531_s27 = scalar_lea.vmem [#allocation9], %s8520_s10 }
 0x8c8   : > { %v2886_v42 = vperm.slane %v2880_v39, %v7471_v32  ;;  %v2893_v43 = vrot.slane %v2890_v38, 4  ;;  %v2916_v44 = vperm.slane %v2908_v41, %v7471_v32  ;;  %s8533_s26 = smov %s8531_s27 }
 0x8c9   : > { %v2906_v6 = vsel %vm2025_vm2, %v2905_v40, %v2899_v31 }
 0x8ca   : > { %v2891_v47 = vrot.slane %v2886_v42, 4  ;;  %v2894_v50 = vsel %vm2025_vm2, 0, %v2893_v43  ;;  %v2912_v8 = vperm.slane %v2906_v6, %v7471_v32  ;;  %v2919_v51 = vrot.slane %v2916_v44, 4  ;;  %v3214_v44 = vpop.permute.xlu0 %3213  ;;  %v3218_v6 = vpop.permute.xlu1 %3217 }
 0x8cb   : > { %v2926_v52 = vrot.slane %v2894_v50, 4  ;;  %v2921_v48 = vsel %vm2025_vm2, %v2893_v43, %v2886_v42  ;;  %v3216_v42 = vpop.permute.xlu2 %3215 }
 0x8cc   : > { %v2892_v45 = vsel %vm2025_vm2, 0, %v2891_v47  ;;  %v2917_v46 = vrot.slane %v2912_v8, 4  ;;  %v2920_v54 = vsel %vm2025_vm2, 0, %v2919_v51  ;;  %v2940_v59 = vsel %vm2025_vm2, %v2919_v51, %v2912_v8 }
 0x8cd   : > { %v2927_v49 = vsel %vm2025_vm2, %v2926_v52, %v2892_v45  ;;  %v2945_v55 = vrot.slane %v2920_v54, 4  ;;  %v2925_v63 = vperm.slane %v2921_v48, %v7462_v20  ;;  %v2944_v0 = vperm.slane %v2940_v59, %v7462_v20 }
 0x8ce   : > { %v2918_v56 = vsel %vm2025_vm2, 0, %v2917_v46  ;;  %v2931_v57 = vperm.slane %v2927_v49, %v7462_v20 }
 0x8cf   : > { %v2946_v62 = vsel %vm2025_vm2, %v2945_v55, %v2918_v56 }
 0x8d0   : > { %v2932_v60 = vrot.slane %v2931_v57, 4  ;;  %v2950_v12 = vperm.slane %v2946_v62, %v7462_v20 }
 0x8d2   : > { %v2951_v10 = vrot.slane %v2950_v12, 4  ;;  %v2933_v11 = vsel %vm2025_vm2, %v2932_v60, %v2925_v63  ;;  %v3220_v51 = vpop.permute.xlu0 %3219  ;;  %v3244_v12 = vshrl.u32 %v3216_v42, 16 }
 0x8d3   : > { %v2937_v1 = vperm.slane %v2933_v11, %v7471_v32  ;;  %v7845_v43 = vpop.permute.xlu2 %3221  ;;  %v3245_v62 = vshrl.u32 %v3220_v51, 16 }
 0x8d4   : > { %v2952_v4 = vsel %vm2025_vm2, %v2951_v10, %v2944_v0  ;;  %v3243_v0 = vpack.i.b16 %v3220_v51, %v3216_v42 }
 0x8d5   : > { %v2956_v5 = vperm.slane %v2952_v4, %v7471_v32  ;;  %v2938_v7 = vrot.slane %v2937_v1, 4  ;;  %v2962_v3 = vshrl.u32 %v2937_v1, 16  ;;  %v3246_v10 = vpack.i.b16 %v3245_v62, %v3244_v12 }
 0x8d7   : > { %v2961_v15 = vpack.i.b16 %v2956_v5, %v2937_v1  ;;  %v2963_v16 = vshrl.u32 %v2956_v5, 16  ;;  %v2939_v17 = vsel %vm2025_vm2, 0, %v2938_v7  ;;  %v2957_v18 = vrot.slane %v2956_v5, 4 }
 0x8d8   : > { %v2968_v23 = vshrl.u32 %v2939_v17, 16  ;;  %v3231_v1 = vpack.i.b16 %v3218_v6, %v3214_v44  ;;  %v3309_v5 = vperm.slane %v3243_v0, %v7462_v20  ;;  %v3233_v7 = vshrl.u32 %v3218_v6, 16 }
 0x8d9   : > { %5630 = vmatmul.msk.bf16.vlgmr.msrb.gmra.mxu0 %vm2361_vm3, %v2961_v15  ;;  %v2964_v19 = vpack.i.b16 %v2963_v16, %v2962_v3  ;;  %v2958_v21 = vsel %vm2025_vm2, 0, %v2957_v18  ;;  %v3335_v3 = vperm.slane %v3246_v10, %v7462_v20 }
 0x8da   : > { %v2967_v22 = vpack.i.b16 %v2958_v21, %v2939_v17  ;;  %v2969_v24 = vshrl.u32 %v2958_v21, 16  ;;  %v3232_v21 = vshrl.u32 %v3214_v44, 16 }
 0x8db   : > { %5631 = vmatmul.msk.bf16.vlgmr.msrb.gmra.mxu1 %vm2361_vm3, %v2964_v19 }
 0x8dc   : > { %5632 = vmatmul.msk.bf16.vlgmr.msrb.gmra.mxu2 %vm2361_vm3, %v2967_v22  ;;  %v2970_v26 = vpack.i.b16 %v2969_v24, %v2968_v23  ;;  %v3257_v22 = vperm.slane %v3231_v1, %v7462_v20  ;;  %v3317_v23 = vrot.slane %v3309_v5, 4 }
 0x8de   : > { %5633 = vmatmul.msk.bf16.vlgmr.msrb.gmra.mxu3 %vm2361_vm3, %v2970_v26 }
 0x956   : > { %v3478_v28 = vpop.f32.mrf.mxu0 }
 0x957   : > { %v3479_v30 = vadd.f32 %v5947_v27, %v3478_v28  ;;  %v3343_v28 = vrot.slane %v3335_v3, 4 }
 0x958   : > { %v3500_v31 = vpop.f32.mrf.mxu1 }
 0x959   : > { %v3501_v33 = vadd.f32 %v5947_v27, %v3500_v31  ;;  %v3548_v14 = vsel %vm2687_vm6, %v3479_v30, -inf }
 0x95a   : > { %3549 = vmax.xlane.f32.xlu2 %v3548_v14 }
 0x95b   : > { %v3551_v34 = vsel %vm2687_vm6, %v3501_v33, -inf }
 0x95c   : > { %3552 = vmax.xlane.f32.xlu1 %v3551_v34 }
 0x95e   : > { %v3480_v35 = vpop.f32.mrf.mxu0 }
 0x95f   : > { %v3522_v25 = vpop.f32.mrf.mxu2  ;;  %v3265_v35 = vrot.slane %v3257_v22, 4 }
 0x960   : > { %v3523_v36 = vadd.f32 %v5947_v27, %v3522_v25  ;;  %v3502_v29 = vpop.f32.mrf.mxu1 }
 0x961   : > { %v3544_v61 = vpop.f32.mrf.mxu3 }
 0x962   : > { %v3545_v37 = vadd.f32 %v5947_v27, %v3544_v61  ;;  %v3554_v38 = vsel %vm2687_vm6, %v3523_v36, -inf  ;;  %v3234_v27 = vpack.i.b16 %v3233_v7, %v3232_v21 }
 0x964   : > { %3555 = vmax.xlane.f32.xlu1 %v3554_v38  ;;  %v3557_v39 = vsel %vm2687_vm6, %v3545_v37, -inf  ;;  %v3283_v44 = vperm.slane %v3234_v27, %v7462_v20 }
 0x965   : > { %3558 = vmax.xlane.f32.xlu0 %v3557_v39  ;;  %v3238_v39 = vshrl.u32 %v7845_v43, 16 }
 0x967   : > { %v3524_v40 = vpop.f32.mrf.mxu2 }
 0x969   : > { %v3546_v41 = vpop.f32.mrf.mxu3 }
 0x972   : > { %3227 = vrot.lane.b32.xlu2 %v7697_v2, %s6777_s6 }
 0x979   : > { %3223 = vrot.lane.b32.xlu0 %v7711_v53, %s6777_s6 }
 0x97d   : > { %3225 = vrot.lane.b32.xlu1 %v7729_v9, %s6777_s6 }
 0x9cd   : > { %v3550_v47 = vpop.xlane.xlu2 %3549 }
 0x9ce   : > { %v3560_v50 = vsub.f32 %v3479_v30, %v3550_v47 }
 0x9cf   : > { %v3553_v8 = vpop.xlane.xlu1 %3552 }
 0x9d0   : > { %v3564_v52 = vmul.f32 1.442695, %v3560_v50  ;;  %v3561_v48 = vsub.f32 %v3501_v33, %v3553_v8 }
 0x9d2   : > { %5979 = vpow2.f32 %v3564_v52  ;;  %v3566_v56 = vmul.f32 1.442695, %v3561_v48 }
 0x9d5   : > { %v3228_v4 = vpop.permute.xlu2 %3227 }
 0x9d6   : > { %v3251_v17 = vshrl.u32 %v3228_v4, 16 }
 0x9d7   : > { %v3556_v45 = vpop.xlane.xlu1 %3555 }
 0x9d8   : > { %v7847_v46 = vpop.eup %5979  ;;  %v3562_v2 = vsub.f32 %v3523_v36, %v3556_v45  ;;  %v3559_v54 = vpop.xlane.xlu0 %3558 }
 0x9d9   : > { %v3563_v53 = vsub.f32 %v3545_v37, %v3559_v54  ;;  %v3572_v9 = vsel %vm2687_vm6, %v7847_v46, 0.0 }
 0x9da   : > { %v3568_v49 = vmul.f32 1.442695, %v3562_v2  ;;  %3573 = vadd.xlane.f32.xlu2 %v3572_v9 }
 0x9db   : > { %v3570_v55 = vmul.f32 1.442695, %v3563_v53 }
 0x9dc   : > { %5981 = vpow2.f32 %v3568_v49 }
 0x9dd   : > { %5983 = vpow2.f32 %v3570_v55  ;;  %v3291_v55 = vrot.slane %v3283_v44, 4 }
 0x9de   : > { %5985 = vpow2.f32 %v3566_v56 }
 0x9e2   : > { %v7851_v57 = vpop.eup %5981 }
 0x9e3   : > { %v7853_v59 = vpop.eup %5983  ;;  %v3578_v63 = vsel %vm2687_vm6, %v7851_v57, 0.0 }
 0x9e4   : > { %3579 = vadd.xlane.f32.xlu0 %v3578_v63  ;;  %v3581_v60 = vsel %vm2687_vm6, %v7853_v59, 0.0  ;;  %v7859_v11 = vpop.eup %5985 }
 0x9e5   : > { %3582 = vadd.xlane.f32.xlu1 %v3581_v60  ;;  %v3575_v16 = vsel %vm2687_vm6, %v7859_v11, 0.0 }
 0x9eb   : > { %v3224_v15 = vpop.permute.xlu0 %3223 }
 0x9ec   : > { %v3249_v18 = vpack.i.b16 %v3228_v4, %v3224_v15  ;;  %v3250_v19 = vshrl.u32 %v3224_v15, 16  ;;  %3576 = vadd.xlane.f32.xlu0 %v3575_v16 }
 0x9ee   : > { %v3252_v24 = vpack.i.b16 %v3251_v17, %v3250_v19  ;;  %v3314_v26 = vperm.slane %v3249_v18, %v7462_v20 }
 0x9ef   : > { %v3226_v30 = vpop.permute.xlu1 %3225 }
 0x9f0   : > { %v3315_v31 = vrot.slane %v3314_v26, 4  ;;  %v3318_v33 = vsel %vm2025_vm2, %v3314_v26, %v3317_v23  ;;  %v3340_v14 = vperm.slane %v3252_v24, %v7462_v20  ;;  %v3237_v34 = vpack.i.b16 %v3226_v30, %v7845_v43 }
 0x9f1   : > { %v3326_v25 = vperm.slane %v3318_v33, %v7471_v32  ;;  %v3239_v36 = vshrl.u32 %v3226_v30, 16 }
 0x9f2   : > { %v3316_v29 = vsel %vm2025_vm2, %v3315_v31, %v3309_v5  ;;  %v3341_v61 = vrot.slane %v3340_v14, 4  ;;  %v3344_v37 = vsel %vm2025_vm2, %v3340_v14, %v3343_v28  ;;  %v3262_v38 = vperm.slane %v3237_v34, %v7462_v20 }
 0x9f3   : > { %v3322_v40 = vperm.slane %v3316_v29, %v7471_v32  ;;  %v3329_v41 = vrot.slane %v3326_v25, 4  ;;  %v3352_v42 = vperm.slane %v3344_v37, %v7471_v32  ;;  %v3240_v43 = vpack.i.b16 %v3239_v36, %v3238_v39 }
 0x9f4   : > { %v3342_v6 = vsel %vm2025_vm2, %v3341_v61, %v3335_v3  ;;  %v3263_v47 = vrot.slane %v3262_v38, 4  ;;  %v3266_v50 = vsel %vm2025_vm2, %v3262_v38, %v3265_v35 }
 0x9f5   : > { %v3327_v8 = vrot.slane %v3322_v40, 4  ;;  %v3330_v51 = vsel %vm2025_vm2, 0, %v3329_v41  ;;  %v3348_v52 = vperm.slane %v3342_v6, %v7471_v32  ;;  %v3355_v45 = vrot.slane %v3352_v42, 4 }
 0x9f6   : > { %v3400_v2 = vrot.slane %v3330_v51, 4  ;;  %v3264_v54 = vsel %vm2025_vm2, %v3263_v47, %v3257_v22  ;;  %v3274_v53 = vperm.slane %v3266_v50, %v7471_v32  ;;  %v3395_v12 = vsel %vm2025_vm2, %v3329_v41, %v3322_v40 }
 0x9f7   : > { %v3328_v9 = vsel %vm2025_vm2, 0, %v3327_v8  ;;  %v3353_v48 = vrot.slane %v3348_v52, 4  ;;  %v3356_v49 = vsel %vm2025_vm2, 0, %v3355_v45  ;;  %v3270_v63 = vperm.slane %v3264_v54, %v7471_v32 }
 0x9f8   : > { %v3401_v56 = vsel %vm2025_vm2, %v3400_v2, %v3328_v9  ;;  %v3419_v62 = vrot.slane %v3356_v49, 4  ;;  %v3277_v10 = vrot.slane %v3274_v53, 4  ;;  %v3414_v1 = vsel %vm2025_vm2, %v3355_v45, %v3348_v52 }
 0x9f9   : > { %v3354_v60 = vsel %vm2025_vm2, 0, %v3353_v48  ;;  %v3405_v0 = vperm.slane %v3401_v56, %v7462_v20  ;;  %v3275_v5 = vrot.slane %v3270_v63, 4  ;;  %v3288_v7 = vperm.slane %v3240_v43, %v7462_v20 }
 0x9fa   : > { %v3420_v4 = vsel %vm2025_vm2, %v3419_v62, %v3354_v60  ;;  %v3278_v16 = vsel %vm2025_vm2, 0, %v3277_v10  ;;  %v3399_v17 = vperm.slane %v3395_v12, %v7462_v20  ;;  %v3418_v22 = vperm.slane %v3414_v1, %v7462_v20 }
 0x9fb   : > { %v3406_v3 = vrot.slane %v3405_v0, 4  ;;  %v3424_v15 = vperm.slane %v3420_v4, %v7462_v20  ;;  %v3276_v18 = vsel %vm2025_vm2, 0, %v3275_v5  ;;  %v3289_v19 = vrot.slane %v3288_v7, 4 }
 0x9fc   : > { %v3292_v21 = vsel %vm2025_vm2, %v3288_v7, %v3291_v55  ;;  %v3362_v24 = vrot.slane %v3278_v16, 4  ;;  %v3357_v28 = vsel %vm2025_vm2, %v3277_v10, %v3270_v63 }
 0x9fd   : > { %v3300_v23 = vperm.slane %v3292_v21, %v7471_v32  ;;  %v3425_v26 = vrot.slane %v3424_v15, 4  ;;  %v3290_v27 = vsel %vm2025_vm2, %v3289_v19, %v3283_v44  ;;  %v3407_v30 = vsel %vm2025_vm2, %v3406_v3, %v3399_v17 }
 0x9fe   : > { %v3296_v31 = vperm.slane %v3290_v27, %v7471_v32  ;;  %v3363_v14 = vsel %vm2025_vm2, %v3362_v24, %v3276_v18  ;;  %v3361_v61 = vperm.slane %v3357_v28, %v7462_v20  ;;  %v3411_v39 = vperm.slane %v3407_v30, %v7471_v32 }
 0x9ff   : > { %v3303_v33 = vrot.slane %v3300_v23, 4  ;;  %v3426_v34 = vsel %vm2025_vm2, %v3425_v26, %v3418_v22  ;;  %v3367_v35 = vperm.slane %v3363_v14, %v7462_v20 }
 0xa00   : > { %v3430_v25 = vperm.slane %v3426_v34, %v7471_v32  ;;  %v3301_v36 = vrot.slane %v3296_v31, 4  ;;  %v3412_v8 = vrot.slane %v3411_v39, 4  ;;  %v3448_v53 = vshrl.u32 %v3411_v39, 16 }
 0xa01   : > { %v3304_v29 = vsel %vm2025_vm2, 0, %v3303_v33  ;;  %v3368_v37 = vrot.slane %v3367_v35, 4  ;;  %v3376_v41 = vsel %vm2025_vm2, %v3303_v33, %v3296_v31 }
 0xa02   : > { %v3381_v38 = vrot.slane %v3304_v29, 4  ;;  %v3302_v40 = vsel %vm2025_vm2, 0, %v3301_v36  ;;  %v3431_v6 = vrot.slane %v3430_v25, 4  ;;  %v3380_v51 = vperm.slane %v3376_v41, %v7462_v20 }
 0xa03   : > { %v3369_v44 = vsel %vm2025_vm2, %v3368_v37, %v3361_v61  ;;  %v3449_v45 = vshrl.u32 %v3430_v25, 16  ;;  %v3447_v48 = vpack.i.b16 %v3430_v25, %v3411_v39  ;;  %v3413_v49 = vsel %vm2025_vm2, 0, %v3412_v8 }
 0xa04   : > { %v3382_v42 = vsel %vm2025_vm2, %v3381_v38, %v3302_v40  ;;  %v3373_v50 = vperm.slane %v3369_v44, %v7471_v32  ;;  %v3432_v43 = vsel %vm2025_vm2, 0, %v3431_v6  ;;  %v3454_v1 = vshrl.u32 %v3413_v49, 16 }
 0xa05   : > { %v3386_v47 = vperm.slane %v3382_v42, %v7462_v20  ;;  %v3450_v56 = vpack.i.b16 %v3449_v45, %v3448_v53  ;;  %v3455_v62 = vshrl.u32 %v3432_v43, 16  ;;  %v3453_v10 = vpack.i.b16 %v3432_v43, %v3413_v49 }
 0xa06   : > { %v3374_v2 = vrot.slane %v3373_v50, 4  ;;  %v3436_v55 = vshrl.u32 %v3373_v50, 16  ;;  %v3597_v5 = vunpack.c.l.b16 %v3447_v48 }
 0xa07   : > { %v3387_v52 = vrot.slane %v3386_v47, 4  ;;  %v3456_v18 = vpack.i.b16 %v3455_v62, %v3454_v1  ;;  %v3617_v22 = vunpack.c.l.b16 %v3450_v56  ;;  %v3637_v24 = vunpack.c.l.b16 %v3453_v10 }
 0xa08   : > { %v3375_v12 = vsel %vm2025_vm2, 0, %v3374_v2 }
 0xa09   : > { %v3388_v54 = vsel %vm2025_vm2, %v3387_v52, %v3380_v51  ;;  %v3442_v16 = vshrl.u32 %v3375_v12, 16  ;;  %v3657_v31 = vunpack.c.l.b16 %v3456_v18 }
 0xa0a   : > { %v3392_v9 = vperm.slane %v3388_v54, %v7471_v32 }
 0xa0c   : > { %v3435_v63 = vpack.i.b16 %v3392_v9, %v3373_v50  ;;  %v3437_v60 = vshrl.u32 %v3392_v9, 16  ;;  %v3393_v0 = vrot.slane %v3392_v9, 4 }
 0xa0e   : > { %v3596_v4 = vunpack.c.l.b16 %v3435_v63  ;;  %v3438_v7 = vpack.i.b16 %v3437_v60, %v3436_v55  ;;  %v3394_v3 = vsel %vm2025_vm2, 0, %v3393_v0 }
 0xa0f   : > { %v3441_v15 = vpack.i.b16 %v3394_v3, %v3375_v12  ;;  %v3443_v17 = vshrl.u32 %v3394_v3, 16 }
 0xa10   : > { %v3598_v19 = vpack.c.b16 %v3597_v5, %v3596_v4  ;;  %v3616_v21 = vunpack.c.l.b16 %v3438_v7 }
 0xa11   : > { %v3636_v23 = vunpack.c.l.b16 %v3441_v15  ;;  %v3444_v26 = vpack.i.b16 %v3443_v17, %v3442_v16 }
 0xa12   : > { %3610 = vmatpush.bf16.msra.mxu0 %v3598_v19  ;;  %v3618_v27 = vpack.c.b16 %v3617_v22, %v3616_v21 }
 0xa13   : > { %v3638_v28 = vpack.c.b16 %v3637_v24, %v3636_v23  ;;  %v3656_v30 = vunpack.c.l.b16 %v3444_v26 }
 0xa14   : > { %3630 = vmatpush.bf16.msra.mxu1 %v3618_v27 }
 0xa15   : > { %3650 = vmatpush.bf16.msra.mxu2 %v3638_v28  ;;  %v3658_v33 = vpack.c.b16 %v3657_v31, %v3656_v30 }
 0xa17   : > { %3670 = vmatpush.bf16.msra.mxu3 %v3658_v33 }
 0xa4d   : > { %v3574_v14 = vpop.xlane.xlu2 %3573 }
 0xa4e   : > { %5987 = vrcp.f32 %v3574_v14  ;;  %v3812_v37 = vand.u32 2147483648, %v3574_v14  ;;  %v3810_v40 = vand.u32 2147483647, %v3574_v14  ;;  %vm3806_vm13 = vweird.f32 %v3574_v14 }
 0xa50   : > { %v3813_v42 = vor.u32 1.1754944e-38, %v3812_v37  ;;  %vm3811_vm15 = vcmp.eq.f32.partialorder %v3810_v40, 8.507059e+37 }
 0xa54   : > { %v5988_v34 = vpop.eup %5987 }
 0xa55   : > { %v3802_v35 = vmul.f32 %v5988_v34, %v3574_v14  ;;  %v3588_v25 = vmul.f32 %v5988_v34, %v7847_v46  ;;  %vm3807_vm12 = vweird.f32 %v5988_v34 }
 0xa56   : > { %vm3808_vm14 = vmor %vm3806_vm13, %vm3807_vm12  ;;  %vm4813_vm13 = vcmask 523264  }
 0xa57   : > { %v3803_v36 = vsub.f32 1.0, %v3802_v35  ;;  %v3580_v29 = vpop.xlane.xlu0 %3579  ;;  %v3592_v61 = vpack.c.bf16 %v3588_v25, %v3588_v25 }
 0xa58   : > { %5989 = vrcp.f32 %v3580_v29  ;;  %v3583_v38 = vpop.xlane.xlu1 %3582 }
 0xa59   : > { %v3804_v39 = vmul.f32 %v5988_v34, %v3803_v36  ;;  %5991 = vrcp.f32 %v3583_v38  ;;  %5634 = vmatmul.msk.bf16.vlgmr.msra.gmra.mxu0 %vm2687_vm6, %v3592_v61 }
 0xa5b   : > { %v3805_v41 = vadd.f32 %v5988_v34, %v3804_v39 }
 0xa5d   : > { %v3809_v44 = vsel %vm3808_vm14, %v5988_v34, %v3805_v41 }
 0xa5e   : > { %v5990_v6 = vpop.eup %5989  ;;  %v3814_v47 = vsel %vm3811_vm15, %v3813_v42, %v3809_v44 }
 0xa5f   : > { %v5992_v50 = vpop.eup %5991  ;;  %v7928_v8 = vmul.f32 %v7847_v46, %v3814_v47  ;;  %v3590_v51 = vmul.f32 %v5990_v6, %v7851_v57  ;;  %v3577_v52 = vpop.xlane.xlu0 %3576 }
 0xa60   : > { %v3591_v45 = vmul.f32 %v5992_v50, %v7853_v59  ;;  %5993 = vrcp.f32 %v3577_v52 }
 0xa61   : > { %v3594_v2 = vpack.c.bf16 %v3590_v51, %v3590_v51 }
 0xa62   : > { %v3595_v43 = vpack.c.bf16 %v3591_v45, %v3591_v45 }
 0xa63   : > { %5636 = vmatmul.msk.bf16.vlgmr.msra.gmra.mxu2 %vm2687_vm6, %v3594_v2 }
 0xa64   : > { %5637 = vmatmul.msk.bf16.vlgmr.msra.gmra.mxu3 %vm2687_vm6, %v3595_v43 }
 0xa66   : > { %v5994_v54 = vpop.eup %5993 }
 0xa67   : > { %v3589_v53 = vmul.f32 %v5994_v54, %v7859_v11 }
 0xa69   : > { %v3593_v9 = vpack.c.bf16 %v3589_v53, %v3589_v53 }
 0xa6b   : > { %5635 = vmatmul.msk.bf16.vlgmr.msra.gmra.mxu1 %vm2687_vm6, %v3593_v9 }
 0xad6   : > { %v3612_v46 = vpop.f32.mrf.mxu0 }
 0xad7   : > { %v3678_v49 = vrot.slane %v3612_v46, 4 }
 0xade   : > { %v3614_v48 = vpop.f32.mrf.mxu0 }
 0xae6   : > { %v3652_v57 = vpop.f32.mrf.mxu2 }
 0xae7   : > { %v3676_v55 = vrot.slane %v3652_v57, 4  ;;  %v3679_v59 = vsel %vm2025_vm2, %v3652_v57, %v3678_v49  ;;  %v3672_v56 = vpop.f32.mrf.mxu3 }
 0xae8   : > { %v3687_v62 = vperm.slane %v3679_v59, %v7462_v20  ;;  %v3688_v63 = vrot.slane %v3672_v56, 4  ;;  %v3632_v60 = vpop.f32.mrf.mxu1 }
 0xae9   : > { %v3677_v12 = vsel %vm2025_vm2, %v3676_v55, %v3612_v46  ;;  %v3690_v0 = vrot.slane %v3632_v60, 4 }
 0xaea   : > { %v3683_v11 = vperm.slane %v3677_v12, %v7462_v20  ;;  %v3689_v10 = vsel %vm2025_vm2, %v3688_v63, %v3632_v60  ;;  %v3714_v7 = vrot.slane %v3687_v62, 4 }
 0xaeb   : > { %v3691_v1 = vsel %vm2025_vm2, %v3672_v56, %v3690_v0  ;;  %v3695_v4 = vperm.slane %v3689_v10, %v7462_v20  ;;  %v5738_v0 = vld [vmem:[%s8531_s27 + $0x8] sm:$0xff] }
 0xaec   : > { %v3702_v5 = vrot.slane %v3683_v11, 4  ;;  %v3699_v3 = vperm.slane %v3691_v1, %v7462_v20  ;;  %3846 = vmatpush.bf16.msrb.mxu0 %v5738_v0 }
 0xaed   : > { %v3700_v15 = vrot.slane %v3695_v4, 4 }
 0xaee   : > { %v3703_v16 = vsel %vm2025_vm2, %v3695_v4, %v3702_v5  ;;  %v3712_v17 = vrot.slane %v3699_v3, 4  ;;  %v3715_v18 = vsel %vm2025_vm2, %v3699_v3, %v3714_v7  ;;  %v3654_v19 = vpop.f32.mrf.mxu2 }
 0xaef   : > { %v3701_v21 = vsel %vm2025_vm2, %v3700_v15, %v3683_v11  ;;  %v3711_v22 = vperm.slane %v3703_v16, %v7471_v32  ;;  %v3723_v23 = vperm.slane %v3715_v18, %v7471_v32  ;;  %v3674_v24 = vpop.f32.mrf.mxu3  ;;  %v5737_v11 = vld [vmem:[%s8533_s26] sm:$0xff]  ;;  %v5742_v16 = vld [vmem:[%s8534_s0 + $0x8] sm:$0xff] }
 0xaf0   : > { %v3707_v26 = vperm.slane %v3701_v21, %v7471_v32  ;;  %v3713_v27 = vsel %vm2025_vm2, %v3712_v17, %v3687_v62  ;;  %v3634_v28 = vpop.f32.mrf.mxu1  ;;  %3847 = vmatpush.bf16.msrb.mxu0 %v5737_v11  ;;  %3953 = vmatpush.bf16.msrb.mxu2 %v5742_v16  ;;  %v5741_v17 = vld [vmem:[%s8535_s1] sm:$0xff] }
 0xaf1   : > { %v3719_v30 = vperm.slane %v3713_v27, %v7471_v32  ;;  %v3726_v31 = vrot.slane %v3711_v22, 4  ;;  %v3730_v33 = vrot.slane %v3723_v23, 4  ;;  %v1942_v18 = vld [vmem:[%s8532_s17] sm:$0xf] }
 0xaf2   : > { %v3724_v14 = vrot.slane %v3707_v26, 4  ;;  %v5948_v19 = vld [vmem:[%s8536_s7] ss:$0 sm:$0xff] }
 0xaf3   : > { %v3727_v34 = vsel %vm2025_vm2, 0.0, %v3726_v31  ;;  %v3728_v35 = vrot.slane %v3719_v30, 4  ;;  %v3731_v25 = vsel %vm2025_vm2, 0.0, %v3730_v33  ;;  %v3732_v36 = vsel %vm2025_vm2, %v3726_v31, %v3707_v26 }
 0xaf4   : > { %v3725_v29 = vsel %vm2025_vm2, 0.0, %v3724_v14  ;;  %v3736_v61 = vperm.slane %v3732_v36, %v7462_v20  ;;  %v3737_v37 = vrot.slane %v3727_v34, 4  ;;  %v3748_v38 = vrot.slane %v3731_v25, 4  ;;  %3954 = vmatpush.bf16.msrb.mxu2 %v5741_v17  ;;  %v5951_v14 = vld [vmem:[%s8537_s18] ss:$0 sm:$0xff]  ;;  %v5740_v36 = vld [vmem:[%s8538_s22 + $0x8] sm:$0xff] }
 0xaf5   : > { %v3729_v39 = vsel %vm2025_vm2, 0.0, %v3728_v35  ;;  %v3743_v40 = vsel %vm2025_vm2, %v3730_v33, %v3719_v30  ;;  %3916 = vmatpush.bf16.msrb.mxu1 %v5740_v36 }
 0xaf6   : > { %v3738_v41 = vsel %vm2025_vm2, %v3737_v37, %v3725_v29  ;;  %v3747_v42 = vperm.slane %v3743_v40, %v7462_v20  ;;  %v3749_v44 = vsel %vm2025_vm2, %v3748_v38, %v3729_v39  ;;  %v3756_v6 = vrot.slane %v3736_v61, 4  ;;  %v5739_v29 = vld [vmem:[%s8539_s11] sm:$0xff] }
 0xaf7   : > { %v3742_v47 = vperm.slane %v3738_v41, %v7462_v20  ;;  %v3753_v50 = vperm.slane %v3749_v44, %v7462_v20  ;;  %5664 = vmatmul.msk.bf16.vlgmr.msrb.gmra.mxu2 %vm1977_vm1, %v1942_v18 }
 0xaf8   : > { %v3768_v51 = vrot.slane %v3747_v42, 4 }
 0xaf9   : > { %v3757_v52 = vsel %vm2025_vm2, %v3742_v47, %v3756_v6  ;;  %v3754_v45 = vrot.slane %v3742_v47, 4  ;;  %v3766_v2 = vrot.slane %v3753_v50, 4  ;;  %3917 = vmatpush.bf16.msrb.mxu1 %v5739_v29  ;;  %v5949_v47 = vld [vmem:[%s8540_s16] ss:$0 sm:$0xff] }
 0xafa   : > { %v3765_v43 = vperm.slane %v3757_v52, %v7471_v32  ;;  %v3769_v54 = vsel %vm2025_vm2, %v3753_v50, %v3768_v51  ;;  %v5950_v51 = vld [vmem:[%s8541_s23] ss:$0 sm:$0xff] }
 0xafb   : > { %v3777_v53 = vperm.slane %v3769_v54, %v7471_v32  ;;  %v3755_v9 = vsel %vm2025_vm2, %v3754_v45, %v3736_v61  ;;  %v3767_v46 = vsel %vm2025_vm2, %v3766_v2, %v3747_v42 }
 0xafc   : > { %v3784_v48 = vrot.slane %v3765_v43, 4  ;;  %v3761_v49 = vperm.slane %v3755_v9, %v7471_v32  ;;  %v3773_v57 = vperm.slane %v3767_v46, %v7471_v32 }
 0xafd   : > { %v3782_v55 = vrot.slane %v3777_v53, 4 }
 0xafe   : > { %v3785_v59 = vsel %vm2025_vm2, %v3777_v53, %v3784_v48  ;;  %v3778_v56 = vrot.slane %v3773_v57, 4  ;;  %v3780_v62 = vrot.slane %v3761_v49, 4 }
 0xaff   : > { %3795 = vrot.lane.b32.xlu0 %v3785_v59, %s6783_s9  ;;  %v3783_v63 = vsel %vm2025_vm2, %v3782_v55, %v3765_v43 }
 0xb00   : > { %3791 = vrot.lane.b32.xlu2 %v3783_v63, %s6784_s12  ;;  %v3781_v60 = vsel %vm2025_vm2, %v3773_v57, %v3780_v62  ;;  %v3779_v12 = vsel %vm2025_vm2, %v3778_v56, %v3761_v49 }
 0xb01   : > { %3787 = vrot.lane.b32.xlu1 %v3781_v60, %s6785_s25 }
 0xb5a   : > { %v3792_v1 = vpop.permute.xlu2 %3791 }
 0xb71   : > { %v3796_v5 = vpop.permute.xlu0 %3795 }
 0xb73   : > { %v3788_v10 = vpop.permute.xlu1 %3787 }
 0xb74   : > { %v3798_v4 = vsel %vm2361_vm3, %v3779_v12, %v3788_v10 }
 0xb75   : > { %v3799_v7 = vsel %vm2687_vm6, %v3798_v4, %v3792_v1 }
 0xb76   : > { %v3800_v3 = vsel %vm2689_vm7, %v3799_v7, %v3796_v5 }
 0xb77   : > { %v3816_v15 = vpack.c.bf16 %v3800_v3, %v3800_v3 }
 0xb79   : > { %5646 = vmatmul.msk.bf16.vlgmr.msrb.gmra.mxu0 %vm1977_vm1, %v3816_v15 }
 0xb7a   : > { %v3956_v34 = vpop.f32.mrf.mxu2 }
 0xb7b   : > { %v3957_v35 = vadd.f32 %v5951_v14, %v3956_v34 }
 0xb7d   : > { %v3960_v25 = vpack.c.bf16 %v3957_v35, %v3957_v35 }
 0xb7f   : > { %4083 = vrot.lane.b32.xlu0 %v3960_v25, %s6776_s19  ;;  %v4092_v53 = vshrl.u32 %v3960_v25, 16 }
 0xb87   : > { %4085 = vrot.lane.b32.xlu0 %v3960_v25, %s6778_s20 }
 0xb8f   : > { %4087 = vrot.lane.b32.xlu0 %v3960_v25, %s6775_s3 }
 0xbf1   : > { %v8019_v54 = vpop.permute.xlu0 %4083 }
 0xbf2   : > { %v4093_v9 = vshrl.u32 %v8019_v54, 16  ;;  %v4091_v48 = vpack.i.b16 %v8019_v54, %v3960_v25 }
 0xbf4   : > { %v4094_v49 = vpack.i.b16 %v4093_v9, %v4092_v53  ;;  %v4105_v57 = vperm.slane %v4091_v48, %v7462_v20 }
 0xbf6   : > { %v3849_v21 = vpop.f32.mrf.mxu0  ;;  %v4131_v55 = vperm.slane %v4094_v49, %v7462_v20  ;;  %v4113_v62 = vrot.slane %v4105_v57, 4 }
 0xbf7   : > { %v3850_v22 = vadd.f32 %v5948_v19, %v3849_v21 }
 0xbf8   : > { %v4139_v12 = vrot.slane %v4131_v55, 4 }
 0xbf9   : > { %v3853_v23 = vadd.f32 %v3850_v22, %v7717_v58  ;;  %v3958_v58 = vpop.f32.mrf.mxu2  ;;  %v4086_v46 = vpop.permute.xlu0 %4085 }
 0xbfa   : > { %v4098_v59 = vshrl.u32 %v4086_v46, 16 }
 0xbfb   : > { %v3854_v24 = vsel %vm1977_vm1, %v3853_v23, 0.0 }
 0xbfc   : > { %3855 = vadd.xlane.f32.xlu1 %v3854_v24 }
 0xbfe   : > { %v3851_v26 = vpop.f32.mrf.mxu0 }
 0xc01   : > { %v8026_v56 = vpop.permute.xlu0 %4087 }
 0xc02   : > { %v4097_v63 = vpack.i.b16 %v8026_v56, %v4086_v46  ;;  %v4099_v60 = vshrl.u32 %v8026_v56, 16 }
 0xc04   : > { %v4100_v0 = vpack.i.b16 %v4099_v60, %v4098_v59  ;;  %v4110_v11 = vperm.slane %v4097_v63, %v7462_v20 }
 0xc06   : > { %v4111_v10 = vrot.slane %v4110_v11, 4  ;;  %v4114_v1 = vsel %vm2025_vm2, %v4110_v11, %v4113_v62  ;;  %v4136_v4 = vperm.slane %v4100_v0, %v7462_v20  ;;  %v5952_v62 = vld [vmem:[%s8542_s2] ss:$0 sm:$0xff] }
 0xc07   : > { %v4122_v5 = vperm.slane %v4114_v1, %v7471_v32 }
 0xc08   : > { %v4112_v7 = vsel %vm2025_vm2, %v4111_v10, %v4105_v57  ;;  %v4137_v3 = vrot.slane %v4136_v4, 4  ;;  %v4140_v15 = vsel %vm2025_vm2, %v4136_v4, %v4139_v12 }
 0xc09   : > { %v4118_v16 = vperm.slane %v4112_v7, %v7471_v32  ;;  %v4125_v17 = vrot.slane %v4122_v5, 4  ;;  %v4148_v18 = vperm.slane %v4140_v15, %v7471_v32 }
 0xc0a   : > { %v4138_v19 = vsel %vm2025_vm2, %v4137_v3, %v4131_v55 }
 0xc0b   : > { %v4123_v21 = vrot.slane %v4118_v16, 4  ;;  %v4126_v22 = vsel %vm2025_vm2, 0, %v4125_v17  ;;  %v4151_v24 = vrot.slane %v4148_v18, 4  ;;  %v4153_v14 = vsel %vm2025_vm2, %v4125_v17, %v4118_v16 }
 0xc0c   : > { %v4158_v26 = vrot.slane %v4126_v22, 4  ;;  %v4157_v29 = vperm.slane %v4153_v14, %v7462_v20 }
 0xc6f   : > { %v3856_v27 = vpop.xlane.xlu1 %3855 }
 0xc70   : > { %v3857_v28 = vmul.f32 %v3856_v27, %v7670_v13  ;;  %v4124_v27 = vsel %vm2025_vm2, 0, %v4123_v21 }
 0xc71   : > { %v4159_v34 = vsel %vm2025_vm2, %v4158_v26, %v4124_v27 }
 0xc72   : > { %v3858_v30 = vsub.f32 %v3853_v23, %v3857_v28  ;;  %v4144_v23 = vperm.slane %v4138_v19, %v7471_v32 }
 0xc74   : > { %v3859_v31 = vmul.f32 %v3858_v30, %v3858_v30  ;;  %v4149_v28 = vrot.slane %v4144_v23, 4  ;;  %v4172_v36 = vsel %vm2025_vm2, %v4151_v24, %v4144_v23 }
 0xc76   : > { %v3860_v33 = vsel %vm1977_vm1, %v3859_v31, 0.0 }
 0xc77   : > { %3861 = vadd.xlane.f32.xlu2 %v3860_v33  ;;  %v4150_v33 = vsel %vm2025_vm2, 0, %v4149_v28 }
 0xc8f   : > { %4203 = vrot.lane.b32.xlu2 %v3960_v25, %s6777_s6  ;;  %v4163_v25 = vperm.slane %v4159_v34, %v7462_v20 }
 0xc97   : > { %4207 = vrot.lane.b32.xlu2 %v4086_v46, %s6777_s6 }
 0xcea   : > { %v3862_v61 = vpop.xlane.xlu2 %3861 }
 0xceb   : > { %v3863_v37 = vmul.f32 %v3862_v61, %v7670_v13  ;;  %v4164_v61 = vrot.slane %v4163_v25, 4 }
 0xced   : > { %v3864_v38 = vadd.f32 1e-06, %v3863_v37  ;;  %v4176_v37 = vperm.slane %v4172_v36, %v7462_v20 }
 0xcef   : > { %5995 = vrsqrt.f32 %v3864_v38  ;;  %vm3871_vm4 = vweird.f32 %v3864_v38 }
 0xcf5   : > { %v5996_v39 = vpop.eup %5995 }
 0xcf6   : > { %v3866_v40 = vmul.f32 %v5996_v39, %v3864_v38  ;;  %vm3872_vm0 = vweird.f32 %v5996_v39 }
 0xcf7   : > { %vm3873_vm8 = vmor %vm3871_vm4, %vm3872_vm0 }
 0xcf8   : > { %v3867_v41 = vmul.f32 %v5996_v39, %v3866_v40 }
 0xcfa   : > { %v3868_v42 = vmul.f32 0.5, %v3867_v41 }
 0xcfc   : > { %v3869_v44 = vsub.f32 1.5, %v3868_v42 }
 0xcfe   : > { %v3870_v6 = vmul.f32 %v5996_v39, %v3869_v44 }
 0xd00   : > { %v3874_v50 = vsel %vm3873_vm8, %v5996_v39, %v3870_v6  ;;  %v4165_v39 = vsel %vm2025_vm2, %v4164_v61, %v4157_v29 }
 0xd01   : > { %v3875_v52 = vmul.f32 %v3874_v50, %v3858_v30  ;;  %v4152_v30 = vsel %vm2025_vm2, 0, %v4151_v24  ;;  %v4169_v41 = vperm.slane %v4165_v39, %v7471_v32 }
 0xd02   : > { %v4177_v31 = vrot.slane %v4152_v30, 4 }
 0xd03   : > { %v3880_v45 = vmul.f32 %v5949_v47, %v3875_v52  ;;  %v4194_v6 = vshrl.u32 %v4169_v41, 16  ;;  %v4170_v50 = vrot.slane %v4169_v41, 4 }
 0xd04   : > { %v4178_v35 = vsel %vm2025_vm2, %v4177_v31, %v4150_v33 }
 0xd05   : > { %v8014_v2 = vadd.f32 %v5950_v51, %v3880_v45  ;;  %v4182_v58 = vperm.slane %v4178_v35, %v7462_v20 }
 0xd07   : > { %v3886_v43 = vpack.c.bf16 %v8014_v2, %v8014_v2  ;;  %v4183_v38 = vrot.slane %v4182_v58, 4 }
 0xd09   : > { %5655 = vmatmul.msk.bf16.vlgmr.msrb.gmra.mxu1 %vm1977_vm1, %v3886_v43  ;;  %v4184_v40 = vsel %vm2025_vm2, %v4183_v38, %v4176_v37  ;;  %v4171_v43 = vsel %vm2025_vm2, 0, %v4170_v50 }
 0xd0a   : > { %v4188_v42 = vperm.slane %v4184_v40, %v7471_v32  ;;  %v4200_v9 = vshrl.u32 %v4171_v43, 16 }
 0xd0c   : > { %v4193_v44 = vpack.i.b16 %v4188_v42, %v4169_v41  ;;  %v4195_v47 = vshrl.u32 %v4188_v42, 16  ;;  %v4189_v51 = vrot.slane %v4188_v42, 4 }
 0xd0e   : > { %v4332_v52 = vsel %vm2361_vm3, %v4193_v44, 0  ;;  %v4196_v45 = vpack.i.b16 %v4195_v47, %v4194_v6  ;;  %v4190_v53 = vsel %vm2025_vm2, 0, %v4189_v51 }
 0xd0f   : > { %4341 = vmatpush.bf16.xpose.msrb.mxu3 %v4332_v52  ;;  %v4199_v48 = vpack.i.b16 %v4190_v53, %v4171_v43  ;;  %v4201_v49 = vshrl.u32 %v4190_v53, 16 }
 0xd10   : > { %v4351_v46 = vsel %vm2361_vm3, %v4196_v45, 0 }
 0xd11   : > { %4360 = vmatpush.bf16.xpose.msra.mxu0 %v4351_v46  ;;  %v4370_v57 = vsel %vm2361_vm3, %v4199_v48, 0  ;;  %v4202_v55 = vpack.i.b16 %v4201_v49, %v4200_v9 }
 0xd12   : > { %4379 = vmatpush.bf16.xpose.msra.mxu1 %v4370_v57 }
 0xd13   : > { %v4389_v59 = vsel %vm2361_vm3, %v4202_v55, 0 }
 0xd14   : > { %4398 = vmatpush.bf16.xpose.msra.mxu2 %v4389_v59 }
 0xd86   : > { %v3919_v63 = vpop.f32.mrf.mxu1 }
 0xd87   : > { %v3920_v60 = vadd.f32 %v5952_v62, %v3919_v63 }
 0xd89   : > { %v3923_v12 = vpack.c.bf16 %v3920_v60, %v3920_v60 }
 0xd8b   : > { %3962 = vrot.lane.b32.xlu0 %v3923_v12, %s6776_s19  ;;  %v3971_v5 = vshrl.u32 %v3923_v12, 16  ;;  %s8546_s19 = scalar_lea.vmem [#allocation23], %s8525_s29 }
 0xd8e   : > { %v3921_v0 = vpop.f32.mrf.mxu1 }
 0xd93   : > { %3964 = vrot.lane.b32.xlu0 %v3923_v12, %s6778_s20 }
 0xd9b   : > { %3966 = vrot.lane.b32.xlu0 %v3923_v12, %s6775_s3 }
 0xdfd   : > { %v3963_v11 = vpop.permute.xlu0 %3962 }
 0xdfe   : > { %v3972_v1 = vshrl.u32 %v3963_v11, 16  ;;  %v3970_v4 = vpack.i.b16 %v3963_v11, %v3923_v12 }
 0xe00   : > { %v3973_v7 = vpack.i.b16 %v3972_v1, %v3971_v5  ;;  %v3984_v3 = vperm.slane %v3970_v4, %v7462_v20 }
 0xe02   : > { %v4010_v16 = vperm.slane %v3973_v7, %v7462_v20  ;;  %v3992_v21 = vrot.slane %v3984_v3, 4 }
 0xe04   : > { %v4018_v24 = vrot.slane %v4010_v16, 4 }
 0xe05   : > { %v3965_v10 = vpop.permute.xlu0 %3964 }
 0xe06   : > { %v3977_v17 = vshrl.u32 %v3965_v10, 16 }
 0xe0d   : > { %v3967_v15 = vpop.permute.xlu0 %3966 }
 0xe0e   : > { %v3976_v18 = vpack.i.b16 %v3967_v15, %v3965_v10  ;;  %v3978_v19 = vshrl.u32 %v3967_v15, 16 }
 0xe10   : > { %v3979_v22 = vpack.i.b16 %v3978_v19, %v3977_v17  ;;  %v3989_v23 = vperm.slane %v3976_v18, %v7462_v20 }
 0xe12   : > { %v3990_v26 = vrot.slane %v3989_v23, 4  ;;  %v3993_v27 = vsel %vm2025_vm2, %v3989_v23, %v3992_v21  ;;  %v4015_v28 = vperm.slane %v3979_v22, %v7462_v20 }
 0xe13   : > { %v4001_v30 = vperm.slane %v3993_v27, %v7471_v32 }
 0xe14   : > { %v3991_v31 = vsel %vm2025_vm2, %v3990_v26, %v3984_v3  ;;  %v4016_v33 = vrot.slane %v4015_v28, 4  ;;  %v4019_v14 = vsel %vm2025_vm2, %v4015_v28, %v4018_v24  ;;  %v5953_v3 = vld [vmem:[%s1898_s30] ss:$0 sm:$0xff]  ;;  %s8544_s30 = scalar_lea.vmem [#allocation21], %s8520_s10 }
 0xe15   : > { %v3997_v34 = vperm.slane %v3991_v31, %v7471_v32  ;;  %v4004_v35 = vrot.slane %v4001_v30, 4  ;;  %v4027_v25 = vperm.slane %v4019_v14, %v7471_v32  ;;  %s8545_s4 = smov %s8544_s30 }
 0xe16   : > { %v4017_v58 = vsel %vm2025_vm2, %v4016_v33, %v4010_v16 }
 0xe17   : > { %v4002_v36 = vrot.slane %v3997_v34, 4  ;;  %v4005_v29 = vsel %vm2025_vm2, 0, %v4004_v35  ;;  %v4023_v61 = vperm.slane %v4017_v58, %v7471_v32  ;;  %v4030_v37 = vrot.slane %v4027_v25, 4 }
 0xe18   : > { %v4037_v38 = vrot.slane %v4005_v29, 4  ;;  %v4032_v42 = vsel %vm2025_vm2, %v4004_v35, %v3997_v34  ;;  %v4204_v34 = vpop.permute.xlu2 %4203 }
 0xe19   : > { %v4003_v39 = vsel %vm2025_vm2, 0, %v4002_v36  ;;  %v4028_v40 = vrot.slane %v4023_v61, 4  ;;  %v4031_v41 = vsel %vm2025_vm2, 0, %v4030_v37  ;;  %v4051_v51 = vsel %vm2025_vm2, %v4030_v37, %v4023_v61 }
 0xe1a   : > { %v4038_v44 = vsel %vm2025_vm2, %v4037_v38, %v4003_v39  ;;  %v4056_v6 = vrot.slane %v4031_v41, 4  ;;  %v4036_v45 = vperm.slane %v4032_v42, %v7462_v20  ;;  %v4055_v9 = vperm.slane %v4051_v51, %v7462_v20 }
 0xe1b   : > { %v4029_v47 = vsel %vm2025_vm2, 0, %v4028_v40  ;;  %v4042_v50 = vperm.slane %v4038_v44, %v7462_v20 }
 0xe1c   : > { %v4057_v52 = vsel %vm2025_vm2, %v4056_v6, %v4029_v47 }
 0xe1d   : > { %v4043_v43 = vrot.slane %v4042_v50, 4  ;;  %v4061_v53 = vperm.slane %v4057_v52, %v7462_v20 }
 0xe1f   : > { %v4062_v46 = vrot.slane %v4061_v53, 4  ;;  %v4044_v48 = vsel %vm2025_vm2, %v4043_v43, %v4036_v45 }
 0xe20   : > { %v4048_v49 = vperm.slane %v4044_v48, %v7471_v32  ;;  %v4208_v25 = vpop.permute.xlu2 %4207 }
 0xe21   : > { %v4063_v57 = vsel %vm2025_vm2, %v4062_v46, %v4055_v9  ;;  %v4220_v9 = vshrl.u32 %v4208_v25, 16 }
 0xe22   : > { %v4067_v55 = vperm.slane %v4063_v57, %v7471_v32  ;;  %v4049_v59 = vrot.slane %v4048_v49, 4  ;;  %v4073_v62 = vshrl.u32 %v4048_v49, 16 }
 0xe24   : > { %v4072_v63 = vpack.i.b16 %v4067_v55, %v4048_v49  ;;  %v4074_v60 = vshrl.u32 %v4067_v55, 16  ;;  %v4050_v12 = vsel %vm2025_vm2, 0, %v4049_v59  ;;  %v4068_v0 = vrot.slane %v4067_v55, 4 }
 0xe25   : > { %v4079_v4 = vshrl.u32 %v4050_v12, 16  ;;  %v4214_v55 = vshrl.u32 %v4204_v34, 16 }
 0xe26   : > { %5665 = vmatmul.msk.bf16.vlgmr.msrb.gmra.mxu3 %vm2361_vm3, %v4072_v63  ;;  %v4075_v11 = vpack.i.b16 %v4074_v60, %v4073_v62  ;;  %v4069_v10 = vsel %vm2025_vm2, 0, %v4068_v0 }
 0xe27   : > { %v4078_v1 = vpack.i.b16 %v4069_v10, %v4050_v12  ;;  %v4080_v5 = vshrl.u32 %v4069_v10, 16 }
 0xe28   : > { %5666 = vmatmul.msk.bf16.vlgmr.msra.gmra.mxu0 %vm2361_vm3, %v4075_v11 }
 0xe29   : > { %5667 = vmatmul.msk.bf16.vlgmr.msra.gmra.mxu1 %vm2361_vm3, %v4078_v1  ;;  %v4081_v7 = vpack.i.b16 %v4080_v5, %v4079_v4 }
 0xe2b   : > { %5668 = vmatmul.msk.bf16.vlgmr.msra.gmra.mxu2 %vm2361_vm3, %v4081_v7 }
 0xea5   : > { %v4362_v15 = vpop.f32.mrf.mxu0 }
 0xea6   : > { %v4363_v16 = vadd.f32 %v5953_v3, %v4362_v15  ;;  %v4381_v17 = vpop.f32.mrf.mxu1 }
 0xea7   : > { %v4382_v18 = vadd.f32 %v5953_v3, %v4381_v17 }
 0xea8   : > { %v4407_v19 = vsel %vm2361_vm3, %v4363_v16, -inf }
 0xea9   : > { %4408 = vmax.xlane.f32.xlu1 %v4407_v19  ;;  %v4343_v21 = vpop.f32.mrf.mxu3  ;;  %v4410_v22 = vsel %vm2361_vm3, %v4382_v18, -inf }
 0xeaa   : > { %4411 = vmax.xlane.f32.xlu0 %v4410_v22  ;;  %v4344_v23 = vadd.f32 %v5953_v3, %v4343_v21 }
 0xeac   : > { %v4404_v30 = vsel %vm2361_vm3, %v4344_v23, -inf }
 0xead   : > { %v4364_v24 = vpop.f32.mrf.mxu0 }
 0xeae   : > { %v4383_v26 = vpop.f32.mrf.mxu1  ;;  %v4400_v27 = vpop.f32.mrf.mxu2 }
 0xeaf   : > { %v4401_v28 = vadd.f32 %v5953_v3, %v4400_v27 }
 0xeb1   : > { %v4345_v31 = vpop.f32.mrf.mxu3  ;;  %4405 = vmax.xlane.f32.xlu1 %v4404_v30  ;;  %v4413_v33 = vsel %vm2361_vm3, %v4401_v28, -inf }
 0xeb2   : > { %4414 = vmax.xlane.f32.xlu2 %v4413_v33 }
 0xeb6   : > { %v4402_v14 = vpop.f32.mrf.mxu2 }
 0xeca   : > { %4205 = vrot.lane.b32.xlu1 %v8019_v54, %s6777_s6  ;;  %4209 = vrot.lane.b32.xlu2 %v8026_v56, %s6777_s6  ;;  %s8547_s6 = scalar_lea.vmem [#allocation27], %s8520_s10  ;;  %s8552_s10 = scalar_lea.vmem [#allocation30], %s8525_s29 }
 0xecb   : > { %s8548_s20 = smov %s8547_s6 }
 0xf1c   : > { %v4409_v35 = vpop.xlane.xlu1 %4408 }
 0xf1d   : > { %v4412_v58 = vpop.xlane.xlu0 %4411  ;;  %v4417_v29 = vsub.f32 %v4363_v16, %v4409_v35 }
 0xf1e   : > { %v4418_v36 = vsub.f32 %v4382_v18, %v4412_v58 }
 0xf1f   : > { %v4422_v37 = vmul.f32 1.442695, %v4417_v29 }
 0xf20   : > { %v4424_v61 = vmul.f32 1.442695, %v4418_v36 }
 0xf22   : > { %5997 = vpow2.f32 %v4424_v61 }
 0xf23   : > { %5999 = vpow2.f32 %v4422_v37 }
 0xf24   : > { %v4406_v38 = vpop.xlane.xlu1 %4405 }
 0xf25   : > { %v4416_v39 = vsub.f32 %v4344_v23, %v4406_v38  ;;  %v4415_v40 = vpop.xlane.xlu2 %4414 }
 0xf26   : > { %v4419_v41 = vsub.f32 %v4401_v28, %v4415_v40 }
 0xf27   : > { %v4420_v42 = vmul.f32 1.442695, %v4416_v39 }
 0xf28   : > { %v8112_v44 = vpop.eup %5997  ;;  %v4426_v54 = vmul.f32 1.442695, %v4419_v41 }
 0xf29   : > { %6001 = vpow2.f32 %v4420_v42  ;;  %v4434_v56 = vsel %vm2361_vm3, %v8112_v44, 0.0  ;;  %v8116_v6 = vpop.eup %5999 }
 0xf2a   : > { %6003 = vpow2.f32 %v4426_v54  ;;  %4435 = vadd.xlane.f32.xlu0 %v4434_v56  ;;  %v4431_v52 = vsel %vm2361_vm3, %v8116_v6, 0.0 }
 0xf2d   : > { %v4210_v43 = vpop.permute.xlu2 %4209 }
 0xf2e   : > { %v4221_v53 = vshrl.u32 %v4210_v43, 16  ;;  %v4219_v46 = vpack.i.b16 %v4210_v43, %v4208_v25 }
 0xf2f   : > { %v8118_v47 = vpop.eup %6001 }
 0xf30   : > { %v8120_v50 = vpop.eup %6003  ;;  %v4428_v51 = vsel %vm2361_vm3, %v8118_v47, 0.0  ;;  %v4222_v48 = vpack.i.b16 %v4221_v53, %v4220_v9  ;;  %v4232_v49 = vperm.slane %v4219_v46, %v7462_v20 }
 0xf31   : > { %4429 = vadd.xlane.f32.xlu1 %v4428_v51  ;;  %v4437_v45 = vsel %vm2361_vm3, %v8120_v50, 0.0 }
 0xf32   : > { %4432 = vadd.xlane.f32.xlu0 %v4431_v52  ;;  %4438 = vadd.xlane.f32.xlu2 %v4437_v45  ;;  %v4258_v59 = vperm.slane %v4222_v48, %v7462_v20  ;;  %v4233_v60 = vrot.slane %v4232_v49, 4 }
 0xf34   : > { %v4259_v11 = vrot.slane %v4258_v59, 4 }
 0xf3c   : > { %v4206_v57 = vpop.permute.xlu1 %4205 }
 0xf3d   : > { %v4213_v62 = vpack.i.b16 %v4206_v57, %v4204_v34  ;;  %v4215_v63 = vshrl.u32 %v4206_v57, 16 }
 0xf3f   : > { %v4216_v12 = vpack.i.b16 %v4215_v63, %v4214_v55  ;;  %v4227_v0 = vperm.slane %v4213_v62, %v7462_v20 }
 0xf41   : > { %v4234_v10 = vsel %vm2025_vm2, %v4233_v60, %v4227_v0  ;;  %v4235_v1 = vrot.slane %v4227_v0, 4  ;;  %v4253_v4 = vperm.slane %v4216_v12, %v7462_v20 }
 0xf42   : > { %v4240_v5 = vperm.slane %v4234_v10, %v7471_v32 }
 0xf43   : > { %v4236_v7 = vsel %vm2025_vm2, %v4232_v49, %v4235_v1  ;;  %v4260_v3 = vsel %vm2025_vm2, %v4259_v11, %v4253_v4  ;;  %v4261_v15 = vrot.slane %v4253_v4, 4 }
 0xf44   : > { %v4244_v16 = vperm.slane %v4236_v7, %v7471_v32  ;;  %v4266_v17 = vperm.slane %v4260_v3, %v7471_v32  ;;  %v4245_v19 = vrot.slane %v4240_v5, 4 }
 0xf45   : > { %v4262_v18 = vsel %vm2025_vm2, %v4258_v59, %v4261_v15 }
 0xf46   : > { %v4247_v21 = vrot.slane %v4244_v16, 4  ;;  %v4270_v22 = vperm.slane %v4262_v18, %v7471_v32  ;;  %v4271_v24 = vrot.slane %v4266_v17, 4  ;;  %v4246_v28 = vsel %vm2025_vm2, 0, %v4245_v19 }
 0xf48   : > { %v4248_v23 = vsel %vm2025_vm2, 0, %v4247_v21  ;;  %v4273_v26 = vrot.slane %v4270_v22, 4  ;;  %v4275_v31 = vsel %vm2025_vm2, %v4247_v21, %v4240_v5  ;;  %v4272_v34 = vsel %vm2025_vm2, 0, %v4271_v24 }
 0xf49   : > { %v4280_v27 = vrot.slane %v4248_v23, 4  ;;  %v4279_v36 = vperm.slane %v4275_v31, %v7462_v20 }
 0xf4a   : > { %v4274_v30 = vsel %vm2025_vm2, 0, %v4273_v26  ;;  %v4294_v25 = vsel %vm2025_vm2, %v4273_v26, %v4266_v17 }
 0xf4b   : > { %v4281_v33 = vsel %vm2025_vm2, %v4280_v27, %v4246_v28  ;;  %v4299_v14 = vrot.slane %v4274_v30, 4  ;;  %v4298_v38 = vperm.slane %v4294_v25, %v7462_v20 }
 0xf4c   : > { %v4285_v35 = vperm.slane %v4281_v33, %v7462_v20 }
 0xf4d   : > { %v4300_v58 = vsel %vm2025_vm2, %v4299_v14, %v4272_v34 }
 0xf4e   : > { %v4286_v29 = vrot.slane %v4285_v35, 4  ;;  %v4304_v61 = vperm.slane %v4300_v58, %v7462_v20 }
 0xf50   : > { %v4287_v37 = vsel %vm2025_vm2, %v4286_v29, %v4279_v36  ;;  %v4305_v39 = vrot.slane %v4304_v61, 4 }
 0xf51   : > { %v4291_v40 = vperm.slane %v4287_v37, %v7471_v32 }
 0xf52   : > { %v4306_v41 = vsel %vm2025_vm2, %v4305_v39, %v4298_v38 }
 0xf53   : > { %v4310_v42 = vperm.slane %v4306_v41, %v7471_v32  ;;  %v4292_v54 = vrot.slane %v4291_v40, 4  ;;  %v4316_v56 = vshrl.u32 %v4291_v40, 16 }
 0xf55   : > { %v4315_v51 = vpack.i.b16 %v4310_v42, %v4291_v40  ;;  %v4317_v52 = vshrl.u32 %v4310_v42, 16  ;;  %v4293_v45 = vsel %vm2025_vm2, 0, %v4292_v54  ;;  %v4311_v43 = vrot.slane %v4310_v42, 4 }
 0xf56   : > { %v4322_v49 = vshrl.u32 %v4293_v45, 16 }
 0xf57   : > { %v4456_v53 = vsel %vm2489_vm5, %v4315_v51, 0  ;;  %v4318_v9 = vpack.i.b16 %v4317_v52, %v4316_v56  ;;  %v4312_v46 = vsel %vm2025_vm2, 0, %v4311_v43 }
 0xf58   : > { %4465 = vmatpush.bf16.msra.mxu3 %v4456_v53  ;;  %v4321_v48 = vpack.i.b16 %v4312_v46, %v4293_v45  ;;  %v4323_v57 = vshrl.u32 %v4312_v46, 16 }
 0xf59   : > { %v4475_v55 = vsel %vm2489_vm5, %v4318_v9, 0 }
 0xf5a   : > { %4484 = vmatpush.bf16.msrb.mxu0 %v4475_v55  ;;  %v4494_v59 = vsel %vm2489_vm5, %v4321_v48, 0  ;;  %v4324_v62 = vpack.i.b16 %v4323_v57, %v4322_v49 }
 0xf5b   : > { %4503 = vmatpush.bf16.msrb.mxu1 %v4494_v59 }
 0xf5c   : > { %v4513_v63 = vsel %vm2489_vm5, %v4324_v62, 0 }
 0xf5d   : > { %4522 = vmatpush.bf16.msrb.mxu2 %v4513_v63 }
 0xf9d   : > { %v4436_v60 = vpop.xlane.xlu0 %4435 }
 0xf9e   : > { %6005 = vrcp.f32 %v4436_v60 }
 0xfa4   : > { %v6006_v12 = vpop.eup %6005  ;;  %v4430_v0 = vpop.xlane.xlu1 %4429 }
 0xfa5   : > { %v4446_v11 = vmul.f32 %v6006_v12, %v8112_v44  ;;  %6007 = vrcp.f32 %v4430_v0  ;;  %v4433_v10 = vpop.xlane.xlu0 %4432  ;;  %v4439_v1 = vpop.xlane.xlu2 %4438  ;;  %v4664_v21 = vand.u32 2147483648, %v4430_v0  ;;  %v4662_v24 = vand.u32 2147483647, %v4430_v0 }
 0xfa6   : > { %6009 = vrcp.f32 %v4433_v10  ;;  %vm4658_vm9 = vweird.f32 %v4430_v0 }
 0xfa7   : > { %v4450_v4 = vpack.c.bf16 %v4446_v11, %v4446_v11  ;;  %6011 = vrcp.f32 %v4439_v1  ;;  %vm4663_vm11 = vcmp.eq.f32.partialorder %v4662_v24, 8.507059e+37 }
 0xfa9   : > { %5671 = vmatmul.msk.bf16.vlgmr.msrb.gmra.mxu1 %vm2361_vm3, %v4450_v4 }
 0xfab   : > { %v6008_v5 = vpop.eup %6007 }
 0xfac   : > { %v6010_v7 = vpop.eup %6009  ;;  %v4654_v3 = vmul.f32 %v6008_v5, %v4430_v0  ;;  %v4444_v15 = vmul.f32 %v6008_v5, %v8118_v47  ;;  %vm4659_vm5 = vweird.f32 %v6008_v5 }
 0xfad   : > { %v6012_v16 = vpop.eup %6011  ;;  %v4445_v17 = vmul.f32 %v6010_v7, %v8116_v6  ;;  %vm4660_vm10 = vmor %vm4658_vm9, %vm4659_vm5  ;;  %v4665_v6 = vor.u32 1.1754944e-38, %v4664_v21 }
 0xfae   : > { %v4655_v18 = vsub.f32 1.0, %v4654_v3  ;;  %v4447_v19 = vmul.f32 %v6012_v16, %v8120_v50  ;;  %v4448_v44 = vpack.c.bf16 %v4444_v15, %v4444_v15 }
 0xfaf   : > { %v4449_v22 = vpack.c.bf16 %v4445_v17, %v4445_v17 }
 0xfb0   : > { %v4656_v23 = vmul.f32 %v6008_v5, %v4655_v18  ;;  %v4451_v26 = vpack.c.bf16 %v4447_v19, %v4447_v19  ;;  %5669 = vmatmul.msk.bf16.vlgmr.msra.gmra.mxu3 %vm2361_vm3, %v4448_v44 }
 0xfb1   : > { %5670 = vmatmul.msk.bf16.vlgmr.msrb.gmra.mxu0 %vm2361_vm3, %v4449_v22 }
 0xfb2   : > { %v4657_v27 = vadd.f32 %v6008_v5, %v4656_v23  ;;  %5672 = vmatmul.msk.bf16.vlgmr.msrb.gmra.mxu2 %vm2361_vm3, %v4451_v26 }
 0xfb4   : > { %v4661_v28 = vsel %vm4660_vm10, %v6008_v5, %v4657_v27 }
 0xfb5   : > { %v4666_v50 = vsel %vm4663_vm11, %v4665_v6, %v4661_v28 }
 0xfb6   : > { %v8171_v30 = vmul.f32 %v8118_v47, %v4666_v50 }
0x1026   : > { %v4505_v31 = vpop.f32.mrf.mxu1 }
0x1027   : > { %v4528_v34 = vrot.slane %v4505_v31, 4 }
0x102e   : > { %v4486_v33 = vpop.f32.mrf.mxu0  ;;  %v4507_v14 = vpop.f32.mrf.mxu1 }
0x102f   : > { %v4542_v25 = vrot.slane %v4486_v33, 4 }
0x1033   : > { %v4467_v35 = vpop.f32.mrf.mxu3 }
0x1034   : > { %v4529_v58 = vsel %vm2025_vm2, %v4528_v34, %v4467_v35  ;;  %v4530_v36 = vrot.slane %v4467_v35, 4 }
0x1035   : > { %v4535_v29 = vperm.slane %v4529_v58, %v7462_v20  ;;  %v4524_v61 = vpop.f32.mrf.mxu2 }
0x1036   : > { %v4531_v37 = vsel %vm2025_vm2, %v4505_v31, %v4530_v36  ;;  %v4540_v38 = vrot.slane %v4524_v61, 4  ;;  %v4543_v39 = vsel %vm2025_vm2, %v4524_v61, %v4542_v25  ;;  %v4488_v40 = vpop.f32.mrf.mxu0 }
0x1037   : > { %v4539_v47 = vperm.slane %v4531_v37, %v7462_v20  ;;  %v4554_v41 = vrot.slane %v4535_v29, 4  ;;  %v4551_v42 = vperm.slane %v4543_v39, %v7462_v20 }
0x1038   : > { %v4541_v54 = vsel %vm2025_vm2, %v4540_v38, %v4486_v33  ;;  %v5743_v38 = vld [vmem:[%s8545_s4] sm:$0xff] }
0x1039   : > { %v4566_v56 = vrot.slane %v4539_v47, 4  ;;  %v4547_v51 = vperm.slane %v4541_v54, %v7462_v20  ;;  %v4564_v52 = vrot.slane %v4551_v42, 4 }
0x103b   : > { %v4552_v45 = vrot.slane %v4547_v51, 4  ;;  %v4555_v43 = vsel %vm2025_vm2, %v4547_v51, %v4554_v41  ;;  %v4565_v53 = vsel %vm2025_vm2, %v4564_v52, %v4539_v47  ;;  %v4567_v9 = vsel %vm2025_vm2, %v4551_v42, %v4566_v56  ;;  %v4469_v46 = vpop.f32.mrf.mxu3  ;;  %v5954_v51 = vld [vmem:[%s8546_s19] ss:$0 sm:$0xff] }
0x103c   : > { %v4563_v48 = vperm.slane %v4555_v43, %v7471_v32  ;;  %v4571_v49 = vperm.slane %v4565_v53, %v7471_v32  ;;  %v4575_v57 = vperm.slane %v4567_v9, %v7471_v32 }
0x103d   : > { %v4553_v55 = vsel %vm2025_vm2, %v4552_v45, %v4535_v29  ;;  %v4526_v59 = vpop.f32.mrf.mxu2 }
0x103e   : > { %v4559_v62 = vperm.slane %v4553_v55, %v7471_v32  ;;  %v4578_v63 = vrot.slane %v4563_v48, 4  ;;  %v4580_v60 = vrot.slane %v4571_v49, 4  ;;  %v4582_v12 = vrot.slane %v4575_v57, 4  ;;  %v5746_v59 = vld [vmem:[%s8547_s6 + $0x8] sm:$0xff] }
0x103f   : > { %4768 = vmatpush.bf16.msra.mxu0 %v5746_v59 }
0x1040   : > { %v4576_v0 = vrot.slane %v4559_v62, 4  ;;  %v4579_v11 = vsel %vm2025_vm2, 0.0, %v4578_v63  ;;  %v4583_v10 = vsel %vm2025_vm2, 0.0, %v4582_v12  ;;  %v4595_v4 = vsel %vm2025_vm2, %v4582_v12, %v4571_v49  ;;  %v5749_v12 = vld [vmem:[%s7431_s21 + $0x10] sm:$0xff] }
0x1041   : > { %v4589_v1 = vrot.slane %v4579_v11, 4  ;;  %v4600_v5 = vrot.slane %v4583_v10, 4  ;;  %v4584_v7 = vsel %vm2025_vm2, %v4578_v63, %v4559_v62  ;;  %v4581_v3 = vsel %vm2025_vm2, 0.0, %v4580_v60  ;;  %v5745_v62 = vld [vmem:[%s8548_s20] sm:$0xff] }
0x1042   : > { %v4599_v15 = vperm.slane %v4595_v4, %v7462_v20  ;;  %v4577_v16 = vsel %vm2025_vm2, 0.0, %v4576_v0  ;;  %v4588_v17 = vperm.slane %v4584_v7, %v7462_v20 }
0x1043   : > { %v4590_v18 = vsel %vm2025_vm2, %v4589_v1, %v4577_v16  ;;  %v4601_v19 = vsel %vm2025_vm2, %v4600_v5, %v4581_v3  ;;  %4769 = vmatpush.bf16.msra.mxu0 %v5745_v62 }
0x1044   : > { %v4594_v44 = vperm.slane %v4590_v18, %v7462_v20  ;;  %v4605_v21 = vperm.slane %v4601_v19, %v7462_v20  ;;  %v4608_v22 = vrot.slane %v4588_v17, 4  ;;  %v4620_v23 = vrot.slane %v4599_v15, 4 }
0x1046   : > { %v4609_v24 = vsel %vm2025_vm2, %v4594_v44, %v4608_v22  ;;  %v4621_v26 = vsel %vm2025_vm2, %v4605_v21, %v4620_v23  ;;  %v4606_v27 = vrot.slane %v4594_v44, 4  ;;  %v4618_v6 = vrot.slane %v4605_v21, 4  ;;  %v5748_v44 = vld [vmem:[%s7431_s21 + $0x8] sm:$0xff]  ;;  %v5747_v21 = vld [vmem:[%s7431_s21] sm:$0xff] }
0x1047   : > { %v4629_v28 = vperm.slane %v4621_v26, %v7471_v32  ;;  %v4617_v33 = vperm.slane %v4609_v24, %v7471_v32 }
0x1048   : > { %v4607_v50 = vsel %vm2025_vm2, %v4606_v27, %v4588_v17  ;;  %v4619_v31 = vsel %vm2025_vm2, %v4618_v6, %v4599_v15 }
0x1049   : > { %v4634_v14 = vrot.slane %v4629_v28, 4  ;;  %v4613_v20 = vperm.slane %v4607_v50, %v7471_v32  ;;  %v4625_v34 = vperm.slane %v4619_v31, %v7471_v32  ;;  %v4636_v61 = vrot.slane %v4617_v33, 4  ;;  %v5744_v32 = vld [vmem:[%s8544_s30 + $0x8] sm:$0xff] }
0x104a   : > { %4698 = vmatpush.bf16.msrb.mxu3 %v5744_v32 }
0x104b   : > { %v4635_v35 = vsel %vm2025_vm2, %v4634_v14, %v4617_v33  ;;  %v4630_v25 = vrot.slane %v4625_v34, 4  ;;  %v4632_v58 = vrot.slane %v4613_v20, 4  ;;  %v4637_v37 = vsel %vm2025_vm2, %v4629_v28, %v4636_v61  ;;  %v5958_v28 = vld [vmem:[%s8552_s10] ss:$0 sm:$0xff] }
0x104c   : > { %4643 = vrot.lane.b32.xlu1 %v4635_v35, %s6784_s12  ;;  %s8550_s12 = scalar_lea.vmem [#allocation26], %s8525_s29 }
0x104d   : > { %v4633_v36 = vsel %vm2025_vm2, %v4625_v34, %v4632_v58  ;;  %v4631_v29 = vsel %vm2025_vm2, %v4630_v25, %v4613_v20  ;;  %v5956_v16 = vld [vmem:[%s8550_s12] ss:$0 sm:$0xff] }
0x104e   : > { %4639 = vrot.lane.b32.xlu0 %v4633_v36, %s6785_s25  ;;  %4699 = vmatpush.bf16.msrb.mxu3 %v5743_v38  ;;  %s8551_s25 = scalar_lea.vmem [#allocation29], %s8525_s29 }
0x104f   : > { %v5957_v22 = vld [vmem:[%s8551_s25] ss:$0 sm:$0xff] }
0x1056   : > { %4647 = vrot.lane.b32.xlu0 %v4637_v37, %s6783_s9  ;;  %s8549_s9 = scalar_lea.vmem [#allocation24], %s8525_s29 }
0x1057   : > { %v5955_v3 = vld [vmem:[%s8549_s9] ss:$0 sm:$0xff] }
0x10be   : > { %v4644_v47 = vpop.permute.xlu1 %4643 }
0x10c0   : > { %v4640_v39 = vpop.permute.xlu0 %4639 }
0x10c1   : > { %v4650_v40 = vsel %vm2361_vm3, %v4631_v29, %v4640_v39 }
0x10c2   : > { %v4651_v42 = vsel %vm2687_vm6, %v4650_v40, %v4644_v47 }
0x10c8   : > { %v4648_v41 = vpop.permute.xlu0 %4647 }
0x10c9   : > { %v4652_v54 = vsel %vm2689_vm7, %v4651_v42, %v4648_v41 }
0x10ca   : > { %v4668_v56 = vpack.c.bf16 %v4652_v54, %v4652_v54 }
0x10cc   : > { %5681 = vmatmul.msk.bf16.vlgmr.msrb.gmra.mxu3 %vm1977_vm1, %v4668_v56 }
0x114f   : > { %v4701_v52 = vpop.f32.mrf.mxu3 }
0x1150   : > { %v4702_v45 = vadd.f32 %v5954_v51, %v4701_v52 }
0x1152   : > { %v4705_v43 = vadd.f32 %v4702_v45, %v8014_v2  ;;  %v5750_v2 = vld [vmem:[%s7431_s21 + $0x18] sm:$0xff] }
0x1153   : > { %4821 = vmatpush.bf16.msra.mxu1 %v5750_v2 }
0x1154   : > { %v4706_v53 = vsel %vm1977_vm1, %v4705_v43, 0.0 }
0x1155   : > { %4707 = vadd.xlane.f32.xlu2 %v4706_v53 }
0x1157   : > { %v4703_v9 = vpop.f32.mrf.mxu3  ;;  %4822 = vmatpush.bf16.msra.mxu1 %v5749_v12 }
0x115b   : > { %4823 = vmatpush.bf16.msra.mxu1 %v5748_v44 }
0x115f   : > { %4824 = vmatpush.bf16.msra.mxu1 %v5747_v21 }
0x11c8   : > { %v4708_v46 = vpop.xlane.xlu2 %4707 }
0x11c9   : > { %v4709_v48 = vmul.f32 %v4708_v46, %v7670_v13 }
0x11cb   : > { %v4710_v49 = vsub.f32 %v4705_v43, %v4709_v48 }
0x11cd   : > { %v4711_v57 = vmul.f32 %v4710_v49, %v4710_v49 }
0x11cf   : > { %v4712_v55 = vsel %vm1977_vm1, %v4711_v57, 0.0 }
0x11d0   : > { %4713 = vadd.xlane.f32.xlu0 %v4712_v55 }
0x1243   : > { %v4714_v63 = vpop.xlane.xlu0 %4713 }
0x1244   : > { %v4715_v60 = vmul.f32 %v4714_v63, %v7670_v13 }
0x1246   : > { %v4716_v0 = vadd.f32 1e-06, %v4715_v60 }
0x1248   : > { %6013 = vrsqrt.f32 %v4716_v0  ;;  %vm4723_vm7 = vweird.f32 %v4716_v0 }
0x124e   : > { %v6014_v11 = vpop.eup %6013 }
0x124f   : > { %v4718_v10 = vmul.f32 %v6014_v11, %v4716_v0  ;;  %vm4724_vm2 = vweird.f32 %v6014_v11 }
0x1250   : > { %vm4725_vm12 = vmor %vm4723_vm7, %vm4724_vm2 }
0x1251   : > { %v4719_v1 = vmul.f32 %v6014_v11, %v4718_v10 }
0x1253   : > { %v4720_v4 = vmul.f32 0.5, %v4719_v1 }
0x1255   : > { %v4721_v5 = vsub.f32 1.5, %v4720_v4 }
0x1257   : > { %v4722_v7 = vmul.f32 %v6014_v11, %v4721_v5 }
0x1259   : > { %v4726_v13 = vsel %vm4725_vm12, %v6014_v11, %v4722_v7 }
0x125a   : > { %v4727_v15 = vmul.f32 %v4726_v13, %v4710_v49 }
0x125c   : > { %v4732_v17 = vmul.f32 %v5955_v3, %v4727_v15 }
0x125e   : > { %v4737_v18 = vadd.f32 %v5956_v16, %v4732_v17 }
0x1260   : > { %v4738_v19 = vpack.c.bf16 %v4737_v18, %v4737_v18 }
0x1262   : > { %5690 = vmatmul.msk.bf16.vlgmr.msra.gmra.mxu0 %vm1977_vm1, %v4738_v19 }
0x12df   : > { %v4771_v23 = vpop.f32.mrf.mxu0 }
0x12e0   : > { %v4772_v24 = vadd.f32 %v5957_v22, %v4771_v23 }
0x12e2   : > { %v4775_v26 = vmax.f32 %v4772_v24, 0.0 }
0x12e4   : > { %v4776_v27 = vpack.c.bf16 %v4775_v26, %v4775_v26 }
0x12e6   : > { %5707 = vmatmul.msk.bf16.vlgmr.msra.gmra.mxu1 %vm4813_vm13, %v4776_v27 }
0x12e7   : > { %v4773_v6 = vpop.f32.mrf.mxu0 }
0x1363   : > { %v4826_v50 = vpop.f32.mrf.mxu1 }
0x1364   : > { %v4827_v31 = vadd.f32 %v5958_v28, %v4826_v50 }
0x1366   : > { %v4830_v33 = vadd.f32 %v4827_v31, %v4705_v43 }
0x1367   : > { %4835 = sbr.rel (%p5708_p4) target bundleno = 4975 (0x136f), region = 228 }
0x1368   : > { %4831 = vst.msk [vmem:[#allocation2] sm:$0xff] %vm1977_vm1, %v4830_v33 }
0x136b   : > { %v4828_v14 = vpop.f32.mrf.mxu1 }
0x136c   : > { %4836 = vst.msk [vmem:[%s1862_s14] sm:$0xff] %vm1977_vm1, %v4830_v33 }
0x136d   : > { %4837 = vst.msk [vmem:[%s1869_s15] sm:$0xff] %vm2687_vm6, %v7928_v8 }
0x136e   : > { %4838 = vst.msk [vmem:[%s1876_s24] sm:$0xff] %vm2361_vm3, %v8171_v30 }
0x136f PF: > { %s8554_s21 = sld [smem:[#allocation89_spill]]  ;;  %s4876_s26 = sshll.u32 %s1869_s15, 4  ;;  %s4877_s26 = int_to_ptr.vmem [resolvable:$true] %s4876_s26 }
0x1370   : > { %s8555_s29 = sld [smem:[#allocation81_spill]] }
0x1371   : > { %s8556_s13 = sld [smem:[#allocation102_spill]] }
0x1375   : > { %s8262_s27 = sshll.u32 %s8554_s21, 3 }
0x1376   : > { %s4874_s17 = scalar_lea.hbm %s8555_s29, %s8262_s27  ;;  %s6539_s22 = scalar_lea.hbm %s8555_s29, 16 }
0x1377   : > { %s4878_s0 = sshll.u32 %s4874_s17, 4  ;;  %s4845_s1 = scalar_lea.sflag [#allocation34], %s8556_s13  ;;  %s4879_s0 = int_to_ptr.hbm [resolvable:$true] %s4878_s0 }
0x1378   : > { %s6533_s7 = sshra.s32 %s4879_s0, 4  ;;  %s6534_s7 = int_to_ptr.hbm [resolvable:$true] %s6533_s7 }
0x1379   : > { %s6535_s18 = scalar_lea.hbm %s6534_s7, 8  ;;  %p6540_p9 = scmp.lt.s32.totalorder %s6534_s7, %s8555_s29 }
0x137a   : > { %p6536_p5 = scmp.ne.s32.totalorder %s6534_s7, %s6535_s18  ;;  %p6541_p10 = scmp.lt.s32.totalorder %s6539_s22, %s6535_s18 }
0x137c   : > { %p6537_p6 = pnand %p6536_p5, %p7059_p12  ;;  %p6542_p11 = por %p6541_p10, %p6540_p9 }
0x137e   : > { %p6538_p7 = pneg %p6537_p6 }
0x1380   : > { %p6543_p13 = pnand %p6542_p11, %p6538_p7 }
0x1382   : > { %6546 = shalt.err (!%p6543_p13)
}
0x1383   : > { %s8558_s15 = sld [smem:[#allocation80_spill]]  ;;  %s4862_s30 = sshll.u32 %s1862_s14, 4  ;;  %s4863_s30 = int_to_ptr.vmem [resolvable:$true] %s4862_s30 }
0x1384   : > { %s8560_s16 = sld [smem:[#allocation82_spill]] }
0x1385   : > { %s8562_s23 = sld [smem:[#allocation84_spill]] }
0x1386   : > { %5788 = dma.vmem_to_hbm [thread:$0]  (%p7059_p12), %s4877_s26, 128, %s4879_s0, %s4845_s1  }
0x1389   : > { %s8559_s11 = smov %s8558_s15  ;;  %s4860_s2 = scalar_lea.hbm %s8558_s15, %s8262_s27 }
0x138a   : > { %s8561_s3 = smov %s8560_s16  ;;  %s4864_s4 = sshll.u32 %s4860_s2, 4  ;;  %s4865_s4 = int_to_ptr.hbm [resolvable:$true] %s4864_s4 }
0x138b   : > { %s4888_s19 = scalar_lea.hbm %s8560_s16, %s8262_s27  ;;  %s8563_s6 = sand.u32 1, %s8562_s23  }
0x138c   : > { %s4840_s20 = scalar_lea.sflag [#allocation5], %s8563_s6  ;;  %s6561_s9 = sshra.s32 %s4865_s4, 4  ;;  %s6562_s9 = int_to_ptr.hbm [resolvable:$true] %s6561_s9 }
0x138d   : > { %s6563_s12 = scalar_lea.hbm %s6562_s9, 8  ;;  %s6567_s25 = scalar_lea.hbm %s8559_s11, 16 }
0x138e   : > { %p6564_p0 = scmp.ne.s32.totalorder %s6562_s9, %s6563_s12  ;;  %p6568_p2 = scmp.lt.s32.totalorder %s6562_s9, %s8559_s11 }
0x138f   : > { %p6569_p4 = scmp.lt.s32.totalorder %s6567_s25, %s6563_s12 }
0x1390   : > { %p6565_p3 = pnand %p6564_p0, %p7059_p12 }
0x1391   : > { %p6570_p5 = por %p6569_p4, %p6568_p2 }
0x1392   : > { %p6566_p8 = pneg %p6565_p3 }
0x1394   : > { %p6571_p6 = pnand %p6570_p5, %p6566_p8 }
0x1396   : > { %6574 = shalt.err (!%p6571_p6)
}
0x1397   : > { %5787 = dma.vmem_to_hbm [thread:$0]  (%p7059_p12), %s4863_s30, 128, %s4865_s4, %s4840_s20  }
0x1398   : > { %s4890_s14 = sshll.u32 %s1876_s24, 4  ;;  %s4892_s10 = sshll.u32 %s4888_s19, 4  ;;  %s4891_s14 = int_to_ptr.vmem [resolvable:$true] %s4890_s14  ;;  %s4893_s10 = int_to_ptr.hbm [resolvable:$true] %s4892_s10 }
0x1399   : > { %s6589_s8 = sshra.s32 %s4893_s10, 4  ;;  %s6595_s27 = scalar_lea.hbm %s8561_s3, 16  ;;  %s6590_s8 = int_to_ptr.hbm [resolvable:$true] %s6589_s8 }
0x139a   : > { %s6591_s21 = scalar_lea.hbm %s6590_s8, 8  ;;  %p6596_p11 = scmp.lt.s32.totalorder %s6590_s8, %s8561_s3 }
0x139b   : > { %p6592_p7 = scmp.ne.s32.totalorder %s6590_s8, %s6591_s21  ;;  %p6597_p13 = scmp.lt.s32.totalorder %s6595_s27, %s6591_s21 }
0x139d   : > { %p6593_p9 = pnand %p6592_p7, %p7059_p12  ;;  %p6598_p0 = por %p6597_p13, %p6596_p11 }
0x139f   : > { %p6594_p10 = pneg %p6593_p9 }
0x13a1   : > { %p6599_p3 = pnand %p6598_p0, %p6594_p10 }
0x13a3   : > { %6602 = shalt.err (!%p6599_p3)
}
0x13a4   : > { %5789 = dma.vmem_to_hbm [thread:$0]  (%p7059_p12), %s4891_s14, 128, %s4893_s10, %s4845_s1  }
0x13a5 PF: > { %s8564_s24 = sld [smem:[#allocation92_spill]] }
0x13a6   : > { %s8565_s28 = sld [smem:[#allocation83_spill]] }
0x13ab   : > { %p5803_p8 = scmp.ge.s32.totalorder %s8564_s24, 2 }
0x13ac   : > { %s4904_s26 = sand.u32 1, %s8565_s28  }
0x13ad   : > { %p5794_p2 = pnand %p5803_p8, %p7067_p1  ;;  %s4905_s0 = scalar_lea.sflag [#allocation5], %s4904_s26 }
0x13af   : > { %p5795_p4 = pneg %p5794_p2 }
0x13b1   : > { %6688 = dma.done.wait (%p5795_p4), %s4905_s0, 128  }
0x13b2   : > { %6690 = vsyncadd (%p5795_p4), %s4905_s0, 4294967168  ;;  %s8567_s7 = sadd.s32 4294967294, %s8564_s24  }
0x13b3   : > { %s4914_s18 = sand.u32 1, %s8567_s7  }
0x13b4   : > { %s4915_s22 = scalar_lea.sflag [#allocation34], %s4914_s18 }
0x13b5   : > { %6692 = dma.done.wait (%p5795_p4), %s4915_s22, 256  }
0x13b6   : > { %6694 = vsyncadd (%p5795_p4), %s4915_s22, 4294967040  ;;  %s116_s7 = sadd.s32 1, %s8564_s24   ;;  %s8568_s0 = sld [smem:[#allocation84_spill]] }
0x13b7   : > { %p113_p12 = scmp.ge.s32.totalorder %s116_s7, 6   ;;  %s8569_s15 = sld [smem:[#allocation85_spill]] }
0x13b8   : > { %s8570_s16 = sld [smem:[#allocation98_spill]] }
0x13b9   : > { %s8571_s18 = sld [smem:[#allocation86_spill]] }
0x13ba   : > { %s8572_s22 = sld [smem:[#allocation87_spill]] }
0x13bb   : > { %s8573_s23 = sld [smem:[#allocation96_spill]]  ;;  %115 = sbr.rel (!%p113_p12) target bundleno = 107 (0x6b), region = 514 }
0x13bc   : > { %s8574_s26 = sld [smem:[#allocation90_spill]] }
0x13bd   : > { %s8575_s28 = sld [smem:[#allocation91_spill]] }
0x13be   : > { %s8576_s1 = sld [smem:[#allocation94_spill]] }
0x13bf   : > { %s8577_s2 = sld [smem:[#allocation95_spill]] }
0x13c0   :  { %4931 = vsyncpa [#allocation4], 1 }
0x13c1   :  { %4933 = vsyncpa [#allocation4 + $0x1], 1 }
0x13c2   :  { %4934 = vsyncpa [#allocation7], 1 }
0x13c3   :  { %4936 = vsyncpa [#allocation7 + $0x1], 1 }
0x13c4   :  { %4937 = vsyncpa [#allocation10], 1 }
0x13c5   :  { %4939 = vsyncpa [#allocation10 + $0x1], 1 }
0x13c6   :  { %4940 = vsyncpa [#allocation13], 1 }
0x13c7   :  { %4942 = vsyncpa [#allocation13 + $0x1], 1 }
0x13c8   :  { %4943 = vsyncpa [#allocation16], 1 }
0x13c9   :  { %4945 = vsyncpa [#allocation16 + $0x1], 1 }
0x13ca   :  { %4946 = vsyncpa [#allocation19], 1 }
0x13cb   :  { %4948 = vsyncpa [#allocation19 + $0x1], 1 }
0x13cc   :  { %4949 = vsyncpa [#allocation22], 1 }
0x13cd   :  { %4951 = vsyncpa [#allocation22 + $0x1], 1 }
0x13ce   :  { %4952 = vsyncpa [#allocation25], 1 }
0x13cf   :  { %4954 = vsyncpa [#allocation25 + $0x1], 1 }
0x13d0   :  { %4955 = vsyncpa [#allocation28], 1 }
0x13d1   :  { %4957 = vsyncpa [#allocation28 + $0x1], 1 }
0x13d2   :  { %4958 = vsyncpa [#allocation31], 1 }
0x13d3   :  { %4960 = vsyncpa [#allocation31 + $0x1], 1 }
0x13d4   :  { %4961 = vsyncpa [#allocation5], 1 }
0x13d5   :  { %4963 = vsyncpa [#allocation5 + $0x1], 1 }
0x13d6   :  { %4964 = vsyncpa [#allocation34], 1 }
0x13d7   :  { %4966 = vsyncpa [#allocation34 + $0x1], 1 }

</bundles_post_ra>
